<compile_context>
chip_gen: v7x
topology: tpu7x:2x2x1
jax: 0.10.0
libtpu: 0.0.40
codegen_flags: <defaults>
</compile_context>

<pallas_src>
import jax
import jax.numpy as jnp
from jax import lax
from jax.experimental import pallas as pl
from jax.experimental.pallas import tpu as pltpu


def _pick_batch_tile(B):
    """Batch tile: whole B if small, else a multiple of 8 dividing B."""
    if B <= 8:
        return B
    for bt in (64, 32, 16, 8):
        if B % bt == 0:
            return bt
    return B  # fallback: whole batch per step (always legal)


def _pick_spatial_tile(S, max_tile=512):
    """Spatial tile: a multiple of 128 that divides S, else the full extent."""
    if S <= max_tile:
        return S
    for st in range(max_tile, 127, -128):
        if S % st == 0:
            return st
    return S  # no aligned divisor: single full-extent block


def channel_attention(x, w1, w2):
    B, C, H, W = x.shape
    Cr = w1.shape[0]
    assert w1.shape == (Cr, C), w1.shape
    assert w2.shape == (C, Cr), w2.shape

    S = H * W
    x3 = x.reshape(B, C, S)          # lane-dense: spatial on the 128-lane axis

    bt = _pick_batch_tile(B)
    st = _pick_spatial_tile(S)
    grid = (B // bt, S // st)        # (parallel batch tiles, spatial reduction)
    inv_s = 1.0 / float(S)

    def kernel(x_ref, w1_ref, w2_ref, o_ref, sum_sc, max_sc):
        s_idx = pl.program_id(1)

        xb = x_ref[...]                          # (bt, C, st)
        psum = jnp.sum(xb, axis=2)               # (bt, C) partial sum
        pmax = jnp.max(xb, axis=2)               # (bt, C) partial max

        @pl.when(s_idx == 0)
        def _():
            sum_sc[...] = jnp.zeros_like(sum_sc)
            max_sc[...] = jnp.full_like(max_sc, -jnp.inf)

        sum_sc[...] = sum_sc[...] + psum
        max_sc[...] = jnp.maximum(max_sc[...], pmax)

        @pl.when(s_idx == pl.num_programs(1) - 1)
        def _():
            avg = sum_sc[...] * inv_s            # (bt, C)
            mx = max_sc[...]                     # (bt, C)
            # Shared MLP applied to both pooled vectors in one pass.
            pooled = jnp.concatenate([avg, mx], axis=0)          # (2*bt, C)
            hidden = lax.dot_general(
                pooled, w1_ref[...], (((1,), (1,)), ((), ())),
                preferred_element_type=jnp.float32)              # (2*bt, Cr)
            hidden = jnp.maximum(hidden, 0.0)                    # ReLU
            mlp = lax.dot_general(
                hidden, w2_ref[...], (((1,), (1,)), ((), ())),
                preferred_element_type=jnp.float32)              # (2*bt, C)
            out = jax.nn.sigmoid(mlp[:bt] + mlp[bt:])            # (bt, C)
            o_ref[...] = out.astype(o_ref.dtype)

    out2d = pl.pallas_call(
        kernel,
        out_shape=jax.ShapeDtypeStruct((B, C), x.dtype),
        grid=grid,
        in_specs=[
            pl.BlockSpec((bt, C, st), lambda b, s: (b, 0, s)),
            pl.BlockSpec((Cr, C), lambda b, s: (0, 0)),   # resident weight
            pl.BlockSpec((C, Cr), lambda b, s: (0, 0)),   # resident weight
        ],
        out_specs=pl.BlockSpec((bt, C), lambda b, s: (b, 0)),
        scratch_shapes=[
            pltpu.VMEM((bt, C), jnp.float32),   # running sum (avg pool)
            pltpu.VMEM((bt, C), jnp.float32),   # running max (max pool)
        ],
        compiler_params=pltpu.CompilerParams(
            dimension_semantics=("parallel", "arbitrary")),
    )(x3, w1, w2)

    return out2d.reshape(B, C, 1, 1)


def reference(x, w1, w2):
    """Pure-JAX transcription of the torch forward (eval mode)."""
    avg = jnp.mean(x, axis=(2, 3))                       # (B, C)
    mx = jnp.max(x, axis=(2, 3))                         # (B, C)

    def mlp(p):
        h = jnp.maximum(
            jnp.dot(p, w1.T, precision=lax.Precision.HIGHEST), 0.0)
        return jnp.dot(h, w2.T, precision=lax.Precision.HIGHEST)

    out = jax.nn.sigmoid(mlp(avg) + mlp(mx))
    return out.reshape(out.shape[0], out.shape[1], 1, 1)


if __name__ == "__main__":
    # Small but non-degenerate shapes: channel must be >= ratio.
    B, C, H, W = 16, 64, 32, 32
    ratio = 16
    Cr = C // ratio

    key = jax.random.PRNGKey(0)
    kx, k1, k2 = jax.random.split(key, 3)
    x = jax.random.normal(kx, (B, C, H, W), dtype=jnp.float32)
    # torch Conv2d default init ~ uniform(-1/sqrt(fan_in), 1/sqrt(fan_in)).
    b1 = 1.0 / (C ** 0.5)
    b2 = 1.0 / (Cr ** 0.5)
    w1 = jax.random.uniform(k1, (Cr, C), jnp.float32, minval=-b1, maxval=b1)
    w2 = jax.random.uniform(k2, (C, Cr), jnp.float32, minval=-b2, maxval=b2)

    out = jax.block_until_ready(channel_attention(x, w1, w2))
    ref = jax.block_until_ready(reference(x, w1, w2))

    assert out.shape == (B, C, 1, 1), out.shape
    assert jnp.allclose(out, ref, atol=1e-4, rtol=1e-4), (
        float(jnp.max(jnp.abs(out - ref)))
    )
    print("KERNEL_OK")
</pallas_src>

<mosaic_0001>
module attributes {stable_mosaic.version = 11 : i64} {
  func.func @kernel(%arg0: i32, %arg1: i32, %arg2: memref<16x64x512xf32, #tpu.memory_space<vmem>>, %arg3: memref<4x64xf32, #tpu.memory_space<vmem>>, %arg4: memref<64x4xf32, #tpu.memory_space<vmem>>, %arg5: memref<16x64xf32, #tpu.memory_space<vmem>>, %arg6: memref<16x64xf32, #tpu.memory_space<vmem>>, %arg7: memref<16x64xf32, #tpu.memory_space<vmem>>) attributes {dimension_semantics = [#tpu.dimension_semantics<parallel>, #tpu.dimension_semantics<arbitrary>], iteration_bounds = array<i64: 1, 2>, scalar_prefetch = 0 : i64, scratch_operands = 2 : i64, tpu.core_type = #tpu.core_type<tc>, window_params = [{transform_indices = @transform_0, window_bounds = array<i64: 16, 64, 512>}, {pipeline_mode = #tpu.pipeline_mode<synchronous>, transform_indices = @transform_1, window_bounds = array<i64: 4, 64>}, {pipeline_mode = #tpu.pipeline_mode<synchronous>, transform_indices = @transform_2, window_bounds = array<i64: 64, 4>}, {transform_indices = @transform_3, window_bounds = array<i64: 16, 64>}]} {
    %c0 = arith.constant 0 : index
    %c0_0 = arith.constant 0 : index
    %c0_1 = arith.constant 0 : index
    %0 = vector.load %arg2[%c0, %c0_0, %c0_1] : memref<16x64x512xf32, #tpu.memory_space<vmem>>, vector<16x64x512xf32>
    %cst = arith.constant dense<0.000000e+00> : vector<16x64xf32>
    %1 = vector.multi_reduction <add>, %0, %cst [2] : vector<16x64x512xf32> to vector<16x64xf32>
    %cst_2 = arith.constant dense<0xFF800000> : vector<16x64xf32>
    %2 = vector.multi_reduction <maximumf>, %0, %cst_2 [2] : vector<16x64x512xf32> to vector<16x64xf32>
    %c0_i32 = arith.constant 0 : i32
    %3 = arith.cmpi eq, %arg1, %c0_i32 : i32
    %4 = arith.extui %3 : i1 to i32
    %c0_i32_3 = arith.constant 0 : i32
    %5 = arith.cmpi ne, %4, %c0_i32_3 : i32
    scf.if %5 {
      %cst_13 = arith.constant 0.000000e+00 : f32
      %15 = vector.broadcast %cst_13 : f32 to vector<16x64xf32>
      %c0_14 = arith.constant 0 : index
      %c0_15 = arith.constant 0 : index
      %16 = vector.load %arg6[%c0_14, %c0_15] : memref<16x64xf32, #tpu.memory_space<vmem>>, vector<16x64xf32>
      tpu.vector_store %arg6[%c0_14, %c0_15], %15 {strides = array<i32>} : memref<16x64xf32, #tpu.memory_space<vmem>>, vector<16x64xf32>,
      %cst_16 = arith.constant 0xFF800000 : f32
      %17 = vector.broadcast %cst_16 : f32 to vector<16x64xf32>
      %c0_17 = arith.constant 0 : index
      %c0_18 = arith.constant 0 : index
      %18 = vector.load %arg7[%c0_17, %c0_18] : memref<16x64xf32, #tpu.memory_space<vmem>>, vector<16x64xf32>
      tpu.vector_store %arg7[%c0_17, %c0_18], %17 {strides = array<i32>} : memref<16x64xf32, #tpu.memory_space<vmem>>, vector<16x64xf32>,
    } else {
    }
    %c0_4 = arith.constant 0 : index
    %c0_5 = arith.constant 0 : index
    %6 = vector.load %arg6[%c0_4, %c0_5] : memref<16x64xf32, #tpu.memory_space<vmem>>, vector<16x64xf32>
    %7 = arith.addf %6, %1 : vector<16x64xf32>
    %c0_6 = arith.constant 0 : index
    %c0_7 = arith.constant 0 : index
    %8 = vector.load %arg6[%c0_6, %c0_7] : memref<16x64xf32, #tpu.memory_space<vmem>>, vector<16x64xf32>
    tpu.vector_store %arg6[%c0_6, %c0_7], %7 {strides = array<i32>} : memref<16x64xf32, #tpu.memory_space<vmem>>, vector<16x64xf32>,
    %c0_8 = arith.constant 0 : index
    %c0_9 = arith.constant 0 : index
    %9 = vector.load %arg7[%c0_8, %c0_9] : memref<16x64xf32, #tpu.memory_space<vmem>>, vector<16x64xf32>
    %10 = arith.maximumf %9, %2 : vector<16x64xf32>
    %c0_10 = arith.constant 0 : index
    %c0_11 = arith.constant 0 : index
    %11 = vector.load %arg7[%c0_10, %c0_11] : memref<16x64xf32, #tpu.memory_space<vmem>>, vector<16x64xf32>
    tpu.vector_store %arg7[%c0_10, %c0_11], %10 {strides = array<i32>} : memref<16x64xf32, #tpu.memory_space<vmem>>, vector<16x64xf32>,
    %c1_i32 = arith.constant 1 : i32
    %12 = arith.cmpi eq, %arg1, %c1_i32 : i32
    %13 = arith.extui %12 : i1 to i32
    %c0_i32_12 = arith.constant 0 : i32
    %14 = arith.cmpi ne, %13, %c0_i32_12 : i32
    scf.if %14 {
      %c0_13 = arith.constant 0 : index
      %c0_14 = arith.constant 0 : index
      %15 = vector.load %arg6[%c0_13, %c0_14] : memref<16x64xf32, #tpu.memory_space<vmem>>, vector<16x64xf32>
      %cst_15 = arith.constant 9.765625E-4 : f32
      %16 = vector.broadcast %cst_15 : f32 to vector<16x64xf32>
      %17 = arith.mulf %15, %16 : vector<16x64xf32>
      %c0_16 = arith.constant 0 : index
      %c0_17 = arith.constant 0 : index
      %18 = vector.load %arg7[%c0_16, %c0_17] : memref<16x64xf32, #tpu.memory_space<vmem>>, vector<16x64xf32>
      %19 = tpu.concatenate %17, %18 in 0 : vector<16x64xf32>, vector<16x64xf32> -> vector<32x64xf32>
      %c0_18 = arith.constant 0 : index
      %c0_19 = arith.constant 0 : index
      %20 = vector.load %arg3[%c0_18, %c0_19] : memref<4x64xf32, #tpu.memory_space<vmem>>, vector<4x64xf32>
      %cst_20 = arith.constant dense<0.000000e+00> : vector<32x4xf32>
      %21 = tpu.matmul %19, %20, %cst_20 {dimension_numbers = #tpu.dot_dimension_numbers<[1], [1], [0], [0], [0, 0, 1, 0], [], []>} : vector<32x64xf32>, vector<4x64xf32>, vector<32x4xf32> -> vector<32x4xf32>
      %cst_21 = arith.constant 0.000000e+00 : f32
      %22 = vector.broadcast %cst_21 : f32 to vector<32x4xf32>
      %23 = arith.maximumf %21, %22 : vector<32x4xf32>
      %c0_22 = arith.constant 0 : index
      %c0_23 = arith.constant 0 : index
      %24 = vector.load %arg4[%c0_22, %c0_23] : memref<64x4xf32, #tpu.memory_space<vmem>>, vector<64x4xf32>
      %cst_24 = arith.constant dense<0.000000e+00> : vector<32x64xf32>
      %25 = tpu.matmul %23, %24, %cst_24 {dimension_numbers = #tpu.dot_dimension_numbers<[1], [1], [0], [0], [0, 0, 1, 0], [], []>} : vector<32x4xf32>, vector<64x4xf32>, vector<32x64xf32> -> vector<32x64xf32>
      %26 = vector.extract_strided_slice %25 {offsets = [0, 0], sizes = [16, 64], strides = [1, 1]} : vector<32x64xf32> to vector<16x64xf32>
      %27 = vector.extract_strided_slice %25 {offsets = [16, 0], sizes = [16, 64], strides = [1, 1]} : vector<32x64xf32> to vector<16x64xf32>
      %28 = arith.addf %26, %27 : vector<16x64xf32>
      %29 = arith.negf %28 : vector<16x64xf32>
      %30 = math.exp %29 : vector<16x64xf32>
      %cst_25 = arith.constant 1.000000e+00 : f32
      %31 = vector.broadcast %cst_25 : f32 to vector<16x64xf32>
      %32 = arith.addf %31, %30 : vector<16x64xf32>
      %33 = arith.divf %31, %32 : vector<16x64xf32>
      %c0_26 = arith.constant 0 : index
      %c0_27 = arith.constant 0 : index
      %34 = vector.load %arg5[%c0_26, %c0_27] : memref<16x64xf32, #tpu.memory_space<vmem>>, vector<16x64xf32>
      tpu.vector_store %arg5[%c0_26, %c0_27], %33 {strides = array<i32>} : memref<16x64xf32, #tpu.memory_space<vmem>>, vector<16x64xf32>,
    } else {
    }
    return
  }
  func.func @transform_0(%arg0: i32, %arg1: i32) -> (i32, i32, i32) {
    %c0_i32 = arith.constant 0 : i32
    %c0_i32_0 = arith.constant 0 : i32
    return %arg0, %c0_i32, %arg1 : i32, i32, i32
  }
  func.func @transform_1(%arg0: i32, %arg1: i32) -> (i32, i32) {
    %c0_i32 = arith.constant 0 : i32
    %c0_i32_0 = arith.constant 0 : i32
    %c0_i32_1 = arith.constant 0 : i32
    return %c0_i32, %c0_i32_0 : i32, i32
  }
  func.func @transform_2(%arg0: i32, %arg1: i32) -> (i32, i32) {
    %c0_i32 = arith.constant 0 : i32
    %c0_i32_0 = arith.constant 0 : i32
    %c0_i32_1 = arith.constant 0 : i32
    return %c0_i32, %c0_i32_0 : i32, i32
  }
  func.func @transform_3(%arg0: i32, %arg1: i32) -> (i32, i32) {
    %c0_i32 = arith.constant 0 : i32
    %c0_i32_0 = arith.constant 0 : i32
    return %arg0, %c0_i32 : i32, i32
  }
}

</mosaic_0001>

<bundles_post_ra>
// kernel: tpu_custom_call.1
= control target key start
LH: loop header
LB: loop body
LE: loop exit
PB: predicated region body
PF: predicated region fallthrough
CT: control target
= control target key end

     0   :  { %8 = vsyncpa [#allocation5], 0  ;;  %s8711_s0 = inlined_call_operand.hbm [shape: f32[16,64,1024], index: 0, kind: input, shape index: {}]   ;;  %s8712_s1 = inlined_call_operand.hbm [shape: f32[4,64], index: 1, kind: input, shape index: {}]   ;;  %s8713_s2 = inlined_call_operand.vmem [shape: f32[64,4], index: 2, kind: input, shape index: {}]   ;;  %s8714_s3 = inlined_call_operand.hbm [shape: f32[16,64], index: 3, kind: output, shape index: {}]  }
   0x1   :  { %10 = vsyncpa [#allocation5 + $0x1], 0 }
   0x2   :  { %11 = vsyncpa [#allocation8], 0 }
   0x3   :  { %12 = vsyncpa [#allocation6], 0  ;;  %s4306_s12 = smov 0   ;;  %s4308_s13 = smov 0  }
   0x4   :  { %s4310_s14 = smov 0   ;;  %s4312_s15 = smov 0  }
   0x5   :  { %s4314_s16 = smov 0   ;;  %s4316_s17 = smov 0  }
   0x6 LB: > { %s3935_s18 = sadd.s32 4294967295, %s4274_s17   ;;  %s39_s19 = sadd.s32 1, %s4262_s14  ;;  %s4274_s17 = sphi %s4316_s17, %s18_s17   ;;  %s4270_s16 = sphi %s4314_s16, %s10314_s16   ;;  %s4266_s15 = sphi %s4312_s15, %s10313_s15   ;;  %s4262_s14 = sphi %s4310_s14, %s10312_s14   ;;  %s4258_s13 = sphi %s4308_s13, %s10311_s13   ;;  %s4254_s12 = sphi %s4306_s12, %s10310_s12  }
   0x7   : > { %p46_p0 = scmp.ne.s32.totalorder %s4262_s14, %s4258_s13  ;;  %p47_p1 = scmp.eq.s32.totalorder %s4274_s17, 0 }
   0x8   : > { %p52_p2 = scmp.ne.s32.totalorder %s4258_s13, %s4254_s12  ;;  %p4342_p3 = scmp.eq.s32.totalorder %s3935_s18, 0 }
   0x9   : > { %p48_p4 = por %p47_p1, %p46_p0  ;;  %p3936_p5 = scmp.ge.s32.totalorder %s4274_s17, 1 }
   0xa   : > { %s9072_s20 = scalar_select %p4342_p3, 1, 0 }
   0xb   : > { %p4349_p6 = por %p4342_p3, %p52_p2  ;;  %p131_p7 = scmp.lt.s32.totalorder %s4274_s17, 3 }
   0xc   : > { %s4276_s23 = smov [#allocation7]   ;;  %p4063_p10 = scmp.lt.s32.totalorder %s4274_s17, 2 }
   0xd   : > { %s9073_s21 = scalar_select %p4349_p6, 1, 0 }
   0xe   : > { %p4354_p8 = pnand %p3936_p5, %p131_p7  ;;  %s144_s24 = sshll.u32 %s4276_s23, 4  ;;  %s145_s24 = int_to_ptr.vmem [resolvable:$true] %s144_s24 }
   0xf   : > { %s158_s25 = sand.u32 1, %s4262_s14   ;;  %p4368_p12 = pnand %p4063_p10, %p48_p4 }
  0x10   : > { %s9074_s22 = scalar_select %p4354_p8, 1, 0 }
  0x11   : > { %p4054_p9 = pneg %p4354_p8  ;;  %s4132_s30 = scalar_lea.hbm %s8712_s1, 64 }
  0x12   : > { %s9076_s27 = scalar_select %p4368_p12, 1, 0 }
  0x13   : > { %p4364_p11 = pnand %p4054_p9, %p4342_p3  ;;  %p4133_p13 = scmp.ne.s32.totalorder %s8712_s1, %s4132_s30 }
  0x14   : > { %p4139_p5 = scmp.lt.u32.totalorder %s4132_s30, %s8712_s1 }
  0x15   : > { %p4134_p0 = pneg %p4364_p11 }
  0x17   : > { %p4135_p1 = pnand %p4134_p0, %p4133_p13 }
  0x19   : > { %p4136_p2 = pneg %p4135_p1 }
  0x1b   : > { %p4141_p4 = pnand %p4139_p5, %p4136_p2 }
  0x1d   : > { %4144 = shalt.err (!%p4141_p4)
}
  0x1e   : > { %s4145_s8 = scalar_lea.vmem %s145_s24, 64  ;;  %p4153_p3 = scmp.lt.s32.totalorder %s145_s24, %s145_s24 }
  0x1f   : > { %p4146_p7 = scmp.ne.s32.totalorder %s145_s24, %s4145_s8  ;;  %p4154_p6 = scmp.lt.s32.totalorder %s4145_s8, %s4145_s8 }
  0x21   : > { %p4148_p9 = pnand %p4146_p7, %p4134_p0  ;;  %p4155_p8 = por %p4154_p6, %p4153_p3 }
  0x23   : > { %p4149_p10 = pneg %p4148_p9 }
  0x25   : > { %p4156_p12 = pnand %p4155_p8, %p4149_p10 }
  0x27   : > { %4159 = shalt.err (!%p4156_p12)
}
  0x28   : > { %4057 = dma.hbm_to_vmem [thread:$0]  (!%p4364_p11), %s8712_s1, 64, %s145_s24, [#allocation8]  }
  0x29   : > { %s27_s11 = sadd.s32 1, %s4270_s16  ;;  %s3939_s12 = sshll.u32 %s158_s25, 12 }
  0x2a   : > { %p28_p3 = scmp.ge.s32.totalorder %s27_s11, 2  ;;  %s3970_s23 = sshll.u32 %s4270_s16, 9 }
  0x2b   : > { %s162_s28 = scalar_lea.vmem [#allocation4], %s3939_s12  ;;  %s4397_s4 = scalar_lea.hbm %s8711_s0, %s3970_s23 }
  0x2c   : > { %s172_s26 = sshll.u32 %s162_s28, 4  ;;  %s10316_s11 = smov (%p28_p3, %s27_s11), 0  ;;  %s4399_s26 = int_to_ptr.vmem [resolvable:$true] %s172_s26 }
  0x2d   : > { %s35_s24 = ssub.s32 %s4270_s16, %s10316_s11  ;;  %s4410_s6 = scalar_lea.sflag [#allocation5], %s158_s25 }
  0x2e   : > { %p37_p6 = scmp.eq.s32.totalorder %s35_s24, 0  ;;  %s4160_s7 = scalar_lea.hbm %s4397_s4, 65536 }
  0x2f   : > { %p4161_p8 = scmp.ne.s32.totalorder %s4397_s4, %s4160_s7  ;;  %p9077_p11 = scmp.ne.s32.totalorder %s9076_s27, 0 }
  0x30   : > { %s4406_s5 = scalar_select %p37_p6, %s4262_s14, %s39_s19  }
  0x31   : > { %p4162_p12 = pneg %p9077_p11  ;;  %s4165_s10 = scalar_lea.hbm %s8711_s0, 131072 }
  0x32   : > { %p4166_p1 = scmp.lt.u32.totalorder %s4397_s4, %s8711_s0  ;;  %p4167_p2 = scmp.lt.u32.totalorder %s4165_s10, %s4160_s7 }
  0x33   : > { %p4163_p13 = pnand %p4162_p12, %p4161_p8  ;;  %p4169_p4 = scmp.lt.u32.totalorder %s4160_s7, %s4397_s4 }
  0x34   : > { %p4168_p5 = por %p4167_p2, %p4166_p1 }
  0x35   : > { %p4164_p0 = pneg %p4163_p13 }
  0x36   : > { %p4170_p7 = por %p4169_p4, %p4168_p5 }
  0x38   : > { %p4171_p9 = pnand %p4170_p7, %p4164_p0 }
  0x3a   : > { %4174 = shalt.err (!%p4171_p9)
}
  0x3b   : > { %s4175_s19 = scalar_lea.vmem %s4399_s26, 65536  ;;  %s4277_s25 = smov [#allocation4]  }
  0x3c   : > { %p4176_p10 = scmp.ne.s32.totalorder %s4399_s26, %s4175_s19  ;;  %s4180_s28 = sshll.u32 %s4277_s25, 4  ;;  %s4181_s28 = int_to_ptr.vmem [resolvable:$false] %s4180_s28 }
  0x3d   : > { %s4182_s29 = scalar_lea.vmem %s4181_s28, 131072  ;;  %p4183_p8 = scmp.lt.s32.totalorder %s4399_s26, %s4181_s28 }
  0x3e   : > { %p4178_p3 = pnand %p4176_p10, %p4162_p12  ;;  %p4184_p13 = scmp.lt.s32.totalorder %s4182_s29, %s4175_s19 }
  0x40   : > { %p4179_p6 = pneg %p4178_p3  ;;  %p4185_p1 = por %p4184_p13, %p4183_p8 }
  0x42   : > { %p4186_p2 = pnand %p4185_p1, %p4179_p6 }
  0x44   : > { %4189 = shalt.err (!%p4186_p2)
}
  0x45   : > { %s4278_s30 = smov 1024   ;;  %s4279_s24 = smov 512  }
  0x46   : > { %s4280_s7 = smov 32   ;;  %p9078_p12 = scmp.ne.s32.totalorder %s9074_s22, 0 }
  0x47   : > { %4061 = dma.hbm_to_vmem [thread:$0]  (!%p9077_p11), %s4397_s4, 65536, %s4399_s26, %s4410_s6, %s4278_s30, %s4279_s24, %s4280_s7  }
  0x48   : > { %184 = sbr.rel (%p9078_p12) target bundleno = 1387 (0x56b), region = 32 }
  0x4f   : > { %s186_s8 = sand.u32 1, %s4258_s13   ;;  %p9079_p0 = scmp.ne.s32.totalorder %s9073_s21, 0 }
  0x50   : > { %s3943_s9 = sshll.u32 %s186_s8, 12  ;;  %s187_s10 = scalar_lea.sflag [#allocation5], %s186_s8 }
  0x51   : > { %s4441_s12 = scalar_lea.vmem [#allocation4], %s3943_s9 }
  0x52   : > { %4241 = dma.done.wait (%p9079_p0), %s187_s10, 65536  }
  0x53   : > { %4243 = vsyncadd (%p9079_p0), %s187_s10, 4294901760  ;;  %p9080_p5 = scmp.ne.s32.totalorder %s9072_s20, 0 }
  0x55   : > { %4245 = dma.done.wait (%p9080_p5), [#allocation8], 64  }
  0x56   : > { %4247 = vsyncadd (%p9080_p5), [#allocation8], 4294967232  ;;  %v223_v0 = vld [vmem:[%s4441_s12 + $0x40] sm:$0xff]  ;;  %v224_v1 = vld [vmem:[%s4441_s12 + $0x48] sm:$0xff]  ;;  %p3945_p11 = scmp.ne.s32.totalorder %s4266_s15, 0 }
  0x57   : > { %v225_v2 = vld [vmem:[%s4441_s12 + $0x50] sm:$0xff]  ;;  %v737_v3 = vadd.f32 %v224_v1, %v223_v0  ;;  %v1377_v4 = vmax.f32 %v223_v0, %v224_v1  ;;  %v215_v5 = vld [vmem:[%s4441_s12] sm:$0xff]  ;;  %v216_v6 = vld [vmem:[%s4441_s12 + $0x8] sm:$0xff]  ;;  %vm2011_vm0 = vcmask (!%p3945_p11), 523264  }
  0x58   : > { %v4457_v7 = vld [vmem:[%s4441_s12 + $0x58] sm:$0xff]  ;;  %v217_v8 = vld [vmem:[%s4441_s12 + $0x10] sm:$0xff]  ;;  %v727_v9 = vadd.f32 %v216_v6, %v215_v5  ;;  %v1367_v10 = vmax.f32 %v215_v5, %v216_v6  ;;  %v227_v11 = vld [vmem:[%s4441_s12 + $0x60] sm:$0xff] }
  0x59   : > { %9081 = vst [vmem:[#allocation13_spill] sm:$0xff] %v4457_v7  ;;  %v738_v12 = vadd.f32 %v737_v3, %v225_v2  ;;  %v4461_v13 = vmax.f32 %v1377_v4, %v225_v2  ;;  %v4464_v14 = vld [vmem:[%s4441_s12 + $0x18] sm:$0xff]  ;;  %v228_v15 = vld [vmem:[%s4441_s12 + $0x68] sm:$0xff]  ;;  %v229_v16 = vld [vmem:[%s4441_s12 + $0x70] sm:$0xff] }
  0x5a   : > { %9083 = vst [vmem:[#allocation15_spill] sm:$0xff] %v4464_v14  ;;  %v728_v17 = vadd.f32 %v727_v9, %v217_v8  ;;  %v4468_v18 = vmax.f32 %v1367_v10, %v217_v8  ;;  %v742_v19 = vadd.f32 %v228_v15, %v227_v11  ;;  %v1382_v20 = vmax.f32 %v227_v11, %v228_v15  ;;  %v219_v21 = vld [vmem:[%s4441_s12 + $0x20] sm:$0xff]  ;;  %v220_v22 = vld [vmem:[%s4441_s12 + $0x28] sm:$0xff]  ;;  %v221_v23 = vld [vmem:[%s4441_s12 + $0x30] sm:$0xff] }
  0x5b   : > { %9082 = vst [vmem:[#allocation14_spill] sm:$0xff] %v4461_v13  ;;  %v739_v24 = vadd.f32 %v738_v12, %v4457_v7  ;;  %v4477_v26 = vld [vmem:[%s4441_s12 + $0x78] sm:$0xff]  ;;  %v732_v27 = vadd.f32 %v220_v22, %v219_v21  ;;  %v1372_v28 = vmax.f32 %v219_v21, %v220_v22  ;;  %v235_v29 = vld [vmem:[%s4441_s12 + $0xa0] sm:$0xff]  ;;  %v236_v30 = vld [vmem:[%s4441_s12 + $0xa8] sm:$0xff] }
  0x5c   : > { %9084 = vst [vmem:[#allocation16_spill] sm:$0xff] %v4468_v18  ;;  %9085 = vst [vmem:[#allocation17_spill] sm:$0xff] %v4477_v26  ;;  %v729_v31 = vadd.f32 %v728_v17, %v4464_v14  ;;  %v743_v33 = vadd.f32 %v742_v19, %v229_v16  ;;  %v4484_v34 = vmax.f32 %v1382_v20, %v229_v16  ;;  %v4487_v35 = vld [vmem:[%s4441_s12 + $0x38] sm:$0xff]  ;;  %v237_v36 = vld [vmem:[%s4441_s12 + $0xb0] sm:$0xff] }
  0x5d   : > { %9087 = vst [vmem:[#allocation19_spill] sm:$0xff] %v4487_v35  ;;  %v231_v37 = vld [vmem:[%s4441_s12 + $0x80] sm:$0xff]  ;;  %740 = vadd.xlane.f32.xlu1 %v739_v24  ;;  %v733_v38 = vadd.f32 %v732_v27, %v221_v23  ;;  %v4491_v39 = vmax.f32 %v1372_v28, %v221_v23  ;;  %v4494_v40 = vld [vmem:[%s4441_s12 + $0xb8] sm:$0xff]  ;;  %v752_v41 = vadd.f32 %v236_v30, %v235_v29  ;;  %v232_v43 = vld [vmem:[%s4441_s12 + $0x88] sm:$0xff] }
  0x5e   : > { %9086 = vst [vmem:[#allocation18_spill] sm:$0xff] %v4484_v34  ;;  %9089 = vst [vmem:[#allocation21_spill] sm:$0xff] %v4494_v40  ;;  %v1392_v42 = vmax.f32 %v235_v29, %v236_v30  ;;  %v233_v44 = vld [vmem:[%s4441_s12 + $0x90] sm:$0xff]  ;;  %730 = vadd.xlane.f32.xlu0 %v729_v31  ;;  %v744_v45 = vadd.f32 %v743_v33, %v4477_v26  ;;  %v4502_v47 = vld [vmem:[%s4441_s12 + $0x98] sm:$0xff]  ;;  %v747_v48 = vadd.f32 %v232_v43, %v231_v37 }
  0x5f   : > { %9088 = vst [vmem:[#allocation20_spill] sm:$0xff] %v4491_v39  ;;  %9090 = vst [vmem:[#allocation22_spill] sm:$0xff] %v4502_v47  ;;  %v1387_v49 = vmax.f32 %v231_v37, %v232_v43  ;;  %v243_v50 = vld [vmem:[%s4441_s12 + $0xe0] sm:$0xff]  ;;  %v244_v51 = vld [vmem:[%s4441_s12 + $0xe8] sm:$0xff]  ;;  %v734_v52 = vadd.f32 %v733_v38, %v4487_v35  ;;  %v753_v54 = vadd.f32 %v752_v41, %v237_v36 }
  0x60   : > { %v4509_v55 = vmax.f32 %v1392_v42, %v237_v36  ;;  %v245_v56 = vld [vmem:[%s4441_s12 + $0xf0] sm:$0xff]  ;;  %v239_v57 = vld [vmem:[%s4441_s12 + $0xc0] sm:$0xff]  ;;  %v240_v58 = vld [vmem:[%s4441_s12 + $0xc8] sm:$0xff]  ;;  %v748_v59 = vadd.f32 %v747_v48, %v233_v44  ;;  %v762_v61 = vadd.f32 %v244_v51, %v243_v50  ;;  %v1402_v62 = vmax.f32 %v243_v50, %v244_v51 }
  0x61   : > { %v4514_v60 = vmax.f32 %v1387_v49, %v233_v44  ;;  %v241_v63 = vld [vmem:[%s4441_s12 + $0xd0] sm:$0xff]  ;;  %v251_v0 = vld [vmem:[%s4441_s12 + $0x120] sm:$0xff]  ;;  %745 = vadd.xlane.f32.xlu1 %v744_v45  ;;  %v754_v1 = vadd.f32 %v753_v54, %v4494_v40  ;;  %v4522_v3 = vld [vmem:[%s4441_s12 + $0xf8] sm:$0xff]  ;;  %v757_v5 = vadd.f32 %v240_v58, %v239_v57  ;;  %v1397_v6 = vmax.f32 %v239_v57, %v240_v58 }
  0x62   : > { %9091 = vst [vmem:[#allocation23_spill] sm:$0xff] %v4509_v55  ;;  %9093 = vst [vmem:[#allocation25_spill] sm:$0xff] %v4522_v3  ;;  %v4525_v4 = vld [vmem:[%s4441_s12 + $0xd8] sm:$0xff]  ;;  %v252_v8 = vld [vmem:[%s4441_s12 + $0x128] sm:$0xff]  ;;  %735 = vadd.xlane.f32.xlu0 %v734_v52  ;;  %v749_v9 = vadd.f32 %v748_v59, %v4502_v47  ;;  %v763_v11 = vadd.f32 %v762_v61, %v245_v56  ;;  %v4531_v12 = vmax.f32 %v1402_v62, %v245_v56 }
  0x63   : > { %9092 = vst [vmem:[#allocation24_spill] sm:$0xff] %v4514_v60  ;;  %9094 = vst [vmem:[#allocation26_spill] sm:$0xff] %v4525_v4  ;;  %v253_v15 = vld [vmem:[%s4441_s12 + $0x130] sm:$0xff]  ;;  %v247_v16 = vld [vmem:[%s4441_s12 + $0x100] sm:$0xff]  ;;  %v758_v19 = vadd.f32 %v757_v5, %v241_v63  ;;  %v4536_v20 = vmax.f32 %v1397_v6, %v241_v63  ;;  %v772_v21 = vadd.f32 %v252_v8, %v251_v0 }
  0x64   : > { %9095 = vst [vmem:[#allocation27_spill] sm:$0xff] %v4531_v12  ;;  %v248_v17 = vld [vmem:[%s4441_s12 + $0x108] sm:$0xff]  ;;  %v1412_v22 = vmax.f32 %v251_v0, %v252_v8  ;;  %v249_v23 = vld [vmem:[%s4441_s12 + $0x110] sm:$0xff]  ;;  %v259_v24 = vld [vmem:[%s4441_s12 + $0x160] sm:$0xff]  ;;  %v764_v28 = vadd.f32 %v763_v11, %v4522_v3 }
  0x65   : > { %9096 = vst [vmem:[#allocation28_spill] sm:$0xff] %v4536_v20  ;;  %v260_v27 = vld [vmem:[%s4441_s12 + $0x168] sm:$0xff]  ;;  %v767_v30 = vadd.f32 %v248_v17, %v247_v16  ;;  %v1407_v31 = vmax.f32 %v247_v16, %v248_v17  ;;  %v255_v33 = vld [vmem:[%s4441_s12 + $0x140] sm:$0xff]  ;;  %755 = vadd.xlane.f32.xlu1 %v754_v1  ;;  %v759_v36 = vadd.f32 %v758_v19, %v4525_v4  ;;  %v4549_v38 = vld [vmem:[%s4441_s12 + $0x138] sm:$0xff] }
  0x66   : > { %9097 = vst [vmem:[#allocation29_spill] sm:$0xff] %v4549_v38  ;;  %v773_v41 = vadd.f32 %v772_v21, %v253_v15  ;;  %v4551_v42 = vmax.f32 %v1412_v22, %v253_v15  ;;  %v261_v43 = vld [vmem:[%s4441_s12 + $0x170] sm:$0xff]  ;;  %v256_v44 = vld [vmem:[%s4441_s12 + $0x148] sm:$0xff]  ;;  %750 = vadd.xlane.f32.xlu0 %v749_v9  ;;  %v782_v49 = vadd.f32 %v260_v27, %v259_v24  ;;  %v267_v52 = vld [vmem:[%s4441_s12 + $0x1a0] sm:$0xff] }
  0x67   : > { %v768_v45 = vadd.f32 %v767_v30, %v249_v23  ;;  %v4555_v48 = vmax.f32 %v1407_v31, %v249_v23  ;;  %v1422_v50 = vmax.f32 %v259_v24, %v260_v27  ;;  %v257_v51 = vld [vmem:[%s4441_s12 + $0x150] sm:$0xff]  ;;  %v268_v54 = vld [vmem:[%s4441_s12 + $0x1a8] sm:$0xff]  ;;  %v4563_v57 = vld [vmem:[%s4441_s12 + $0x118] sm:$0xff]  ;;  %v777_v58 = vadd.f32 %v256_v44, %v255_v33 }
  0x68   : > { %9098 = vst [vmem:[#allocation30_spill] sm:$0xff] %v4551_v42  ;;  %9100 = vst [vmem:[#allocation32_spill] sm:$0xff] %v4563_v57  ;;  %v1417_v59 = vmax.f32 %v255_v33, %v256_v44  ;;  %v263_v61 = vld [vmem:[%s4441_s12 + $0x180] sm:$0xff]  ;;  %v264_v62 = vld [vmem:[%s4441_s12 + $0x188] sm:$0xff]  ;;  %v774_v63 = vadd.f32 %v773_v41, %v4549_v38  ;;  %v783_v1 = vadd.f32 %v782_v49, %v261_v43 }
  0x69   : > { %9099 = vst [vmem:[#allocation31_spill] sm:$0xff] %v4555_v48  ;;  %v4570_v5 = vmax.f32 %v1422_v50, %v261_v43  ;;  %765 = vadd.xlane.f32.xlu1 %v764_v28  ;;  %v4573_v6 = vld [vmem:[%s4441_s12 + $0x178] sm:$0xff]  ;;  %v778_v8 = vadd.f32 %v777_v58, %v257_v51  ;;  %v269_v11 = vld [vmem:[%s4441_s12 + $0x1b0] sm:$0xff]  ;;  %v792_v15 = vadd.f32 %v268_v54, %v267_v52  ;;  %v275_v24 = vld [vmem:[%s4441_s12 + $0x1e0] sm:$0xff] }
  0x6a   : > { %9102 = vst [vmem:[#allocation34_spill] sm:$0xff] %v4573_v6  ;;  %v4575_v9 = vmax.f32 %v1417_v59, %v257_v51  ;;  %v1432_v16 = vmax.f32 %v267_v52, %v268_v54  ;;  %760 = vadd.xlane.f32.xlu0 %v759_v36  ;;  %v769_v17 = vadd.f32 %v768_v45, %v4563_v57  ;;  %v4582_v21 = vld [vmem:[%s4441_s12 + $0x158] sm:$0xff]  ;;  %v276_v27 = vld [vmem:[%s4441_s12 + $0x1e8] sm:$0xff]  ;;  %v265_v31 = vld [vmem:[%s4441_s12 + $0x190] sm:$0xff] }
  0x6b   : > { %9101 = vst [vmem:[#allocation33_spill] sm:$0xff] %v4570_v5  ;;  %9104 = vst [vmem:[#allocation36_spill] sm:$0xff] %v4582_v21  ;;  %v787_v22 = vadd.f32 %v264_v62, %v263_v61  ;;  %v1427_v23 = vmax.f32 %v263_v61, %v264_v62  ;;  %v271_v33 = vld [vmem:[%s4441_s12 + $0x1c0] sm:$0xff]  ;;  %v272_v36 = vld [vmem:[%s4441_s12 + $0x1c8] sm:$0xff]  ;;  %v784_v41 = vadd.f32 %v783_v1, %v4573_v6 }
  0x6c   : > { %9103 = vst [vmem:[#allocation35_spill] sm:$0xff] %v4575_v9  ;;  %v4588_v30 = vmax.f32 %v1432_v16, %v269_v11  ;;  %v4595_v43 = vld [vmem:[%s4441_s12 + $0x1b8] sm:$0xff]  ;;  %v793_v44 = vadd.f32 %v792_v15, %v269_v11  ;;  %v1442_v50 = vmax.f32 %v275_v24, %v276_v27  ;;  %v779_v51 = vadd.f32 %v778_v8, %v4582_v21  ;;  %v277_v54 = vld [vmem:[%s4441_s12 + $0x1f0] sm:$0xff]  ;;  %v283_v61 = vld [vmem:[%s4441_s12 + $0x220] sm:$0xff] }
  0x6d   : > { %9106 = vst [vmem:[#allocation38_spill] sm:$0xff] %v4595_v43  ;;  %v4598_v45 = vld [vmem:[%s4441_s12 + $0x198] sm:$0xff]  ;;  %v4600_v49 = vmax.f32 %v1427_v23, %v265_v31  ;;  %775 = vadd.xlane.f32.xlu1 %v774_v63  ;;  %v802_v58 = vadd.f32 %v276_v27, %v275_v24  ;;  %v1437_v59 = vmax.f32 %v271_v33, %v272_v36  ;;  %v284_v62 = vld [vmem:[%s4441_s12 + $0x228] sm:$0xff]  ;;  %v273_v63 = vld [vmem:[%s4441_s12 + $0x1d0] sm:$0xff] }
  0x6e   : > { %9105 = vst [vmem:[#allocation37_spill] sm:$0xff] %v4588_v30  ;;  %9107 = vst [vmem:[#allocation39_spill] sm:$0xff] %v4598_v45  ;;  %770 = vadd.xlane.f32.xlu0 %v769_v17  ;;  %v788_v1 = vadd.f32 %v787_v22, %v265_v31  ;;  %v4610_v15 = vmax.f32 %v1442_v50, %v277_v54  ;;  %v797_v16 = vadd.f32 %v272_v36, %v271_v33  ;;  %v279_v8 = vld [vmem:[%s4441_s12 + $0x200] sm:$0xff]  ;;  %v280_v23 = vld [vmem:[%s4441_s12 + $0x208] sm:$0xff] }
  0x6f   : > { %9108 = vst [vmem:[#allocation40_spill] sm:$0xff] %v4600_v49  ;;  %v4616_v52 = vld [vmem:[%s4441_s12 + $0x1f8] sm:$0xff]  ;;  %v4618_v24 = vmax.f32 %v1437_v59, %v273_v63  ;;  %v1452_v27 = vmax.f32 %v283_v61, %v284_v62  ;;  %v794_v17 = vadd.f32 %v793_v44, %v4595_v43  ;;  %v285_v50 = vld [vmem:[%s4441_s12 + $0x230] sm:$0xff]  ;;  %v812_v33 = vadd.f32 %v284_v62, %v283_v61  ;;  %v291_v22 = vld [vmem:[%s4441_s12 + $0x260] sm:$0xff] }
  0x70   : > { %9109 = vst [vmem:[#allocation41_spill] sm:$0xff] %v4610_v15  ;;  %9110 = vst [vmem:[#allocation42_spill] sm:$0xff] %v4616_v52  ;;  %v4624_v31 = vld [vmem:[%s4441_s12 + $0x1d8] sm:$0xff]  ;;  %v1447_v36 = vmax.f32 %v279_v8, %v280_v23  ;;  %v803_v11 = vadd.f32 %v802_v58, %v277_v54  ;;  %v281_v44 = vld [vmem:[%s4441_s12 + $0x210] sm:$0xff]  ;;  %v807_v19 = vadd.f32 %v280_v23, %v279_v8 }
  0x71   : > { %9111 = vst [vmem:[#allocation43_spill] sm:$0xff] %v4618_v24  ;;  %9112 = vst [vmem:[#allocation44_spill] sm:$0xff] %v4624_v31  ;;  %785 = vadd.xlane.f32.xlu1 %v784_v41  ;;  %v4629_v28 = vmax.f32 %v1452_v27, %v285_v50  ;;  %v292_v0 = vld [vmem:[%s4441_s12 + $0x268] sm:$0xff]  ;;  %v789_v61 = vadd.f32 %v788_v1, %v4598_v45  ;;  %v798_v62 = vadd.f32 %v797_v16, %v273_v63  ;;  %v4636_v41 = vld [vmem:[%s4441_s12 + $0x238] sm:$0xff] }
  0x72   : > { %780 = vadd.xlane.f32.xlu0 %v779_v51  ;;  %9114 = vst [vmem:[#allocation46_spill] sm:$0xff] %v4636_v41  ;;  %v4638_v54 = vmax.f32 %v1447_v36, %v281_v44  ;;  %v1462_v58 = vmax.f32 %v291_v22, %v292_v0  ;;  %v287_v59 = vld [vmem:[%s4441_s12 + $0x240] sm:$0xff]  ;;  %v288_v27 = vld [vmem:[%s4441_s12 + $0x248] sm:$0xff]  ;;  %v4645_v23 = vld [vmem:[%s4441_s12 + $0x218] sm:$0xff]  ;;  %v813_v56 = vadd.f32 %v812_v33, %v285_v50 }
  0x73   : > { %9113 = vst [vmem:[#allocation45_spill] sm:$0xff] %v4629_v28  ;;  %9116 = vst [vmem:[#allocation48_spill] sm:$0xff] %v4645_v23  ;;  %v293_v51 = vld [vmem:[%s4441_s12 + $0x270] sm:$0xff]  ;;  %v1457_v1 = vmax.f32 %v287_v59, %v288_v27  ;;  %v822_v16 = vadd.f32 %v292_v0, %v291_v22  ;;  %v299_v29 = vld [vmem:[%s4441_s12 + $0x2a0] sm:$0xff]  ;;  %v804_v8 = vadd.f32 %v803_v11, %v4616_v52 }
  0x74   : > { %9115 = vst [vmem:[#allocation47_spill] sm:$0xff] %v4638_v54  ;;  %v4650_v36 = vmax.f32 %v1462_v58, %v293_v51  ;;  %v289_v37 = vld [vmem:[%s4441_s12 + $0x250] sm:$0xff]  ;;  %v300_v10 = vld [vmem:[%s4441_s12 + $0x2a8] sm:$0xff]  ;;  %v808_v2 = vadd.f32 %v807_v19, %v281_v44  ;;  %v4657_v25 = vld [vmem:[%s4441_s12 + $0x278] sm:$0xff]  ;;  %v799_v58 = vadd.f32 %v798_v62, %v4624_v31  ;;  %v817_v19 = vadd.f32 %v288_v27, %v287_v59 }
  0x75   : > { %795 = vadd.xlane.f32.xlu1 %v794_v17  ;;  %9118 = vst [vmem:[#allocation50_spill] sm:$0xff] %v4657_v25  ;;  %v4659_v50 = vmax.f32 %v1457_v1, %v289_v37  ;;  %v1472_v33 = vmax.f32 %v299_v29, %v300_v10  ;;  %v295_v0 = vld [vmem:[%s4441_s12 + $0x280] sm:$0xff]  ;;  %v296_v22 = vld [vmem:[%s4441_s12 + $0x288] sm:$0xff]  ;;  %v4667_v11 = vld [vmem:[%s4441_s12 + $0x258] sm:$0xff]  ;;  %v814_v53 = vadd.f32 %v813_v56, %v4636_v41 }
  0x76   : > { %9117 = vst [vmem:[#allocation49_spill] sm:$0xff] %v4650_v36  ;;  %790 = vadd.xlane.f32.xlu0 %v789_v61  ;;  %9120 = vst [vmem:[#allocation52_spill] sm:$0xff] %v4667_v11  ;;  %v301_v44 = vld [vmem:[%s4441_s12 + $0x2b0] sm:$0xff]  ;;  %v1467_v63 = vmax.f32 %v295_v0, %v296_v22  ;;  %v307_v32 = vld [vmem:[%s4441_s12 + $0x2e0] sm:$0xff]  ;;  %v823_v54 = vadd.f32 %v822_v16, %v293_v51  ;;  %v818_v41 = vadd.f32 %v817_v19, %v289_v37 }
  0x77   : > { %9119 = vst [vmem:[#allocation51_spill] sm:$0xff] %v4659_v50  ;;  %v4672_v46 = vmax.f32 %v1472_v33, %v301_v44  ;;  %v297_v61 = vld [vmem:[%s4441_s12 + $0x290] sm:$0xff]  ;;  %v308_v62 = vld [vmem:[%s4441_s12 + $0x2e8] sm:$0xff]  ;;  %v4679_v17 = vld [vmem:[%s4441_s12 + $0x2b8] sm:$0xff]  ;;  %v809_v33 = vadd.f32 %v808_v2, %v4645_v23  ;;  %v832_v50 = vadd.f32 %v300_v10, %v299_v29  ;;  %v827_v28 = vadd.f32 %v296_v22, %v295_v0 }
  0x78   : > { %9122 = vst [vmem:[#allocation54_spill] sm:$0xff] %v4679_v17  ;;  %v4681_v36 = vmax.f32 %v1467_v63, %v297_v61  ;;  %v1482_v59 = vmax.f32 %v307_v32, %v308_v62  ;;  %v303_v27 = vld [vmem:[%s4441_s12 + $0x2c0] sm:$0xff]  ;;  %v304_v1 = vld [vmem:[%s4441_s12 + $0x2c8] sm:$0xff]  ;;  %v4689_v51 = vld [vmem:[%s4441_s12 + $0x298] sm:$0xff]  ;;  %v824_v0 = vadd.f32 %v823_v54, %v4657_v25  ;;  %v842_v22 = vadd.f32 %v308_v62, %v307_v32 }
  0x79   : > { %9121 = vst [vmem:[#allocation53_spill] sm:$0xff] %v4672_v46  ;;  %805 = vadd.xlane.f32.xlu1 %v804_v8  ;;  %9124 = vst [vmem:[#allocation56_spill] sm:$0xff] %v4689_v51  ;;  %v309_v63 = vld [vmem:[%s4441_s12 + $0x2f0] sm:$0xff]  ;;  %v1477_v16 = vmax.f32 %v303_v27, %v304_v1  ;;  %v315_v10 = vld [vmem:[%s4441_s12 + $0x320] sm:$0xff]  ;;  %v837_v24 = vadd.f32 %v304_v1, %v303_v27  ;;  %v819_v19 = vadd.f32 %v818_v41, %v4667_v11 }
  0x7a   : > { %9123 = vst [vmem:[#allocation55_spill] sm:$0xff] %v4681_v36  ;;  %800 = vadd.xlane.f32.xlu0 %v799_v58  ;;  %v4694_v31 = vmax.f32 %v1482_v59, %v309_v63  ;;  %v305_v2 = vld [vmem:[%s4441_s12 + $0x2d0] sm:$0xff]  ;;  %v316_v29 = vld [vmem:[%s4441_s12 + $0x328] sm:$0xff]  ;;  %v4700_v23 = vld [vmem:[%s4441_s12 + $0x2f8] sm:$0xff] }
  0x7b   : > { %9126 = vst [vmem:[#allocation58_spill] sm:$0xff] %v4700_v23  ;;  %v4702_v56 = vmax.f32 %v1477_v16, %v305_v2  ;;  %v1492_v46 = vmax.f32 %v315_v10, %v316_v29  ;;  %v311_v58 = vld [vmem:[%s4441_s12 + $0x300] sm:$0xff]  ;;  %v312_v37 = vld [vmem:[%s4441_s12 + $0x308] sm:$0xff]  ;;  %v4710_v59 = vld [vmem:[%s4441_s12 + $0x2d8] sm:$0xff]  ;;  %v833_v16 = vadd.f32 %v832_v50, %v301_v44  ;;  %v838_v45 = vadd.f32 %v837_v24, %v305_v2 }
  0x7c   : > { %9125 = vst [vmem:[#allocation57_spill] sm:$0xff] %v4694_v31  ;;  %9128 = vst [vmem:[#allocation60_spill] sm:$0xff] %v4710_v59  ;;  %v317_v8 = vld [vmem:[%s4441_s12 + $0x330] sm:$0xff]  ;;  %v1487_v36 = vmax.f32 %v311_v58, %v312_v37  ;;  %v323_v62 = vld [vmem:[%s4441_s12 + $0x360] sm:$0xff]  ;;  %v828_v31 = vadd.f32 %v827_v28, %v297_v61  ;;  %v843_v28 = vadd.f32 %v842_v22, %v309_v63 }
  0x7d   : > { %9127 = vst [vmem:[#allocation59_spill] sm:$0xff] %v4702_v56  ;;  %815 = vadd.xlane.f32.xlu1 %v814_v53  ;;  %v4715_v54 = vmax.f32 %v1492_v46, %v317_v8  ;;  %v313_v32 = vld [vmem:[%s4441_s12 + $0x310] sm:$0xff]  ;;  %v324_v25 = vld [vmem:[%s4441_s12 + $0x368] sm:$0xff]  ;;  %v4722_v53 = vld [vmem:[%s4441_s12 + $0x338] sm:$0xff]  ;;  %v852_v61 = vadd.f32 %v316_v29, %v315_v10  ;;  %v834_v15 = vadd.f32 %v833_v16, %v4679_v17 }
  0x7e   : > { %810 = vadd.xlane.f32.xlu0 %v809_v33  ;;  %9130 = vst [vmem:[#allocation62_spill] sm:$0xff] %v4722_v53  ;;  %v4724_v50 = vmax.f32 %v1487_v36, %v313_v32  ;;  %v1502_v44 = vmax.f32 %v323_v62, %v324_v25  ;;  %v319_v1 = vld [vmem:[%s4441_s12 + $0x340] sm:$0xff]  ;;  %v320_v27 = vld [vmem:[%s4441_s12 + $0x348] sm:$0xff]  ;;  %v4731_v52 = vld [vmem:[%s4441_s12 + $0x318] sm:$0xff]  ;;  %v829_v36 = vadd.f32 %v828_v31, %v4689_v51 }
  0x7f   : > { %9129 = vst [vmem:[#allocation61_spill] sm:$0xff] %v4715_v54  ;;  %9132 = vst [vmem:[#allocation64_spill] sm:$0xff] %v4731_v52  ;;  %v4734_v33 = vld [vmem:[%s4441_s12 + $0x370] sm:$0xff]  ;;  %v1497_v41 = vmax.f32 %v319_v1, %v320_v27  ;;  %v331_v46 = vld [vmem:[%s4441_s12 + $0x3a0] sm:$0xff]  ;;  %v862_v43 = vadd.f32 %v324_v25, %v323_v62 }
  0x80   : > { %9131 = vst [vmem:[#allocation63_spill] sm:$0xff] %v4724_v50  ;;  %v4739_v56 = vmax.f32 %v1502_v44, %v4734_v33  ;;  %v4742_v11 = vld [vmem:[%s4441_s12 + $0x350] sm:$0xff]  ;;  %v332_v54 = vld [vmem:[%s4441_s12 + $0x3a8] sm:$0xff]  ;;  %v4748_v63 = vld [vmem:[%s4441_s12 + $0x378] sm:$0xff] }
  0x81   : > { %825 = vadd.xlane.f32.xlu1 %v824_v0  ;;  %9134 = vst [vmem:[#allocation66_spill] sm:$0xff] %v4748_v63  ;;  %v4751_v10 = vmax.f32 %v1497_v41, %v4742_v11  ;;  %v1512_v29 = vmax.f32 %v331_v46, %v332_v54  ;;  %v327_v22 = vld [vmem:[%s4441_s12 + $0x380] sm:$0xff]  ;;  %v328_v44 = vld [vmem:[%s4441_s12 + $0x388] sm:$0xff]  ;;  %v847_v0 = vadd.f32 %v312_v37, %v311_v58  ;;  %v4759_v2 = vld [vmem:[%s4441_s12 + $0x358] sm:$0xff] }
  0x82   : > { %9133 = vst [vmem:[#allocation65_spill] sm:$0xff] %v4739_v56  ;;  %820 = vadd.xlane.f32.xlu0 %v819_v19  ;;  %9136 = vst [vmem:[#allocation68_spill] sm:$0xff] %v4759_v2  ;;  %v333_v16 = vld [vmem:[%s4441_s12 + $0x3b0] sm:$0xff]  ;;  %v1507_v50 = vmax.f32 %v327_v22, %v328_v44  ;;  %v339_v31 = vld [vmem:[%s4441_s12 + $0x3e0] sm:$0xff]  ;;  %v844_v58 = vadd.f32 %v843_v28, %v4700_v23  ;;  %v853_v37 = vadd.f32 %v852_v61, %v317_v8 }
  0x83   : > { %9135 = vst [vmem:[#allocation67_spill] sm:$0xff] %v4751_v10  ;;  %v4764_v17 = vmax.f32 %v1512_v29, %v333_v16  ;;  %v4767_v19 = vld [vmem:[%s4441_s12 + $0x390] sm:$0xff]  ;;  %v340_v51 = vld [vmem:[%s4441_s12 + $0x3e8] sm:$0xff]  ;;  %v4773_v49 = vld [vmem:[%s4441_s12 + $0x3b8] sm:$0xff]  ;;  %v839_v10 = vadd.f32 %v838_v45, %v4710_v59  ;;  %v848_v23 = vadd.f32 %v847_v0, %v313_v32  ;;  %v872_v0 = vadd.f32 %v332_v54, %v331_v46 }
  0x84   : > { %9138 = vst [vmem:[#allocation70_spill] sm:$0xff] %v4773_v49  ;;  %v4776_v24 = vmax.f32 %v1507_v50, %v4767_v19  ;;  %v1522_v56 = vmax.f32 %v339_v31, %v340_v51  ;;  %v4779_v41 = vld [vmem:[%s4441_s12 + $0x3c0] sm:$0xff]  ;;  %v4782_v29 = vld [vmem:[%s4441_s12 + $0x3c8] sm:$0xff]  ;;  %v4788_v50 = vld [vmem:[%s4441_s12 + $0x398] sm:$0xff]  ;;  %v863_v21 = vadd.f32 %v862_v43, %v4734_v33  ;;  %v867_v9 = vadd.f32 %v328_v44, %v327_v22 }
  0x85   : > { %9137 = vst [vmem:[#allocation69_spill] sm:$0xff] %v4764_v17  ;;  %835 = vadd.xlane.f32.xlu1 %v834_v15  ;;  %9140 = vst [vmem:[#allocation72_spill] sm:$0xff] %v4788_v50  ;;  %v4791_v28 = vld [vmem:[%s4441_s12 + $0x3f0] sm:$0xff]  ;;  %v1517_v61 = vmax.f32 %v4779_v41, %v4782_v29  ;;  %v857_v15 = vadd.f32 %v320_v27, %v319_v1  ;;  %v4804_v8 = vld [vmem:[%s4441_s12 + $0x420] sm:$0xff]  ;;  %v854_v27 = vadd.f32 %v853_v37, %v4722_v53 }
  0x86   : > { %9139 = vst [vmem:[#allocation71_spill] sm:$0xff] %v4776_v24  ;;  %830 = vadd.xlane.f32.xlu0 %v829_v36  ;;  %v4798_v45 = vmax.f32 %v1522_v56, %v4791_v28  ;;  %v4801_v62 = vld [vmem:[%s4441_s12 + $0x3d0] sm:$0xff]  ;;  %v4807_v17 = vld [vmem:[%s4441_s12 + $0x428] sm:$0xff]  ;;  %v4810_v59 = vld [vmem:[%s4441_s12 + $0x3f8] sm:$0xff]  ;;  %v864_v5 = vadd.f32 %v863_v21, %v4748_v63 }
  0x87   : > { %9142 = vst [vmem:[#allocation74_spill] sm:$0xff] %v4810_v59  ;;  %v4813_v36 = vmax.f32 %v1517_v61, %v4801_v62  ;;  %v1532_v32 = vmax.f32 %v4804_v8, %v4807_v17  ;;  %v4818_v1 = vld [vmem:[%s4441_s12 + $0x400] sm:$0xff]  ;;  %v4821_v56 = vld [vmem:[%s4441_s12 + $0x408] sm:$0xff]  ;;  %v4827_v24 = vld [vmem:[%s4441_s12 + $0x3d8] sm:$0xff]  ;;  %v858_v43 = vadd.f32 %v857_v15, %v4742_v11  ;;  %v873_v15 = vadd.f32 %v872_v0, %v333_v16 }
  0x88   : > { %9141 = vst [vmem:[#allocation73_spill] sm:$0xff] %v4798_v45  ;;  %9144 = vst [vmem:[#allocation76_spill] sm:$0xff] %v4827_v24  ;;  %v4830_v61 = vld [vmem:[%s4441_s12 + $0x430] sm:$0xff]  ;;  %v1527_v30 = vmax.f32 %v4818_v1, %v4821_v56  ;;  %v4844_v25 = vld [vmem:[%s4441_s12 + $0x460] sm:$0xff] }
  0x89   : > { %9143 = vst [vmem:[#allocation75_spill] sm:$0xff] %v4813_v36  ;;  %845 = vadd.xlane.f32.xlu1 %v844_v58  ;;  %v4838_v46 = vmax.f32 %v1532_v32, %v4830_v61  ;;  %v4841_v37 = vld [vmem:[%s4441_s12 + $0x410] sm:$0xff]  ;;  %v4847_v45 = vld [vmem:[%s4441_s12 + $0x468] sm:$0xff]  ;;  %v849_v58 = vadd.f32 %v848_v23, %v4731_v52  ;;  %v4852_v33 = vld [vmem:[%s4441_s12 + $0x438] sm:$0xff]  ;;  %v882_v36 = vadd.f32 %v340_v51, %v339_v31 }
  0x8a   : > { %840 = vadd.xlane.f32.xlu0 %v839_v10  ;;  %9146 = vst [vmem:[#allocation78_spill] sm:$0xff] %v4852_v33  ;;  %v4855_v22 = vmax.f32 %v1527_v30, %v4841_v37  ;;  %v1542_v44 = vmax.f32 %v4844_v25, %v4847_v45  ;;  %v4860_v32 = vld [vmem:[%s4441_s12 + $0x440] sm:$0xff]  ;;  %v4863_v54 = vld [vmem:[%s4441_s12 + $0x448] sm:$0xff]  ;;  %v4868_v10 = vld [vmem:[%s4441_s12 + $0x418] sm:$0xff]  ;;  %v868_v51 = vadd.f32 %v867_v9, %v4767_v19 }
  0x8b   : > { %9145 = vst [vmem:[#allocation77_spill] sm:$0xff] %v4838_v46  ;;  %9148 = vst [vmem:[#allocation80_spill] sm:$0xff] %v4868_v10  ;;  %v4871_v11 = vld [vmem:[%s4441_s12 + $0x470] sm:$0xff]  ;;  %v1537_v30 = vmax.f32 %v4860_v32, %v4863_v54  ;;  %v4884_v23 = vld [vmem:[%s4441_s12 + $0x4a0] sm:$0xff]  ;;  %v859_v21 = vadd.f32 %v858_v43, %v4759_v2  ;;  %v877_v9 = vadd.f32 %v4782_v29, %v4779_v41 }
  0x8c   : > { %9147 = vst [vmem:[#allocation79_spill] sm:$0xff] %v4855_v22  ;;  %v4878_v53 = vmax.f32 %v1542_v44, %v4871_v11  ;;  %v4881_v6 = vld [vmem:[%s4441_s12 + $0x450] sm:$0xff]  ;;  %v4887_v46 = vld [vmem:[%s4441_s12 + $0x4a8] sm:$0xff]  ;;  %v4892_v16 = vld [vmem:[%s4441_s12 + $0x478] sm:$0xff]  ;;  %v883_v2 = vadd.f32 %v882_v36, %v4791_v28  ;;  %v892_v28 = vadd.f32 %v4807_v17, %v4804_v8  ;;  %v887_v17 = vadd.f32 %v4821_v56, %v4818_v1 }
  0x8d   : > { %855 = vadd.xlane.f32.xlu1 %v854_v27  ;;  %9150 = vst [vmem:[#allocation82_spill] sm:$0xff] %v4892_v16  ;;  %v4895_v31 = vmax.f32 %v1537_v30, %v4881_v6  ;;  %v1552_v0 = vmax.f32 %v4884_v23, %v4887_v46  ;;  %v4900_v44 = vld [vmem:[%s4441_s12 + $0x480] sm:$0xff]  ;;  %v4903_v52 = vld [vmem:[%s4441_s12 + $0x488] sm:$0xff]  ;;  %v4911_v27 = vld [vmem:[%s4441_s12 + $0x458] sm:$0xff]  ;;  %v902_v8 = vadd.f32 %v4847_v45, %v4844_v25 }
  0x8e   : > { %9149 = vst [vmem:[#allocation81_spill] sm:$0xff] %v4878_v53  ;;  %850 = vadd.xlane.f32.xlu0 %v849_v58  ;;  %9152 = vst [vmem:[#allocation84_spill] sm:$0xff] %v4911_v27  ;;  %v4914_v30 = vld [vmem:[%s4441_s12 + $0x4b0] sm:$0xff]  ;;  %v1547_v22 = vmax.f32 %v4900_v44, %v4903_v52  ;;  %v4927_v29 = vld [vmem:[%s4441_s12 + $0x4e0] sm:$0xff]  ;;  %v874_v53 = vadd.f32 %v873_v15, %v4773_v49  ;;  %v869_v15 = vadd.f32 %v868_v51, %v4788_v50 }
  0x8f   : > { %9151 = vst [vmem:[#allocation83_spill] sm:$0xff] %v4895_v31  ;;  %v4921_v43 = vmax.f32 %v1552_v0, %v4914_v30  ;;  %v4924_v41 = vld [vmem:[%s4441_s12 + $0x490] sm:$0xff]  ;;  %v4930_v19 = vld [vmem:[%s4441_s12 + $0x4e8] sm:$0xff]  ;;  %v4935_v63 = vld [vmem:[%s4441_s12 + $0x4b8] sm:$0xff]  ;;  %v893_v4 = vadd.f32 %v892_v28, %v4830_v61  ;;  %v888_v61 = vadd.f32 %v887_v17, %v4841_v37  ;;  %v903_v17 = vadd.f32 %v902_v8, %v4871_v11 }
  0x90   : > { %9154 = vst [vmem:[#allocation86_spill] sm:$0xff] %v4935_v63  ;;  %v4938_v57 = vmax.f32 %v1547_v22, %v4924_v41  ;;  %v1562_v0 = vmax.f32 %v4927_v29, %v4930_v19  ;;  %v4943_v58 = vld [vmem:[%s4441_s12 + $0x4c0] sm:$0xff]  ;;  %v4946_v31 = vld [vmem:[%s4441_s12 + $0x4c8] sm:$0xff]  ;;  %v4954_v22 = vld [vmem:[%s4441_s12 + $0x498] sm:$0xff] }
  0x91   : > { %9153 = vst [vmem:[#allocation85_spill] sm:$0xff] %v4921_v43  ;;  %865 = vadd.xlane.f32.xlu1 %v864_v5  ;;  %9156 = vst [vmem:[#allocation88_spill] sm:$0xff] %v4954_v22  ;;  %v4957_v49 = vld [vmem:[%s4441_s12 + $0x4f0] sm:$0xff]  ;;  %v1557_v48 = vmax.f32 %v4943_v58, %v4946_v31  ;;  %v878_v5 = vadd.f32 %v877_v9, %v4801_v62  ;;  %v4973_v43 = vld [vmem:[%s4441_s12 + $0x520] sm:$0xff]  ;;  %v894_v11 = vadd.f32 %v893_v4, %v4852_v33 }
  0x92   : > { %9155 = vst [vmem:[#allocation87_spill] sm:$0xff] %v4938_v57  ;;  %860 = vadd.xlane.f32.xlu0 %v859_v21  ;;  %v4967_v51 = vmax.f32 %v1562_v0, %v4957_v49  ;;  %v4970_v36 = vld [vmem:[%s4441_s12 + $0x4d0] sm:$0xff]  ;;  %v4976_v50 = vld [vmem:[%s4441_s12 + $0x528] sm:$0xff]  ;;  %v4979_v21 = vld [vmem:[%s4441_s12 + $0x4f8] sm:$0xff]  ;;  %v884_v0 = vadd.f32 %v883_v2, %v4810_v59  ;;  %v897_v2 = vadd.f32 %v4863_v54, %v4860_v32 }
  0x93   : > { %9158 = vst [vmem:[#allocation90_spill] sm:$0xff] %v4979_v21  ;;  %v4982_v62 = vmax.f32 %v1557_v48, %v4970_v36  ;;  %v1572_v1 = vmax.f32 %v4973_v43, %v4976_v50  ;;  %v4987_v56 = vld [vmem:[%s4441_s12 + $0x500] sm:$0xff]  ;;  %v4990_v9 = vld [vmem:[%s4441_s12 + $0x508] sm:$0xff]  ;;  %v4998_v48 = vld [vmem:[%s4441_s12 + $0x4d8] sm:$0xff]  ;;  %v889_v4 = vadd.f32 %v888_v61, %v4868_v10 }
  0x94   : > { %9157 = vst [vmem:[#allocation89_spill] sm:$0xff] %v4967_v51  ;;  %9160 = vst [vmem:[#allocation92_spill] sm:$0xff] %v4998_v48  ;;  %v5001_v38 = vld [vmem:[%s4441_s12 + $0x530] sm:$0xff]  ;;  %v1567_v42 = vmax.f32 %v4987_v56, %v4990_v9  ;;  %v5017_v51 = vld [vmem:[%s4441_s12 + $0x560] sm:$0xff] }
  0x95   : > { %9159 = vst [vmem:[#allocation91_spill] sm:$0xff] %v4982_v62  ;;  %875 = vadd.xlane.f32.xlu1 %v874_v53  ;;  %v5011_v45 = vmax.f32 %v1572_v1, %v5001_v38  ;;  %v5014_v57 = vld [vmem:[%s4441_s12 + $0x510] sm:$0xff]  ;;  %v5020_v59 = vld [vmem:[%s4441_s12 + $0x568] sm:$0xff]  ;;  %v879_v53 = vadd.f32 %v878_v5, %v4827_v24  ;;  %v5025_v54 = vld [vmem:[%s4441_s12 + $0x538] sm:$0xff]  ;;  %v912_v62 = vadd.f32 %v4887_v46, %v4884_v23 }
  0x96   : > { %870 = vadd.xlane.f32.xlu0 %v869_v15  ;;  %9162 = vst [vmem:[#allocation94_spill] sm:$0xff] %v5025_v54  ;;  %v5028_v32 = vmax.f32 %v1567_v42, %v5014_v57  ;;  %v1582_v28 = vmax.f32 %v5017_v51, %v5020_v59  ;;  %v5033_v1 = vld [vmem:[%s4441_s12 + $0x540] sm:$0xff]  ;;  %v5036_v25 = vld [vmem:[%s4441_s12 + $0x548] sm:$0xff]  ;;  %v5041_v5 = vld [vmem:[%s4441_s12 + $0x518] sm:$0xff]  ;;  %v898_v46 = vadd.f32 %v897_v2, %v4881_v6 }
  0x97   : > { %9161 = vst [vmem:[#allocation93_spill] sm:$0xff] %v5011_v45  ;;  %9164 = vst [vmem:[#allocation96_spill] sm:$0xff] %v5041_v5  ;;  %v5044_v37 = vld [vmem:[%s4441_s12 + $0x570] sm:$0xff]  ;;  %v1577_v42 = vmax.f32 %v5033_v1, %v5036_v25  ;;  %v5060_v45 = vld [vmem:[%s4441_s12 + $0x5a0] sm:$0xff]  ;;  %v907_v6 = vadd.f32 %v4903_v52, %v4900_v44  ;;  %v913_v10 = vadd.f32 %v912_v62, %v4914_v30 }
  0x98   : > { %9163 = vst [vmem:[#allocation95_spill] sm:$0xff] %v5028_v32  ;;  %v5054_v20 = vmax.f32 %v1582_v28, %v5044_v37  ;;  %v5057_v15 = vld [vmem:[%s4441_s12 + $0x550] sm:$0xff]  ;;  %v5063_v3 = vld [vmem:[%s4441_s12 + $0x5a8] sm:$0xff]  ;;  %v5068_v23 = vld [vmem:[%s4441_s12 + $0x578] sm:$0xff]  ;;  %v922_v30 = vadd.f32 %v4930_v19, %v4927_v29  ;;  %v917_v19 = vadd.f32 %v4946_v31, %v4943_v58  ;;  %v932_v29 = vadd.f32 %v4976_v50, %v4973_v43 }
  0x99   : > { %885 = vadd.xlane.f32.xlu1 %v884_v0  ;;  %9166 = vst [vmem:[#allocation98_spill] sm:$0xff] %v5068_v23  ;;  %v5071_v8 = vmax.f32 %v1577_v42, %v5057_v15  ;;  %v1592_v28 = vmax.f32 %v5060_v45, %v5063_v3  ;;  %v5076_v24 = vld [vmem:[%s4441_s12 + $0x580] sm:$0xff]  ;;  %v5079_v32 = vld [vmem:[%s4441_s12 + $0x588] sm:$0xff]  ;;  %v5087_v2 = vld [vmem:[%s4441_s12 + $0x558] sm:$0xff]  ;;  %v927_v50 = vadd.f32 %v4990_v9, %v4987_v56 }
  0x9a   : > { %9165 = vst [vmem:[#allocation97_spill] sm:$0xff] %v5054_v20  ;;  %880 = vadd.xlane.f32.xlu0 %v879_v53  ;;  %9168 = vst [vmem:[#allocation100_spill] sm:$0xff] %v5087_v2  ;;  %v5090_v42 = vld [vmem:[%s4441_s12 + $0x5b0] sm:$0xff]  ;;  %v1587_v33 = vmax.f32 %v5076_v24, %v5079_v32  ;;  %v5103_v44 = vld [vmem:[%s4441_s12 + $0x5e0] sm:$0xff]  ;;  %v904_v20 = vadd.f32 %v903_v17, %v4892_v16  ;;  %v899_v17 = vadd.f32 %v898_v46, %v4911_v27 }
  0x9b   : > { %9167 = vst [vmem:[#allocation99_spill] sm:$0xff] %v5071_v8  ;;  %v5097_v61 = vmax.f32 %v1592_v28, %v5090_v42  ;;  %v5100_v52 = vld [vmem:[%s4441_s12 + $0x590] sm:$0xff]  ;;  %v5106_v0 = vld [vmem:[%s4441_s12 + $0x5e8] sm:$0xff]  ;;  %v5111_v12 = vld [vmem:[%s4441_s12 + $0x5b8] sm:$0xff]  ;;  %v923_v7 = vadd.f32 %v922_v30, %v4957_v49  ;;  %v918_v49 = vadd.f32 %v917_v19, %v4970_v36  ;;  %v933_v19 = vadd.f32 %v932_v29, %v5001_v38 }
  0x9c   : > { %9170 = vst [vmem:[#allocation102_spill] sm:$0xff] %v5111_v12  ;;  %v5114_v47 = vmax.f32 %v1587_v33, %v5100_v52  ;;  %v1602_v28 = vmax.f32 %v5103_v44, %v5106_v0  ;;  %v5119_v53 = vld [vmem:[%s4441_s12 + $0x5c0] sm:$0xff]  ;;  %v5122_v8 = vld [vmem:[%s4441_s12 + $0x5c8] sm:$0xff]  ;;  %v5130_v62 = vld [vmem:[%s4441_s12 + $0x598] sm:$0xff] }
  0x9d   : > { %9169 = vst [vmem:[#allocation101_spill] sm:$0xff] %v5097_v61  ;;  %895 = vadd.xlane.f32.xlu1 %v894_v11  ;;  %9172 = vst [vmem:[#allocation104_spill] sm:$0xff] %v5130_v62  ;;  %v5133_v16 = vld [vmem:[%s4441_s12 + $0x5f0] sm:$0xff]  ;;  %v1597_v60 = vmax.f32 %v5119_v53, %v5122_v8  ;;  %v908_v11 = vadd.f32 %v907_v6, %v4924_v41  ;;  %v5149_v61 = vld [vmem:[%s4441_s12 + $0x620] sm:$0xff]  ;;  %v924_v38 = vadd.f32 %v923_v7, %v4979_v21 }
  0x9e   : > { %9171 = vst [vmem:[#allocation103_spill] sm:$0xff] %v5114_v47  ;;  %890 = vadd.xlane.f32.xlu0 %v889_v4  ;;  %v5143_v46 = vmax.f32 %v1602_v28, %v5133_v16  ;;  %v5146_v33 = vld [vmem:[%s4441_s12 + $0x5d0] sm:$0xff]  ;;  %v5152_v27 = vld [vmem:[%s4441_s12 + $0x628] sm:$0xff]  ;;  %v5155_v4 = vld [vmem:[%s4441_s12 + $0x5f8] sm:$0xff]  ;;  %v914_v28 = vadd.f32 %v913_v10, %v4935_v63  ;;  %v919_v7 = vadd.f32 %v918_v49, %v4998_v48 }
  0x9f   : > { %9174 = vst [vmem:[#allocation106_spill] sm:$0xff] %v5155_v4  ;;  %v5158_v41 = vmax.f32 %v1597_v60, %v5146_v33  ;;  %v1612_v31 = vmax.f32 %v5149_v61, %v5152_v27  ;;  %v5163_v58 = vld [vmem:[%s4441_s12 + $0x600] sm:$0xff]  ;;  %v5166_v6 = vld [vmem:[%s4441_s12 + $0x608] sm:$0xff]  ;;  %v5174_v60 = vld [vmem:[%s4441_s12 + $0x5d8] sm:$0xff] }
  0xa0   : > { %9173 = vst [vmem:[#allocation105_spill] sm:$0xff] %v5143_v46  ;;  %9176 = vst [vmem:[#allocation108_spill] sm:$0xff] %v5174_v60  ;;  %v5177_v40 = vld [vmem:[%s4441_s12 + $0x630] sm:$0xff]  ;;  %v1607_v55 = vmax.f32 %v5163_v58, %v5166_v6  ;;  %v5193_v46 = vld [vmem:[%s4441_s12 + $0x660] sm:$0xff] }
  0xa1   : > { %9175 = vst [vmem:[#allocation107_spill] sm:$0xff] %v5158_v41  ;;  %905 = vadd.xlane.f32.xlu1 %v904_v20  ;;  %v5187_v43 = vmax.f32 %v1612_v31, %v5177_v40  ;;  %v5190_v47 = vld [vmem:[%s4441_s12 + $0x610] sm:$0xff]  ;;  %v5196_v63 = vld [vmem:[%s4441_s12 + $0x668] sm:$0xff]  ;;  %v909_v20 = vadd.f32 %v908_v11, %v4954_v22  ;;  %v5201_v56 = vld [vmem:[%s4441_s12 + $0x638] sm:$0xff]  ;;  %v942_v41 = vadd.f32 %v5020_v59, %v5017_v51 }
  0xa2   : > { %900 = vadd.xlane.f32.xlu0 %v899_v17  ;;  %9178 = vst [vmem:[#allocation110_spill] sm:$0xff] %v5201_v56  ;;  %v5204_v9 = vmax.f32 %v1607_v55, %v5190_v47  ;;  %v1622_v30 = vmax.f32 %v5193_v46, %v5196_v63  ;;  %v5209_v31 = vld [vmem:[%s4441_s12 + $0x640] sm:$0xff]  ;;  %v5212_v10 = vld [vmem:[%s4441_s12 + $0x648] sm:$0xff]  ;;  %v5217_v11 = vld [vmem:[%s4441_s12 + $0x618] sm:$0xff]  ;;  %v928_v59 = vadd.f32 %v927_v50, %v5014_v57 }
  0xa3   : > { %9177 = vst [vmem:[#allocation109_spill] sm:$0xff] %v5187_v43  ;;  %9180 = vst [vmem:[#allocation112_spill] sm:$0xff] %v5217_v11  ;;  %v5220_v36 = vld [vmem:[%s4441_s12 + $0x670] sm:$0xff]  ;;  %v1617_v55 = vmax.f32 %v5209_v31, %v5212_v10  ;;  %v5236_v43 = vld [vmem:[%s4441_s12 + $0x6a0] sm:$0xff]  ;;  %v937_v57 = vadd.f32 %v5036_v25, %v5033_v1  ;;  %v943_v48 = vadd.f32 %v942_v41, %v5044_v37 }
  0xa4   : > { %9179 = vst [vmem:[#allocation111_spill] sm:$0xff] %v5204_v9  ;;  %v5230_v13 = vmax.f32 %v1622_v30, %v5220_v36  ;;  %v5233_v17 = vld [vmem:[%s4441_s12 + $0x650] sm:$0xff]  ;;  %v5239_v26 = vld [vmem:[%s4441_s12 + $0x6a8] sm:$0xff]  ;;  %v5244_v51 = vld [vmem:[%s4441_s12 + $0x678] sm:$0xff]  ;;  %v952_v37 = vadd.f32 %v5063_v3, %v5060_v45  ;;  %v947_v3 = vadd.f32 %v5079_v32, %v5076_v24  ;;  %v962_v45 = vadd.f32 %v5106_v0, %v5103_v44 }
  0xa5   : > { %915 = vadd.xlane.f32.xlu1 %v914_v28  ;;  %9182 = vst [vmem:[#allocation114_spill] sm:$0xff] %v5244_v51  ;;  %v5247_v29 = vmax.f32 %v1617_v55, %v5233_v17  ;;  %v1632_v30 = vmax.f32 %v5236_v43, %v5239_v26  ;;  %v5252_v22 = vld [vmem:[%s4441_s12 + $0x680] sm:$0xff]  ;;  %v5255_v9 = vld [vmem:[%s4441_s12 + $0x688] sm:$0xff]  ;;  %v5263_v50 = vld [vmem:[%s4441_s12 + $0x658] sm:$0xff] }
  0xa6   : > { %9181 = vst [vmem:[#allocation113_spill] sm:$0xff] %v5230_v13  ;;  %910 = vadd.xlane.f32.xlu0 %v909_v20  ;;  %9184 = vst [vmem:[#allocation116_spill] sm:$0xff] %v5263_v50  ;;  %v5266_v55 = vld [vmem:[%s4441_s12 + $0x6b0] sm:$0xff]  ;;  %v1627_v21 = vmax.f32 %v5252_v22, %v5255_v9  ;;  %v5279_v1 = vld [vmem:[%s4441_s12 + $0x6e0] sm:$0xff]  ;;  %v934_v13 = vadd.f32 %v933_v19, %v5025_v54  ;;  %v929_v19 = vadd.f32 %v928_v59, %v5041_v5 }
  0xa7   : > { %9183 = vst [vmem:[#allocation115_spill] sm:$0xff] %v5247_v29  ;;  %v5273_v49 = vmax.f32 %v1632_v30, %v5266_v55  ;;  %v5276_v25 = vld [vmem:[%s4441_s12 + $0x690] sm:$0xff]  ;;  %v5282_v28 = vld [vmem:[%s4441_s12 + $0x6e8] sm:$0xff]  ;;  %v5287_v34 = vld [vmem:[%s4441_s12 + $0x6b8] sm:$0xff] }
  0xa8   : > { %9186 = vst [vmem:[#allocation118_spill] sm:$0xff] %v5287_v34  ;;  %v5290_v14 = vmax.f32 %v1627_v21, %v5276_v25  ;;  %v1642_v30 = vmax.f32 %v5279_v1, %v5282_v28  ;;  %v5295_v20 = vld [vmem:[%s4441_s12 + $0x6c0] sm:$0xff]  ;;  %v5298_v29 = vld [vmem:[%s4441_s12 + $0x6c8] sm:$0xff]  ;;  %v5306_v41 = vld [vmem:[%s4441_s12 + $0x698] sm:$0xff] }
  0xa9   : > { %9185 = vst [vmem:[#allocation117_spill] sm:$0xff] %v5273_v49  ;;  %925 = vadd.xlane.f32.xlu1 %v924_v38  ;;  %9188 = vst [vmem:[#allocation120_spill] sm:$0xff] %v5306_v41  ;;  %v5309_v54 = vld [vmem:[%s4441_s12 + $0x6f0] sm:$0xff]  ;;  %v1637_v18 = vmax.f32 %v5295_v20, %v5298_v29  ;;  %v938_v38 = vadd.f32 %v937_v57, %v5057_v15  ;;  %v5325_v49 = vld [vmem:[%s4441_s12 + $0x720] sm:$0xff] }
  0xaa   : > { %9187 = vst [vmem:[#allocation119_spill] sm:$0xff] %v5290_v14  ;;  %920 = vadd.xlane.f32.xlu0 %v919_v7  ;;  %v5319_v59 = vmax.f32 %v1642_v30, %v5309_v54  ;;  %v5322_v21 = vld [vmem:[%s4441_s12 + $0x6d0] sm:$0xff]  ;;  %v5328_v5 = vld [vmem:[%s4441_s12 + $0x728] sm:$0xff]  ;;  %v5331_v7 = vld [vmem:[%s4441_s12 + $0x6f8] sm:$0xff]  ;;  %v944_v30 = vadd.f32 %v943_v48, %v5068_v23  ;;  %v957_v48 = vadd.f32 %v5122_v8, %v5119_v53 }
  0xab   : > { %9190 = vst [vmem:[#allocation122_spill] sm:$0xff] %v5322_v21  ;;  %9191 = vst [vmem:[#allocation123_spill] sm:$0xff] %v5331_v7  ;;  %v5334_v15 = vmax.f32 %v1637_v18, %v5322_v21  ;;  %v1652_v24 = vmax.f32 %v5325_v49, %v5328_v5  ;;  %v5339_v32 = vld [vmem:[%s4441_s12 + $0x700] sm:$0xff]  ;;  %v5342_v57 = vld [vmem:[%s4441_s12 + $0x708] sm:$0xff]  ;;  %v953_v21 = vadd.f32 %v952_v37, %v5090_v42 }
  0xac   : > { %9189 = vst [vmem:[#allocation121_spill] sm:$0xff] %v5319_v59  ;;  %v5350_v18 = vld [vmem:[%s4441_s12 + $0x6d8] sm:$0xff]  ;;  %v5353_v35 = vld [vmem:[%s4441_s12 + $0x730] sm:$0xff]  ;;  %v1647_v39 = vmax.f32 %v5339_v32, %v5342_v57  ;;  %v5369_v59 = vld [vmem:[%s4441_s12 + $0x760] sm:$0xff]  ;;  %v948_v8 = vadd.f32 %v947_v3, %v5100_v52  ;;  %v963_v3 = vadd.f32 %v962_v45, %v5133_v16 }
  0xad   : > { %9192 = vst [vmem:[#allocation124_spill] sm:$0xff] %v5334_v15  ;;  %9193 = vst [vmem:[#allocation125_spill] sm:$0xff] %v5350_v18  ;;  %935 = vadd.xlane.f32.xlu1 %v934_v13  ;;  %v5363_v44 = vmax.f32 %v1652_v24, %v5353_v35  ;;  %v5366_v14 = vld [vmem:[%s4441_s12 + $0x710] sm:$0xff]  ;;  %v5372_v23 = vld [vmem:[%s4441_s12 + $0x768] sm:$0xff]  ;;  %v939_v13 = vadd.f32 %v938_v38, %v5087_v2  ;;  %v972_v15 = vadd.f32 %v5152_v27, %v5149_v61 }
  0xae   : > { %9195 = vst [vmem:[#allocation127_spill] sm:$0xff] %v5366_v14  ;;  %930 = vadd.xlane.f32.xlu0 %v929_v19  ;;  %v5377_v42 = vld [vmem:[%s4441_s12 + $0x738] sm:$0xff]  ;;  %v5380_v53 = vmax.f32 %v1647_v39, %v5366_v14  ;;  %v1662_v37 = vmax.f32 %v5369_v59, %v5372_v23  ;;  %v5385_v24 = vld [vmem:[%s4441_s12 + $0x740] sm:$0xff]  ;;  %v5388_v0 = vld [vmem:[%s4441_s12 + $0x748] sm:$0xff]  ;;  %v954_v16 = vadd.f32 %v953_v21, %v5111_v12 }
  0xaf   : > { %9194 = vst [vmem:[#allocation126_spill] sm:$0xff] %v5363_v44  ;;  %9196 = vst [vmem:[#allocation128_spill] sm:$0xff] %v5377_v42  ;;  %v5393_v38 = vld [vmem:[%s4441_s12 + $0x718] sm:$0xff]  ;;  %v5396_v52 = vld [vmem:[%s4441_s12 + $0x770] sm:$0xff]  ;;  %v1657_v39 = vmax.f32 %v5385_v24, %v5388_v0  ;;  %v958_v27 = vadd.f32 %v957_v48, %v5146_v33  ;;  %v949_v21 = vadd.f32 %v948_v8, %v5130_v62 }
  0xb0   : > { %9197 = vst [vmem:[#allocation129_spill] sm:$0xff] %v5380_v53  ;;  %9198 = vst [vmem:[#allocation130_spill] sm:$0xff] %v5393_v38  ;;  %v5406_v14 = vmax.f32 %v1662_v37, %v5396_v52  ;;  %v5409_v19 = vld [vmem:[%s4441_s12 + $0x750] sm:$0xff]  ;;  %v5412_v44 = vld [vmem:[%s4441_s12 + $0x7a0] sm:$0xff]  ;;  %v967_v33 = vadd.f32 %v5166_v6, %v5163_v58  ;;  %v973_v62 = vadd.f32 %v972_v15, %v5177_v40 }
  0xb1   : > { %v5415_v42 = vld [vmem:[%s4441_s12 + $0x7a8] sm:$0xff]  ;;  %945 = vadd.xlane.f32.xlu1 %v944_v30  ;;  %v5420_v61 = vld [vmem:[%s4441_s12 + $0x778] sm:$0xff]  ;;  %v5423_v45 = vmax.f32 %v1657_v39, %v5409_v19  ;;  %v5428_v2 = vld [vmem:[%s4441_s12 + $0x780] sm:$0xff]  ;;  %v982_v40 = vadd.f32 %v5196_v63, %v5193_v46  ;;  %v977_v63 = vadd.f32 %v5212_v10, %v5209_v31  ;;  %v992_v46 = vadd.f32 %v5239_v26, %v5236_v43 }
  0xb2   : > { %9199 = vst [vmem:[#allocation131_spill] sm:$0xff] %v5406_v14  ;;  %9200 = vst [vmem:[#allocation132_spill] sm:$0xff] %v5420_v61  ;;  %v1672_v37 = vmax.f32 %v5412_v44, %v5415_v42  ;;  %v5431_v53 = vld [vmem:[%s4441_s12 + $0x788] sm:$0xff]  ;;  %940 = vadd.xlane.f32.xlu0 %v939_v13  ;;  %v5439_v48 = vld [vmem:[%s4441_s12 + $0x758] sm:$0xff]  ;;  %v964_v14 = vadd.f32 %v963_v3, %v5155_v4  ;;  %v959_v3 = vadd.f32 %v958_v27, %v5174_v60 }
  0xb3   : > { %9201 = vst [vmem:[#allocation133_spill] sm:$0xff] %v5423_v45  ;;  %9202 = vst [vmem:[#allocation134_spill] sm:$0xff] %v5431_v53  ;;  %v5442_v39 = vld [vmem:[%s4441_s12 + $0x7b0] sm:$0xff]  ;;  %v1667_v12 = vmax.f32 %v5428_v2, %v5431_v53  ;;  %v5455_v6 = vld [vmem:[%s4441_s12 + $0x7e0] sm:$0xff]  ;;  %v987_v26 = vadd.f32 %v5255_v9, %v5252_v22  ;;  %v978_v22 = vadd.f32 %v977_v63, %v5233_v17 }
  0xb4   : > { %9203 = vst [vmem:[#allocation135_spill] sm:$0xff] %v5439_v48  ;;  %v5449_v8 = vmax.f32 %v1672_v37, %v5442_v39  ;;  %v5452_v58 = vld [vmem:[%s4441_s12 + $0x790] sm:$0xff]  ;;  %v5458_v30 = vld [vmem:[%s4441_s12 + $0x7e8] sm:$0xff]  ;;  %v5463_v61 = vld [vmem:[%s4441_s12 + $0x7b8] sm:$0xff]  ;;  %v993_v63 = vadd.f32 %v992_v46, %v5266_v55 }
  0xb5   : > { %9205 = vst [vmem:[#allocation137_spill] sm:$0xff] %v5452_v58  ;;  %9206 = vst [vmem:[#allocation138_spill] sm:$0xff] %v5463_v61  ;;  %v5466_v53 = vmax.f32 %v1667_v12, %v5452_v58  ;;  %v1682_v37 = vmax.f32 %v5455_v6, %v5458_v30  ;;  %v5471_v13 = vld [vmem:[%s4441_s12 + $0x7c0] sm:$0xff]  ;;  %v5474_v45 = vld [vmem:[%s4441_s12 + $0x7c8] sm:$0xff]  ;;  %955 = vadd.xlane.f32.xlu1 %v954_v16  ;;  %v968_v16 = vadd.f32 %v967_v33, %v5190_v47 }
  0xb6   : > { %9204 = vst [vmem:[#allocation136_spill] sm:$0xff] %v5449_v8  ;;  %v5482_v15 = vld [vmem:[%s4441_s12 + $0x798] sm:$0xff]  ;;  %v5485_v4 = vld [vmem:[%s4441_s12 + $0x7f0] sm:$0xff]  ;;  %v1677_v58 = vmax.f32 %v5471_v13, %v5474_v45  ;;  %950 = vadd.xlane.f32.xlu0 %v949_v21  ;;  %v5501_v8 = vld [vmem:[%s4441_s12 + $0x820] sm:$0xff] }
  0xb7   : > { %9207 = vst [vmem:[#allocation139_spill] sm:$0xff] %v5466_v53  ;;  %9208 = vst [vmem:[#allocation140_spill] sm:$0xff] %v5482_v15  ;;  %v5495_v27 = vmax.f32 %v1682_v37, %v5485_v4  ;;  %v5498_v12 = vld [vmem:[%s4441_s12 + $0x7d0] sm:$0xff]  ;;  %v5504_v60 = vld [vmem:[%s4441_s12 + $0x828] sm:$0xff]  ;;  %v974_v37 = vadd.f32 %v973_v62, %v5201_v56 }
  0xb8   : > { %9209 = vst [vmem:[#allocation141_spill] sm:$0xff] %v5485_v4  ;;  %9211 = vst [vmem:[#allocation143_spill] sm:$0xff] %v5498_v12  ;;  %v5507_v21 = vld [vmem:[%s4441_s12 + $0x7f8] sm:$0xff]  ;;  %v5510_v47 = vmax.f32 %v1677_v58, %v5498_v12  ;;  %v1692_v10 = vmax.f32 %v5501_v8, %v5504_v60  ;;  %v5515_v31 = vld [vmem:[%s4441_s12 + $0x800] sm:$0xff]  ;;  %v983_v4 = vadd.f32 %v982_v40, %v5220_v36 }
  0xb9   : > { %9210 = vst [vmem:[#allocation142_spill] sm:$0xff] %v5495_v27  ;;  %9212 = vst [vmem:[#allocation144_spill] sm:$0xff] %v5507_v21  ;;  %v5518_v33 = vld [vmem:[%s4441_s12 + $0x808] sm:$0xff]  ;;  %v5526_v58 = vld [vmem:[%s4441_s12 + $0x7d8] sm:$0xff]  ;;  %965 = vadd.xlane.f32.xlu1 %v964_v14  ;;  %v969_v14 = vadd.f32 %v968_v16, %v5217_v11 }
  0xba   : > { %9213 = vst [vmem:[#allocation145_spill] sm:$0xff] %v5510_v47  ;;  %9214 = vst [vmem:[#allocation146_spill] sm:$0xff] %v5526_v58  ;;  %v5529_v12 = vld [vmem:[%s4441_s12 + $0x830] sm:$0xff]  ;;  %v1687_v15 = vmax.f32 %v5515_v31, %v5518_v33  ;;  %v5545_v27 = vld [vmem:[%s4441_s12 + $0x860] sm:$0xff]  ;;  %960 = vadd.xlane.f32.xlu0 %v959_v3  ;;  %v1002_v47 = vadd.f32 %v5282_v28, %v5279_v1  ;;  %v984_v55 = vadd.f32 %v983_v4, %v5244_v51 }
  0xbb   : > { %v5539_v43 = vmax.f32 %v1692_v10, %v5529_v12  ;;  %v5542_v53 = vld [vmem:[%s4441_s12 + $0x810] sm:$0xff]  ;;  %v5548_v56 = vld [vmem:[%s4441_s12 + $0x868] sm:$0xff]  ;;  %v5553_v9 = vld [vmem:[%s4441_s12 + $0x838] sm:$0xff]  ;;  %v988_v28 = vadd.f32 %v987_v26, %v5276_v25  ;;  %v979_v4 = vadd.f32 %v978_v22, %v5263_v50  ;;  %v997_v25 = vadd.f32 %v5298_v29, %v5295_v20 }
  0xbc   : > { %9216 = vst [vmem:[#allocation148_spill] sm:$0xff] %v5553_v9  ;;  %v5556_v36 = vmax.f32 %v1687_v15, %v5542_v53  ;;  %v1702_v40 = vmax.f32 %v5545_v27, %v5548_v56  ;;  %v5561_v10 = vld [vmem:[%s4441_s12 + $0x840] sm:$0xff]  ;;  %v5564_v62 = vld [vmem:[%s4441_s12 + $0x848] sm:$0xff]  ;;  %v5569_v16 = vld [vmem:[%s4441_s12 + $0x818] sm:$0xff]  ;;  %v1003_v50 = vadd.f32 %v1002_v47, %v5309_v54  ;;  %v1012_v54 = vadd.f32 %v5328_v5, %v5325_v49 }
  0xbd   : > { %9215 = vst [vmem:[#allocation147_spill] sm:$0xff] %v5539_v43  ;;  %9218 = vst [vmem:[#allocation150_spill] sm:$0xff] %v5569_v16  ;;  %v5572_v17 = vld [vmem:[%s4441_s12 + $0x870] sm:$0xff]  ;;  %v1697_v15 = vmax.f32 %v5561_v10, %v5564_v62  ;;  %v5588_v43 = vld [vmem:[%s4441_s12 + $0x8a0] sm:$0xff]  ;;  %975 = vadd.xlane.f32.xlu1 %v974_v37  ;;  %v1007_v5 = vadd.f32 %v5342_v57, %v5339_v32  ;;  %v1022_v49 = vadd.f32 %v5372_v23, %v5369_v59 }
  0xbe   : > { %9217 = vst [vmem:[#allocation149_spill] sm:$0xff] %v5556_v36  ;;  %v5582_v58 = vmax.f32 %v1702_v40, %v5572_v17  ;;  %v5585_v3 = vld [vmem:[%s4441_s12 + $0x850] sm:$0xff]  ;;  %v5591_v9 = vld [vmem:[%s4441_s12 + $0x8a8] sm:$0xff]  ;;  %v5596_v1 = vld [vmem:[%s4441_s12 + $0x878] sm:$0xff]  ;;  %970 = vadd.xlane.f32.xlu0 %v969_v14  ;;  %v1017_v23 = vadd.f32 %v5388_v0, %v5385_v24 }
  0xbf   : > { %9220 = vst [vmem:[#allocation152_spill] sm:$0xff] %v5596_v1  ;;  %v5599_v46 = vmax.f32 %v1697_v15, %v5585_v3  ;;  %v1712_v40 = vmax.f32 %v5588_v43, %v5591_v9  ;;  %v5604_v11 = vld [vmem:[%s4441_s12 + $0x880] sm:$0xff]  ;;  %v5607_v36 = vld [vmem:[%s4441_s12 + $0x888] sm:$0xff]  ;;  %v5615_v26 = vld [vmem:[%s4441_s12 + $0x858] sm:$0xff] }
  0xc0   : > { %9219 = vst [vmem:[#allocation151_spill] sm:$0xff] %v5582_v58  ;;  %9222 = vst [vmem:[#allocation154_spill] sm:$0xff] %v5607_v36  ;;  %v5618_v15 = vld [vmem:[%s4441_s12 + $0x8b0] sm:$0xff]  ;;  %v1707_v51 = vmax.f32 %v5604_v11, %v5607_v36  ;;  %v5631_v20 = vld [vmem:[%s4441_s12 + $0x8e0] sm:$0xff]  ;;  %v994_v58 = vadd.f32 %v993_v63, %v5287_v34  ;;  %v989_v63 = vadd.f32 %v988_v28, %v5306_v41 }
  0xc1   : > { %9221 = vst [vmem:[#allocation153_spill] sm:$0xff] %v5599_v46  ;;  %9223 = vst [vmem:[#allocation155_spill] sm:$0xff] %v5615_v26  ;;  %v5625_v22 = vmax.f32 %v1712_v40, %v5618_v15  ;;  %v5628_v29 = vld [vmem:[%s4441_s12 + $0x890] sm:$0xff]  ;;  %v5634_v37 = vld [vmem:[%s4441_s12 + $0x8e8] sm:$0xff]  ;;  %985 = vadd.xlane.f32.xlu1 %v984_v55 }
  0xc2   : > { %9225 = vst [vmem:[#allocation157_spill] sm:$0xff] %v5628_v29  ;;  %v5639_v1 = vld [vmem:[%s4441_s12 + $0x8b8] sm:$0xff]  ;;  %v5642_v36 = vmax.f32 %v1707_v51, %v5628_v29  ;;  %v1722_v40 = vmax.f32 %v5631_v20, %v5634_v37  ;;  %v5647_v14 = vld [vmem:[%s4441_s12 + $0x8c0] sm:$0xff]  ;;  %v5650_v46 = vld [vmem:[%s4441_s12 + $0x8c8] sm:$0xff]  ;;  %980 = vadd.xlane.f32.xlu0 %v979_v4 }
  0xc3   : > { %9224 = vst [vmem:[#allocation156_spill] sm:$0xff] %v5625_v22  ;;  %9226 = vst [vmem:[#allocation158_spill] sm:$0xff] %v5639_v1  ;;  %v5658_v47 = vld [vmem:[%s4441_s12 + $0x898] sm:$0xff]  ;;  %v5661_v34 = vld [vmem:[%s4441_s12 + $0x8f0] sm:$0xff]  ;;  %v1717_v29 = vmax.f32 %v5647_v14, %v5650_v46  ;;  %v1013_v1 = vadd.f32 %v1012_v54, %v5353_v35 }
  0xc4   : > { %9227 = vst [vmem:[#allocation159_spill] sm:$0xff] %v5642_v36  ;;  %9228 = vst [vmem:[#allocation160_spill] sm:$0xff] %v5658_v47  ;;  %v9229_v26 = vld [vmem:[#allocation122_spill] sm:$0xff]  ;;  %v5671_v28 = vmax.f32 %v1722_v40, %v5661_v34  ;;  %v5674_v51 = vld [vmem:[%s4441_s12 + $0x8d0] sm:$0xff]  ;;  %v1004_v40 = vadd.f32 %v1003_v50, %v5331_v7 }
  0xc5   : > { %v998_v55 = vadd.f32 %v997_v25, %v9229_v26  ;;  %9231 = vst [vmem:[#allocation161_spill] sm:$0xff] %v5674_v51  ;;  %v5677_v22 = vld [vmem:[%s4441_s12 + $0x920] sm:$0xff]  ;;  %v5680_v41 = vld [vmem:[%s4441_s12 + $0x928] sm:$0xff]  ;;  %v5683_v4 = vld [vmem:[%s4441_s12 + $0x8f8] sm:$0xff]  ;;  %v5686_v25 = vmax.f32 %v1717_v29, %v5674_v51  ;;  %995 = vadd.xlane.f32.xlu1 %v994_v58 }
  0xc6   : > { %9230 = vst [vmem:[#allocation122_spill] sm:$0xff] %v5671_v28  ;;  %9232 = vst [vmem:[#allocation162_spill] sm:$0xff] %v5683_v4  ;;  %v1732_v32 = vmax.f32 %v5677_v22, %v5680_v41  ;;  %v5691_v57 = vld [vmem:[%s4441_s12 + $0x900] sm:$0xff]  ;;  %v5694_v26 = vld [vmem:[%s4441_s12 + $0x908] sm:$0xff]  ;;  %990 = vadd.xlane.f32.xlu0 %v989_v63 }
  0xc7   : > { %9233 = vst [vmem:[#allocation163_spill] sm:$0xff] %v5686_v25  ;;  %v5702_v29 = vld [vmem:[%s4441_s12 + $0x8d8] sm:$0xff]  ;;  %v5705_v47 = vld [vmem:[%s4441_s12 + $0x930] sm:$0xff]  ;;  %v1727_v51 = vmax.f32 %v5691_v57, %v5694_v26  ;;  %v5721_v28 = vld [vmem:[%s4441_s12 + $0x960] sm:$0xff]  ;;  %v999_v35 = vadd.f32 %v998_v55, %v5350_v18  ;;  %v1032_v18 = vadd.f32 %v5415_v42, %v5412_v44  ;;  %v1018_v44 = vadd.f32 %v1017_v23, %v5409_v19 }
  0xc8   : > { %9234 = vst [vmem:[#allocation164_spill] sm:$0xff] %v5702_v29  ;;  %v5715_v59 = vmax.f32 %v1732_v32, %v5705_v47  ;;  %v5718_v36 = vld [vmem:[%s4441_s12 + $0x910] sm:$0xff]  ;;  %v5724_v7 = vld [vmem:[%s4441_s12 + $0x968] sm:$0xff]  ;;  %v5729_v24 = vld [vmem:[%s4441_s12 + $0x938] sm:$0xff] }
  0xc9   : > { %9236 = vst [vmem:[#allocation166_spill] sm:$0xff] %v5718_v36  ;;  %9237 = vst [vmem:[#allocation167_spill] sm:$0xff] %v5724_v7  ;;  %v9238_v58 = vld [vmem:[#allocation127_spill] sm:$0xff]  ;;  %v5732_v54 = vmax.f32 %v1727_v51, %v5718_v36  ;;  %v1742_v32 = vmax.f32 %v5721_v28, %v5724_v7  ;;  %v5745_v55 = vld [vmem:[%s4441_s12 + $0x918] sm:$0xff]  ;;  %1005 = vadd.xlane.f32.xlu1 %v1004_v40 }
  0xca   : > { %9235 = vst [vmem:[#allocation165_spill] sm:$0xff] %v5715_v59  ;;  %v1008_v0 = vadd.f32 %v1007_v5, %v9238_v58  ;;  %9239 = vst [vmem:[#allocation127_spill] sm:$0xff] %v5729_v24  ;;  %v5737_v50 = vld [vmem:[%s4441_s12 + $0x940] sm:$0xff]  ;;  %v5740_v25 = vld [vmem:[%s4441_s12 + $0x948] sm:$0xff]  ;;  %v1023_v58 = vadd.f32 %v1022_v49, %v5396_v52  ;;  %1000 = vadd.xlane.f32.xlu0 %v999_v35 }
  0xcb   : > { %9240 = vst [vmem:[#allocation168_spill] sm:$0xff] %v5732_v54  ;;  %9241 = vst [vmem:[#allocation169_spill] sm:$0xff] %v5740_v25  ;;  %v5748_v5 = vld [vmem:[%s4441_s12 + $0x970] sm:$0xff]  ;;  %v1737_v51 = vmax.f32 %v5737_v50, %v5740_v25  ;;  %v5764_v59 = vld [vmem:[%s4441_s12 + $0x9a0] sm:$0xff] }
  0xcc   : > { %9242 = vst [vmem:[#allocation170_spill] sm:$0xff] %v5745_v55  ;;  %v5758_v7 = vmax.f32 %v1742_v32, %v5748_v5  ;;  %v5761_v63 = vld [vmem:[%s4441_s12 + $0x950] sm:$0xff]  ;;  %v5767_v24 = vld [vmem:[%s4441_s12 + $0x9a8] sm:$0xff]  ;;  %v5772_v42 = vld [vmem:[%s4441_s12 + $0x978] sm:$0xff] }
  0xcd   : > { %9244 = vst [vmem:[#allocation172_spill] sm:$0xff] %v5761_v63  ;;  %v9245_v25 = vld [vmem:[#allocation128_spill] sm:$0xff]  ;;  %9246 = vst [vmem:[#allocation173_spill] sm:$0xff] %v5772_v42  ;;  %v5775_v49 = vmax.f32 %v1737_v51, %v5761_v63  ;;  %v1752_v32 = vmax.f32 %v5764_v59, %v5767_v24  ;;  %v5780_v36 = vld [vmem:[%s4441_s12 + $0x980] sm:$0xff]  ;;  %v1033_v42 = vadd.f32 %v1032_v18, %v5442_v39 }
  0xce   : > { %9243 = vst [vmem:[#allocation171_spill] sm:$0xff] %v5758_v7  ;;  %v1014_v52 = vadd.f32 %v1013_v1, %v9245_v25  ;;  %v5783_v54 = vld [vmem:[%s4441_s12 + $0x988] sm:$0xff]  ;;  %v1009_v1 = vadd.f32 %v1008_v0, %v5393_v38  ;;  %v9249_v19 = vld [vmem:[#allocation134_spill] sm:$0xff]  ;;  %v5794_v25 = vld [vmem:[%s4441_s12 + $0x9b0] sm:$0xff]  ;;  %v1042_v18 = vadd.f32 %v5458_v30, %v5455_v6  ;;  %v1037_v30 = vadd.f32 %v5474_v45, %v5471_v13 }
  0xcf   : > { %9247 = vst [vmem:[#allocation174_spill] sm:$0xff] %v5775_v49  ;;  %9248 = vst [vmem:[#allocation175_spill] sm:$0xff] %v5783_v54  ;;  %v1027_v40 = vadd.f32 %v9249_v19, %v5428_v2  ;;  %v5791_v51 = vld [vmem:[%s4441_s12 + $0x958] sm:$0xff]  ;;  %v1747_v63 = vmax.f32 %v5780_v36, %v5783_v54  ;;  %v5801_v0 = vmax.f32 %v1752_v32, %v5794_v25  ;;  %v5804_v2 = vld [vmem:[%s4441_s12 + $0x990] sm:$0xff] }
  0xd0   : > { %9250 = vst [vmem:[#allocation134_spill] sm:$0xff] %v5791_v51  ;;  %9252 = vst [vmem:[#allocation177_spill] sm:$0xff] %v5804_v2  ;;  %v5807_v19 = vld [vmem:[%s4441_s12 + $0x9e0] sm:$0xff]  ;;  %v5810_v23 = vld [vmem:[%s4441_s12 + $0x9e8] sm:$0xff]  ;;  %1015 = vadd.xlane.f32.xlu1 %v1014_v52  ;;  %1010 = vadd.xlane.f32.xlu0 %v1009_v1  ;;  %v1052_v6 = vadd.f32 %v5504_v60, %v5501_v8  ;;  %v1047_v60 = vadd.f32 %v5518_v33, %v5515_v31 }
  0xd1   : > { %9251 = vst [vmem:[#allocation176_spill] sm:$0xff] %v5801_v0  ;;  %v9253_v7 = vld [vmem:[#allocation132_spill] sm:$0xff]  ;;  %v5815_v55 = vld [vmem:[%s4441_s12 + $0x9b8] sm:$0xff]  ;;  %v5818_v54 = vmax.f32 %v1747_v63, %v5804_v2  ;;  %v1762_v32 = vmax.f32 %v5807_v19, %v5810_v23  ;;  %v5823_v35 = vld [vmem:[%s4441_s12 + $0x9c0] sm:$0xff] }
  0xd2   : > { %v1024_v38 = vadd.f32 %v1023_v58, %v9253_v7  ;;  %v5826_v49 = vld [vmem:[%s4441_s12 + $0x9c8] sm:$0xff]  ;;  %v1019_v58 = vadd.f32 %v1018_v44, %v5439_v48  ;;  %v5834_v63 = vld [vmem:[%s4441_s12 + $0x998] sm:$0xff]  ;;  %v5837_v7 = vld [vmem:[%s4441_s12 + $0x9f0] sm:$0xff] }
  0xd3   : > { %9254 = vst [vmem:[#allocation178_spill] sm:$0xff] %v5818_v54  ;;  %9255 = vst [vmem:[#allocation179_spill] sm:$0xff] %v5834_v63  ;;  %v1757_v2 = vmax.f32 %v5823_v35, %v5826_v49  ;;  %v9256_v51 = vld [vmem:[#allocation137_spill] sm:$0xff]  ;;  %v5847_v44 = vmax.f32 %v1762_v32, %v5837_v7  ;;  %v5853_v0 = vld [vmem:[%s4441_s12 + $0xa20] sm:$0xff]  ;;  %v1034_v32 = vadd.f32 %v1033_v42, %v5463_v61 }
  0xd4   : > { %v1028_v52 = vadd.f32 %v1027_v40, %v9256_v51  ;;  %v5850_v39 = vld [vmem:[%s4441_s12 + $0x9d0] sm:$0xff]  ;;  %9259 = vst [vmem:[#allocation181_spill] sm:$0xff] %v5853_v0  ;;  %v5856_v48 = vld [vmem:[%s4441_s12 + $0xa28] sm:$0xff]  ;;  %v5859_v1 = vld [vmem:[%s4441_s12 + $0x9f8] sm:$0xff]  ;;  %1025 = vadd.xlane.f32.xlu1 %v1024_v38  ;;  %1020 = vadd.xlane.f32.xlu0 %v1019_v58 }
  0xd5   : > { %9257 = vst [vmem:[#allocation137_spill] sm:$0xff] %v5847_v44  ;;  %9258 = vst [vmem:[#allocation180_spill] sm:$0xff] %v5850_v39  ;;  %v5862_v40 = vmax.f32 %v1757_v2, %v5850_v39  ;;  %v1772_v45 = vmax.f32 %v5853_v0, %v5856_v48  ;;  %v5867_v13 = vld [vmem:[%s4441_s12 + $0xa00] sm:$0xff]  ;;  %v5870_v51 = vld [vmem:[%s4441_s12 + $0xa08] sm:$0xff] }
  0xd6   : > { %9260 = vst [vmem:[#allocation182_spill] sm:$0xff] %v5856_v48  ;;  %v5878_v2 = vld [vmem:[%s4441_s12 + $0x9d8] sm:$0xff]  ;;  %v5881_v39 = vld [vmem:[%s4441_s12 + $0xa30] sm:$0xff]  ;;  %v1767_v63 = vmax.f32 %v5867_v13, %v5870_v51  ;;  %v5897_v44 = vld [vmem:[%s4441_s12 + $0xa60] sm:$0xff] }
  0xd7   : > { %9261 = vst [vmem:[#allocation183_spill] sm:$0xff] %v5862_v40  ;;  %9262 = vst [vmem:[#allocation184_spill] sm:$0xff] %v5878_v2  ;;  %v9263_v48 = vld [vmem:[#allocation141_spill] sm:$0xff]  ;;  %v5891_v42 = vmax.f32 %v1772_v45, %v5881_v39  ;;  %v5900_v61 = vld [vmem:[%s4441_s12 + $0xa68] sm:$0xff] }
  0xd8   : > { %v1043_v0 = vadd.f32 %v1042_v18, %v9263_v48  ;;  %v5894_v54 = vld [vmem:[%s4441_s12 + $0xa10] sm:$0xff]  ;;  %9266 = vst [vmem:[#allocation186_spill] sm:$0xff] %v5900_v61  ;;  %v9268_v18 = vld [vmem:[#allocation143_spill] sm:$0xff]  ;;  %v5905_v33 = vld [vmem:[%s4441_s12 + $0xa38] sm:$0xff]  ;;  %v1782_v45 = vmax.f32 %v5897_v44, %v5900_v61  ;;  %1035 = vadd.xlane.f32.xlu1 %v1034_v32 }
  0xd9   : > { %9264 = vst [vmem:[#allocation141_spill] sm:$0xff] %v5891_v42  ;;  %9265 = vst [vmem:[#allocation185_spill] sm:$0xff] %v5894_v54  ;;  %v9267_v38 = vld [vmem:[#allocation140_spill] sm:$0xff]  ;;  %v1038_v31 = vadd.f32 %v1037_v30, %v9268_v18  ;;  %v5908_v8 = vmax.f32 %v1767_v63, %v5894_v54  ;;  %v5913_v40 = vld [vmem:[%s4441_s12 + $0xa40] sm:$0xff]  ;;  %v1053_v18 = vadd.f32 %v1052_v6, %v5529_v12 }
  0xda   : > { %v1029_v48 = vadd.f32 %v1028_v52, %v9267_v38  ;;  %9269 = vst [vmem:[#allocation143_spill] sm:$0xff] %v5905_v33  ;;  %v5916_v2 = vld [vmem:[%s4441_s12 + $0xa48] sm:$0xff]  ;;  %v5921_v52 = vld [vmem:[%s4441_s12 + $0xa18] sm:$0xff]  ;;  %v5924_v30 = vld [vmem:[%s4441_s12 + $0xa70] sm:$0xff]  ;;  %v1062_v38 = vadd.f32 %v5548_v56, %v5545_v27  ;;  %v1044_v12 = vadd.f32 %v1043_v0, %v5507_v21  ;;  %v1048_v56 = vadd.f32 %v1047_v60, %v5542_v53 }
  0xdb   : > { %9270 = vst [vmem:[#allocation187_spill] sm:$0xff] %v5908_v8  ;;  %9271 = vst [vmem:[#allocation188_spill] sm:$0xff] %v5921_v52  ;;  %v1777_v63 = vmax.f32 %v5913_v40, %v5916_v2  ;;  %v5934_v61 = vmax.f32 %v1782_v45, %v5924_v30  ;;  %v5937_v58 = vld [vmem:[%s4441_s12 + $0xa50] sm:$0xff]  ;;  %v5940_v42 = vld [vmem:[%s4441_s12 + $0xaa0] sm:$0xff]  ;;  %v1057_v53 = vadd.f32 %v5564_v62, %v5561_v10 }
  0xdc   : > { %9273 = vst [vmem:[#allocation190_spill] sm:$0xff] %v5937_v58  ;;  %v5943_v33 = vld [vmem:[%s4441_s12 + $0xaa8] sm:$0xff]  ;;  %v5948_v27 = vld [vmem:[%s4441_s12 + $0xa78] sm:$0xff]  ;;  %v5956_v54 = vld [vmem:[%s4441_s12 + $0xa80] sm:$0xff]  ;;  %1030 = vadd.xlane.f32.xlu0 %v1029_v48  ;;  %1045 = vadd.xlane.f32.xlu1 %v1044_v12 }
  0xdd   : > { %9272 = vst [vmem:[#allocation189_spill] sm:$0xff] %v5934_v61  ;;  %9274 = vst [vmem:[#allocation191_spill] sm:$0xff] %v5948_v27  ;;  %v5951_v6 = vmax.f32 %v1777_v63, %v5937_v58  ;;  %v1792_v45 = vmax.f32 %v5940_v42, %v5943_v33  ;;  %v5959_v8 = vld [vmem:[%s4441_s12 + $0xa88] sm:$0xff]  ;;  %v9277_v0 = vld [vmem:[#allocation146_spill] sm:$0xff]  ;;  %v1063_v27 = vadd.f32 %v1062_v38, %v5572_v17 }
  0xde   : > { %9276 = vst [vmem:[#allocation193_spill] sm:$0xff] %v5959_v8  ;;  %v1039_v32 = vadd.f32 %v1038_v31, %v9277_v0  ;;  %v5967_v63 = vld [vmem:[%s4441_s12 + $0xa58] sm:$0xff]  ;;  %v5970_v21 = vld [vmem:[%s4441_s12 + $0xab0] sm:$0xff]  ;;  %v1787_v58 = vmax.f32 %v5956_v54, %v5959_v8  ;;  %v5983_v10 = vld [vmem:[%s4441_s12 + $0xae0] sm:$0xff]  ;;  %v1072_v17 = vadd.f32 %v5591_v9, %v5588_v43  ;;  %v1058_v12 = vadd.f32 %v1057_v53, %v5585_v3 }
  0xdf   : > { %9275 = vst [vmem:[#allocation192_spill] sm:$0xff] %v5951_v6  ;;  %v5977_v31 = vmax.f32 %v1792_v45, %v5970_v21  ;;  %v5980_v62 = vld [vmem:[%s4441_s12 + $0xa90] sm:$0xff]  ;;  %v5986_v60 = vld [vmem:[%s4441_s12 + $0xae8] sm:$0xff]  ;;  %v5991_v52 = vld [vmem:[%s4441_s12 + $0xab8] sm:$0xff] }
  0xe0   : > { %9279 = vst [vmem:[#allocation195_spill] sm:$0xff] %v5980_v62  ;;  %v9280_v61 = vld [vmem:[#allocation148_spill] sm:$0xff]  ;;  %9281 = vst [vmem:[#allocation196_spill] sm:$0xff] %v5991_v52  ;;  %v5994_v8 = vmax.f32 %v1787_v58, %v5980_v62  ;;  %v1802_v45 = vmax.f32 %v5983_v10, %v5986_v60  ;;  %v5999_v48 = vld [vmem:[%s4441_s12 + $0xac0] sm:$0xff]  ;;  %1040 = vadd.xlane.f32.xlu0 %v1039_v32 }
  0xe1   : > { %9278 = vst [vmem:[#allocation194_spill] sm:$0xff] %v5977_v31  ;;  %v1054_v0 = vadd.f32 %v1053_v18, %v9280_v61  ;;  %v6002_v6 = vld [vmem:[%s4441_s12 + $0xac8] sm:$0xff]  ;;  %v1049_v18 = vadd.f32 %v1048_v56, %v5569_v16  ;;  %v6010_v58 = vld [vmem:[%s4441_s12 + $0xa98] sm:$0xff]  ;;  %v6013_v61 = vld [vmem:[%s4441_s12 + $0xaf0] sm:$0xff] }
  0xe2   : > { %9282 = vst [vmem:[#allocation197_spill] sm:$0xff] %v5994_v8  ;;  %9283 = vst [vmem:[#allocation198_spill] sm:$0xff] %v6010_v58  ;;  %v1797_v62 = vmax.f32 %v5999_v48, %v6002_v6  ;;  %v9284_v56 = vld [vmem:[#allocation154_spill] sm:$0xff]  ;;  %v6023_v38 = vmax.f32 %v1802_v45, %v6013_v61  ;;  %v6026_v31 = vld [vmem:[%s4441_s12 + $0xad0] sm:$0xff]  ;;  %v1082_v8 = vadd.f32 %v5634_v37, %v5631_v20 }
  0xe3   : > { %v1067_v43 = vadd.f32 %v9284_v56, %v5604_v11  ;;  %9286 = vst [vmem:[#allocation199_spill] sm:$0xff] %v6026_v31  ;;  %v6029_v16 = vld [vmem:[%s4441_s12 + $0xb20] sm:$0xff]  ;;  %v6032_v52 = vld [vmem:[%s4441_s12 + $0xb28] sm:$0xff]  ;;  %v6035_v32 = vld [vmem:[%s4441_s12 + $0xaf8] sm:$0xff]  ;;  %1055 = vadd.xlane.f32.xlu1 %v1054_v0  ;;  %v1077_v37 = vadd.f32 %v5650_v46, %v5647_v14 }
  0xe4   : > { %9285 = vst [vmem:[#allocation154_spill] sm:$0xff] %v6023_v38  ;;  %9287 = vst [vmem:[#allocation200_spill] sm:$0xff] %v6029_v16  ;;  %v6038_v3 = vmax.f32 %v1797_v62, %v6026_v31  ;;  %v1812_v11 = vmax.f32 %v6029_v16, %v6032_v52  ;;  %v6043_v53 = vld [vmem:[%s4441_s12 + $0xb00] sm:$0xff]  ;;  %v6046_v45 = vld [vmem:[%s4441_s12 + $0xb08] sm:$0xff]  ;;  %v1073_v16 = vadd.f32 %v1072_v17, %v5618_v15  ;;  %1050 = vadd.xlane.f32.xlu0 %v1049_v18 }
  0xe5   : > { %9288 = vst [vmem:[#allocation201_spill] sm:$0xff] %v6032_v52  ;;  %v9290_v56 = vld [vmem:[#allocation152_spill] sm:$0xff]  ;;  %v6054_v62 = vld [vmem:[%s4441_s12 + $0xad8] sm:$0xff]  ;;  %v1807_v52 = vmax.f32 %v6043_v53, %v6046_v45  ;;  %v6073_v38 = vld [vmem:[%s4441_s12 + $0xb60] sm:$0xff] }
  0xe6   : > { %9289 = vst [vmem:[#allocation202_spill] sm:$0xff] %v6038_v3  ;;  %v1064_v9 = vadd.f32 %v1063_v27, %v9290_v56  ;;  %9291 = vst [vmem:[#allocation203_spill] sm:$0xff] %v6054_v62  ;;  %v6057_v31 = vld [vmem:[%s4441_s12 + $0xb30] sm:$0xff]  ;;  %v6076_v56 = vld [vmem:[%s4441_s12 + $0xb68] sm:$0xff] }
  0xe7   : > { %v6067_v27 = vmax.f32 %v1812_v11, %v6057_v31  ;;  %v6070_v58 = vld [vmem:[%s4441_s12 + $0xb10] sm:$0xff]  ;;  %9294 = vst [vmem:[#allocation206_spill] sm:$0xff] %v6076_v56  ;;  %v9295_v0 = vld [vmem:[#allocation155_spill] sm:$0xff]  ;;  %v6081_v14 = vld [vmem:[%s4441_s12 + $0xb38] sm:$0xff]  ;;  %v1822_v11 = vmax.f32 %v6073_v38, %v6076_v56 }
  0xe8   : > { %9293 = vst [vmem:[#allocation205_spill] sm:$0xff] %v6070_v58  ;;  %v1059_v15 = vadd.f32 %v1058_v12, %v9295_v0  ;;  %v9296_v17 = vld [vmem:[#allocation157_spill] sm:$0xff]  ;;  %v6084_v20 = vmax.f32 %v1807_v52, %v6070_v58  ;;  %v6089_v3 = vld [vmem:[%s4441_s12 + $0xb40] sm:$0xff]  ;;  %v6092_v62 = vld [vmem:[%s4441_s12 + $0xb48] sm:$0xff]  ;;  %v1092_v0 = vadd.f32 %v5680_v41, %v5677_v22  ;;  %1065 = vadd.xlane.f32.xlu1 %v1064_v9 }
  0xe9   : > { %9292 = vst [vmem:[#allocation204_spill] sm:$0xff] %v6067_v27  ;;  %v1068_v46 = vadd.f32 %v1067_v43, %v9296_v17  ;;  %9297 = vst [vmem:[#allocation157_spill] sm:$0xff] %v6081_v14  ;;  %v6097_v12 = vld [vmem:[%s4441_s12 + $0xb18] sm:$0xff]  ;;  %v6100_v43 = vld [vmem:[%s4441_s12 + $0xb70] sm:$0xff]  ;;  %v1817_v52 = vmax.f32 %v6089_v3, %v6092_v62  ;;  %v1083_v17 = vadd.f32 %v1082_v8, %v5661_v34 }
  0xea   : > { %9298 = vst [vmem:[#allocation207_spill] sm:$0xff] %v6084_v20  ;;  %9299 = vst [vmem:[#allocation208_spill] sm:$0xff] %v6092_v62  ;;  %v6110_v56 = vmax.f32 %v1822_v11, %v6100_v43  ;;  %v6113_v18 = vld [vmem:[%s4441_s12 + $0xb50] sm:$0xff]  ;;  %v6116_v27 = vld [vmem:[%s4441_s12 + $0xba0] sm:$0xff]  ;;  %1060 = vadd.xlane.f32.xlu0 %v1059_v15 }
  0xeb   : > { %9300 = vst [vmem:[#allocation209_spill] sm:$0xff] %v6097_v12  ;;  %9302 = vst [vmem:[#allocation211_spill] sm:$0xff] %v6113_v18  ;;  %v6119_v14 = vld [vmem:[%s4441_s12 + $0xba8] sm:$0xff]  ;;  %v9303_v62 = vld [vmem:[#allocation158_spill] sm:$0xff]  ;;  %v6127_v11 = vmax.f32 %v1817_v52, %v6113_v18 }
  0xec   : > { %9301 = vst [vmem:[#allocation210_spill] sm:$0xff] %v6110_v56  ;;  %v1074_v34 = vadd.f32 %v1073_v16, %v9303_v62  ;;  %v9304_v8 = vld [vmem:[#allocation161_spill] sm:$0xff]  ;;  %v1832_v58 = vmax.f32 %v6116_v27, %v6119_v14  ;;  %v6132_v20 = vld [vmem:[%s4441_s12 + $0xb80] sm:$0xff]  ;;  %v6135_v12 = vld [vmem:[%s4441_s12 + $0xb88] sm:$0xff]  ;;  %v1084_v56 = vadd.f32 %v1083_v17, %v5683_v4 }
  0xed   : > { %v1078_v41 = vadd.f32 %v1077_v37, %v9304_v8  ;;  %v6124_v22 = vld [vmem:[%s4441_s12 + $0xb78] sm:$0xff]  ;;  %9306 = vst [vmem:[#allocation212_spill] sm:$0xff] %v6127_v11  ;;  %9307 = vst [vmem:[#allocation213_spill] sm:$0xff] %v6135_v12  ;;  %v9308_v16 = vld [vmem:[#allocation160_spill] sm:$0xff]  ;;  %v1087_v37 = vadd.f32 %v5694_v26, %v5691_v57  ;;  %v1827_v18 = vmax.f32 %v6132_v20, %v6135_v12 }
  0xee   : > { %9305 = vst [vmem:[#allocation161_spill] sm:$0xff] %v6124_v22  ;;  %v1069_v9 = vadd.f32 %v1068_v46, %v9308_v16  ;;  %v6143_v8 = vld [vmem:[%s4441_s12 + $0xb58] sm:$0xff]  ;;  %v6146_v62 = vld [vmem:[%s4441_s12 + $0xbb0] sm:$0xff]  ;;  %v6159_v26 = vld [vmem:[%s4441_s12 + $0xbe0] sm:$0xff]  ;;  %v1093_v16 = vadd.f32 %v1092_v0, %v5705_v47  ;;  %1075 = vadd.xlane.f32.xlu1 %v1074_v34 }
  0xef   : > { %9309 = vst [vmem:[#allocation214_spill] sm:$0xff] %v6143_v8  ;;  %v6153_v46 = vmax.f32 %v1832_v58, %v6146_v62  ;;  %v6156_v57 = vld [vmem:[%s4441_s12 + $0xb90] sm:$0xff]  ;;  %v6162_v52 = vld [vmem:[%s4441_s12 + $0xbe8] sm:$0xff]  ;;  %v6167_v22 = vld [vmem:[%s4441_s12 + $0xbb8] sm:$0xff]  ;;  %v1079_v17 = vadd.f32 %v1078_v41, %v5702_v29 }
  0xf0   : > { %9311 = vst [vmem:[#allocation216_spill] sm:$0xff] %v6156_v57  ;;  %9312 = vst [vmem:[#allocation217_spill] sm:$0xff] %v6162_v52  ;;  %v6170_v12 = vmax.f32 %v1827_v18, %v6156_v57  ;;  %v1842_v58 = vmax.f32 %v6159_v26, %v6162_v52  ;;  %v6175_v15 = vld [vmem:[%s4441_s12 + $0xbc0] sm:$0xff]  ;;  %v6178_v11 = vld [vmem:[%s4441_s12 + $0xbc8] sm:$0xff]  ;;  %1070 = vadd.xlane.f32.xlu0 %v1069_v9 }
  0xf1   : > { %9310 = vst [vmem:[#allocation215_spill] sm:$0xff] %v6153_v46  ;;  %9313 = vst [vmem:[#allocation218_spill] sm:$0xff] %v6167_v22  ;;  %v9315_v47 = vld [vmem:[#allocation167_spill] sm:$0xff]  ;;  %v6186_v4 = vld [vmem:[%s4441_s12 + $0xb98] sm:$0xff]  ;;  %v1837_v8 = vmax.f32 %v6175_v15, %v6178_v11 }
  0xf2   : > { %9314 = vst [vmem:[#allocation219_spill] sm:$0xff] %v6170_v12  ;;  %v1102_v0 = vadd.f32 %v9315_v47, %v5721_v28  ;;  %9316 = vst [vmem:[#allocation167_spill] sm:$0xff] %v6186_v4  ;;  %v6189_v57 = vld [vmem:[%s4441_s12 + $0xbf0] sm:$0xff]  ;;  %v9318_v34 = vld [vmem:[#allocation166_spill] sm:$0xff]  ;;  %1085 = vadd.xlane.f32.xlu1 %v1084_v56 }
  0xf3   : > { %9317 = vst [vmem:[#allocation220_spill] sm:$0xff] %v6189_v57  ;;  %v1088_v41 = vadd.f32 %v1087_v37, %v9318_v34  ;;  %v9319_v29 = vld [vmem:[#allocation169_spill] sm:$0xff]  ;;  %v6199_v18 = vmax.f32 %v1842_v58, %v6189_v57  ;;  %v6205_v22 = vld [vmem:[%s4441_s12 + $0xc20] sm:$0xff]  ;;  %v6208_v52 = vld [vmem:[%s4441_s12 + $0xc28] sm:$0xff] }
  0xf4   : > { %v1097_v28 = vadd.f32 %v9319_v29, %v5737_v50  ;;  %v6202_v46 = vld [vmem:[%s4441_s12 + $0xbd0] sm:$0xff]  ;;  %9322 = vst [vmem:[#allocation221_spill] sm:$0xff] %v6205_v22  ;;  %9323 = vst [vmem:[#allocation222_spill] sm:$0xff] %v6208_v52  ;;  %v6211_v9 = vld [vmem:[%s4441_s12 + $0xbf8] sm:$0xff]  ;;  %v1852_v29 = vmax.f32 %v6205_v22, %v6208_v52  ;;  %v1112_v52 = vadd.f32 %v5767_v24, %v5764_v59  ;;  %1080 = vadd.xlane.f32.xlu0 %v1079_v17  ;;  %v6258_v24 = vpop.xlane.xlu0 %730 }
  0xf5   : > { %9320 = vst [vmem:[#allocation166_spill] sm:$0xff] %v6199_v18  ;;  %9321 = vst [vmem:[#allocation169_spill] sm:$0xff] %v6202_v46  ;;  %v6214_v37 = vmax.f32 %v1837_v8, %v6202_v46  ;;  %v6219_v50 = vld [vmem:[%s4441_s12 + $0xc00] sm:$0xff]  ;;  %v6222_v34 = vld [vmem:[%s4441_s12 + $0xc08] sm:$0xff]  ;;  %v1103_v46 = vadd.f32 %v1102_v0, %v5748_v5  ;;  %v6246_v18 = vpop.xlane.xlu1 %740 }
  0xf6   : > { %9324 = vst [vmem:[#allocation223_spill] sm:$0xff] %v6211_v9  ;;  %9326 = vst [vmem:[#allocation225_spill] sm:$0xff] %v6219_v50  ;;  %v9328_v58 = vld [vmem:[#allocation127_spill] sm:$0xff]  ;;  %v6228_v4 = vld [vmem:[%s4441_s12 + $0xbd8] sm:$0xff]  ;;  %v1847_v8 = vmax.f32 %v6219_v50, %v6222_v34 }
  0xf7   : > { %9325 = vst [vmem:[#allocation224_spill] sm:$0xff] %v6214_v37  ;;  %9327 = vst [vmem:[#allocation226_spill] sm:$0xff] %v6222_v34  ;;  %v1094_v47 = vadd.f32 %v1093_v16, %v9328_v58  ;;  %v6231_v57 = vld [vmem:[%s4441_s12 + $0xc30] sm:$0xff]  ;;  %v9331_v9 = vld [vmem:[#allocation170_spill] sm:$0xff] }
  0xf8   : > { %v6241_v58 = vmax.f32 %v1852_v29, %v6231_v57  ;;  %v6244_v12 = vld [vmem:[%s4441_s12 + $0xc10] sm:$0xff]  ;;  %9330 = vst [vmem:[#allocation228_spill] sm:$0xff] %v6246_v18  ;;  %v1089_v34 = vadd.f32 %v1088_v41, %v9331_v9  ;;  %v9333_v5 = vld [vmem:[#allocation175_spill] sm:$0xff]  ;;  %v6253_v22 = vld [vmem:[%s4441_s12 + $0xc38] sm:$0xff]  ;;  %v6277_v37 = vpop.xlane.xlu0 %735 }
  0xf9   : > { %v9332_v50 = vld [vmem:[#allocation172_spill] sm:$0xff]  ;;  %v1107_v0 = vadd.f32 %v9333_v5, %v5780_v36  ;;  %v6256_v59 = vmax.f32 %v1847_v8, %v6244_v12  ;;  %9334 = vst [vmem:[#allocation170_spill] sm:$0xff] %v6258_v24  ;;  %v6263_v17 = vld [vmem:[%s4441_s12 + $0xc18] sm:$0xff]  ;;  %1095 = vadd.xlane.f32.xlu1 %v1094_v47  ;;  %v1113_v36 = vadd.f32 %v1112_v52, %v5794_v25  ;;  %v6271_v8 = vpop.xlane.xlu1 %745  ;;  %9339 = vst [vmem:[#allocation175_spill] sm:$0xff] %v6277_v37 }
  0xfa   : > { %9329 = vst [vmem:[#allocation227_spill] sm:$0xff] %v6241_v58  ;;  %v1098_v56 = vadd.f32 %v1097_v28, %v9332_v50  ;;  %v9335_v28 = vld [vmem:[#allocation173_spill] sm:$0xff]  ;;  %v1122_v5 = vadd.f32 %v5810_v23, %v5807_v19  ;;  %1090 = vadd.xlane.f32.xlu0 %v1089_v34  ;;  %9336 = vst [vmem:[#allocation172_spill] sm:$0xff] %v6271_v8  ;;  %v9337_v16 = vld [vmem:[#allocation134_spill] sm:$0xff]  ;;  %v1117_v58 = vadd.f32 %v5826_v49, %v5823_v35 }
  0xfb   : > { %v1104_v50 = vadd.f32 %v1103_v46, %v9335_v28  ;;  %v9338_v24 = vld [vmem:[#allocation177_spill] sm:$0xff]  ;;  %v1114_v46 = vadd.f32 %v1113_v36, %v5815_v55  ;;  %v9341_v47 = vld [vmem:[#allocation182_spill] sm:$0xff]  ;;  %v9343_v34 = vld [vmem:[#allocation179_spill] sm:$0xff]  ;;  %v1127_v49 = vadd.f32 %v5870_v51, %v5867_v13  ;;  %v1137_v13 = vadd.f32 %v5916_v2, %v5913_v40 }
  0xfc   : > { %v1099_v18 = vadd.f32 %v1098_v56, %v9337_v16  ;;  %v1108_v29 = vadd.f32 %v1107_v0, %v9338_v24  ;;  %v1123_v25 = vadd.f32 %v1122_v5, %v5837_v7  ;;  %v9340_v52 = vld [vmem:[#allocation181_spill] sm:$0xff]  ;;  %v9344_v41 = vld [vmem:[#allocation180_spill] sm:$0xff]  ;;  %v6289_v35 = vpop.xlane.xlu0 %750 }
  0xfd   : > { %1105 = vadd.xlane.f32.xlu1 %v1104_v50  ;;  %v1132_v23 = vadd.f32 %v9341_v47, %v9340_v52  ;;  %v6283_v19 = vpop.xlane.xlu1 %755  ;;  %v1118_v0 = vadd.f32 %v1117_v58, %v9344_v41  ;;  %9345 = vst [vmem:[#allocation134_spill] sm:$0xff] %v6289_v35  ;;  %v9346_v50 = vld [vmem:[#allocation186_spill] sm:$0xff]  ;;  %v9348_v5 = vld [vmem:[#allocation184_spill] sm:$0xff]  ;;  %v9349_v52 = vld [vmem:[#allocation185_spill] sm:$0xff] }
  0xfe   : > { %1100 = vadd.xlane.f32.xlu0 %v1099_v18  ;;  %9342 = vst [vmem:[#allocation173_spill] sm:$0xff] %v6283_v19  ;;  %v1109_v56 = vadd.f32 %v1108_v29, %v9343_v34  ;;  %v1124_v24 = vadd.f32 %v1123_v25, %v5859_v1  ;;  %v1142_v36 = vadd.f32 %v9346_v50, %v5897_v44  ;;  %v9351_v41 = vld [vmem:[#allocation143_spill] sm:$0xff]  ;;  %v9353_v47 = vld [vmem:[#allocation188_spill] sm:$0xff]  ;;  %v6503_v35 = vld [vmem:[%s4441_s12 + $0xcf8] sm:$0xff] }
  0xff   : > { %v1133_v7 = vadd.f32 %v1132_v23, %v5881_v39  ;;  %v1119_v29 = vadd.f32 %v1118_v0, %v9348_v5  ;;  %v1128_v58 = vadd.f32 %v1127_v49, %v9349_v52  ;;  %v1152_v44 = vadd.f32 %v5943_v33, %v5940_v42  ;;  %v9355_v49 = vld [vmem:[#allocation193_spill] sm:$0xff] }
 0x100   : > { %v6301_v51 = vpop.xlane.xlu0 %760  ;;  %v1143_v39 = vadd.f32 %v1142_v36, %v5924_v30  ;;  %v1147_v40 = vadd.f32 %v9355_v49, %v5956_v54  ;;  %v1162_v42 = vadd.f32 %v5986_v60, %v5983_v10  ;;  %v9359_v36 = vld [vmem:[#allocation195_spill] sm:$0xff]  ;;  %v1157_v54 = vadd.f32 %v6002_v6, %v5999_v48  ;;  %v6507_v8 = vld [vmem:[%s4441_s12 + $0xcd8] sm:$0xff] }
 0x101   : > { %1115 = vadd.xlane.f32.xlu1 %v1114_v46  ;;  %v6295_v18 = vpop.xlane.xlu1 %765  ;;  %9350 = vst [vmem:[#allocation181_spill] sm:$0xff] %v6301_v51  ;;  %v1134_v46 = vadd.f32 %v1133_v7, %v9351_v41  ;;  %v1129_v23 = vadd.f32 %v1128_v58, %v9353_v47  ;;  %v1153_v30 = vadd.f32 %v1152_v44, %v5970_v21  ;;  %v9361_v58 = vld [vmem:[#allocation196_spill] sm:$0xff]  ;;  %v9365_v44 = vld [vmem:[#allocation198_spill] sm:$0xff] }
 0x102   : > { %1110 = vadd.xlane.f32.xlu0 %v1109_v56  ;;  %9347 = vst [vmem:[#allocation177_spill] sm:$0xff] %v6295_v18  ;;  %v9354_v56 = vld [vmem:[#allocation190_spill] sm:$0xff]  ;;  %v1163_v21 = vadd.f32 %v1162_v42, %v6013_v61  ;;  %v1167_v6 = vadd.f32 %v6046_v45, %v6043_v53  ;;  %v9370_v42 = vld [vmem:[#allocation203_spill] sm:$0xff] }
 0x103   : > { %v1138_v0 = vadd.f32 %v1137_v13, %v9354_v56  ;;  %v1154_v13 = vadd.f32 %v1153_v30, %v9361_v58  ;;  %v9366_v56 = vld [vmem:[#allocation199_spill] sm:$0xff] }
 0x104   : > { %v6313_v2 = vpop.xlane.xlu0 %770  ;;  %v1164_v49 = vadd.f32 %v1163_v21, %v6035_v32  ;;  %v6488_v51 = vld [vmem:[%s4441_s12 + $0xd28] sm:$0xff] }
 0x105   : > { %1125 = vadd.xlane.f32.xlu1 %v1124_v24  ;;  %v6307_v25 = vpop.xlane.xlu1 %775  ;;  %9356 = vst [vmem:[#allocation179_spill] sm:$0xff] %v6313_v2  ;;  %v9357_v24 = vld [vmem:[#allocation191_spill] sm:$0xff]  ;;  %v1139_v50 = vadd.f32 %v1138_v0, %v5967_v63  ;;  %v1158_v0 = vadd.f32 %v1157_v54, %v9366_v56  ;;  %v9372_v54 = vld [vmem:[#allocation208_spill] sm:$0xff] }
 0x106   : > { %1120 = vadd.xlane.f32.xlu0 %v1119_v29  ;;  %9352 = vst [vmem:[#allocation182_spill] sm:$0xff] %v6307_v25  ;;  %v1144_v7 = vadd.f32 %v1143_v39, %v9357_v24  ;;  %v1148_v29 = vadd.f32 %v1147_v40, %v9359_v36  ;;  %v9363_v39 = vld [vmem:[#allocation201_spill] sm:$0xff]  ;;  %v9368_v40 = vld [vmem:[#allocation206_spill] sm:$0xff]  ;;  %v1177_v53 = vadd.f32 %v9372_v54, %v6089_v3 }
 0x107   : > { %v9371_v36 = vld [vmem:[#allocation205_spill] sm:$0xff] }
 0x108   : > { %v6325_v52 = vpop.xlane.xlu0 %780 }
 0x109   : > { %1135 = vadd.xlane.f32.xlu1 %v1134_v46  ;;  %v6319_v33 = vpop.xlane.xlu1 %785  ;;  %9360 = vst [vmem:[#allocation186_spill] sm:$0xff] %v6325_v52  ;;  %v9362_v46 = vld [vmem:[#allocation200_spill] sm:$0xff] }
 0x10a   : > { %1130 = vadd.xlane.f32.xlu0 %v1129_v23  ;;  %9358 = vst [vmem:[#allocation180_spill] sm:$0xff] %v6319_v33  ;;  %v1172_v60 = vadd.f32 %v9363_v39, %v9362_v46  ;;  %v1149_v23 = vadd.f32 %v1148_v29, %v9365_v44  ;;  %v1168_v29 = vadd.f32 %v1167_v6, %v9371_v36  ;;  %v9376_v39 = vld [vmem:[#allocation209_spill] sm:$0xff]  ;;  %v9384_v36 = vld [vmem:[#allocation216_spill] sm:$0xff] }
 0x10b   : > { %v6471_v33 = vld [vmem:[%s4441_s12 + $0xc98] sm:$0xff] }
 0x10c   : > { %v6337_v48 = vpop.xlane.xlu0 %790  ;;  %v1173_v61 = vadd.f32 %v1172_v60, %v6057_v31  ;;  %v1169_v60 = vadd.f32 %v1168_v29, %v9376_v39  ;;  %v1197_v29 = vadd.f32 %v6178_v11, %v6175_v15  ;;  %v9394_v11 = vld [vmem:[#allocation226_spill] sm:$0xff] }
 0x10d   : > { %1145 = vadd.xlane.f32.xlu1 %v1144_v7  ;;  %v6331_v10 = vpop.xlane.xlu1 %795  ;;  %9367 = vst [vmem:[#allocation185_spill] sm:$0xff] %v6337_v48  ;;  %v1182_v7 = vadd.f32 %v9368_v40, %v6073_v38  ;;  %v1192_v38 = vadd.f32 %v6119_v14, %v6116_v27  ;;  %v9381_v40 = vld [vmem:[#allocation217_spill] sm:$0xff] }
 0x10e   : > { %1140 = vadd.xlane.f32.xlu0 %v1139_v50  ;;  %9364 = vst [vmem:[#allocation184_spill] sm:$0xff] %v6331_v10  ;;  %v1159_v50 = vadd.f32 %v1158_v0, %v9370_v42  ;;  %v9378_v0 = vld [vmem:[#allocation213_spill] sm:$0xff]  ;;  %v1202_v27 = vadd.f32 %v9381_v40, %v6159_v26  ;;  %v9387_v26 = vld [vmem:[#allocation220_spill] sm:$0xff] }
 0x10f   : > { %v1183_v31 = vadd.f32 %v1182_v7, %v6100_v43  ;;  %v1187_v3 = vadd.f32 %v9378_v0, %v6132_v20  ;;  %v1193_v43 = vadd.f32 %v1192_v38, %v6146_v62  ;;  %v9383_v7 = vld [vmem:[#allocation214_spill] sm:$0xff]  ;;  %9413 = vst [vmem:[#allocation220_spill] sm:$0xff] %v6503_v35 }
 0x110   : > { %v6349_v45 = vpop.xlane.xlu0 %800  ;;  %v9386_v62 = vld [vmem:[#allocation218_spill] sm:$0xff] }
 0x111   : > { %1155 = vadd.xlane.f32.xlu1 %v1154_v13  ;;  %v6343_v30 = vpop.xlane.xlu1 %805  ;;  %9373 = vst [vmem:[#allocation188_spill] sm:$0xff] %v6349_v45  ;;  %v9374_v13 = vld [vmem:[#allocation157_spill] sm:$0xff]  ;;  %v1188_v20 = vadd.f32 %v1187_v3, %v9384_v36  ;;  %v9389_v38 = vld [vmem:[#allocation222_spill] sm:$0xff] }
 0x112   : > { %1150 = vadd.xlane.f32.xlu0 %v1149_v23  ;;  %9369 = vst [vmem:[#allocation143_spill] sm:$0xff] %v6343_v30  ;;  %v1174_v21 = vadd.f32 %v1173_v61, %v9374_v13  ;;  %v9377_v23 = vld [vmem:[#allocation211_spill] sm:$0xff]  ;;  %v9392_v3 = vld [vmem:[#allocation169_spill] sm:$0xff]  ;;  %9404 = vst [vmem:[#allocation157_spill] sm:$0xff] %v6471_v33 }
 0x113   : > { %v1178_v56 = vadd.f32 %v1177_v53, %v9377_v23  ;;  %v1194_v53 = vadd.f32 %v1193_v43, %v9386_v62  ;;  %v1198_v40 = vadd.f32 %v1197_v29, %v9392_v3  ;;  %v9393_v36 = vld [vmem:[#allocation225_spill] sm:$0xff]  ;;  %v6389_v43 = vld [vmem:[%s4441_s12 + $0xc68] sm:$0xff] }
 0x114   : > { %v6361_v6 = vpop.xlane.xlu0 %810  ;;  %v1207_v15 = vadd.f32 %v9394_v11, %v9393_v36  ;;  %v6452_v30 = vld [vmem:[%s4441_s12 + $0xce8] sm:$0xff]  ;;  %v6467_v10 = vld [vmem:[%s4441_s12 + $0xcb8] sm:$0xff] }
 0x115   : > { %1165 = vadd.xlane.f32.xlu1 %v1164_v49  ;;  %v6355_v46 = vpop.xlane.xlu1 %815  ;;  %9379 = vst [vmem:[#allocation193_spill] sm:$0xff] %v6361_v6  ;;  %v9380_v49 = vld [vmem:[#allocation161_spill] sm:$0xff]  ;;  %v1199_v36 = vadd.f32 %v1198_v40, %v6228_v4  ;;  %v6427_v40 = vld [vmem:[%s4441_s12 + $0xc88] sm:$0xff]  ;;  %9403 = vst [vmem:[#allocation208_spill] sm:$0xff] %v6467_v10 }
 0x116   : > { %1160 = vadd.xlane.f32.xlu0 %v1159_v50  ;;  %9375 = vst [vmem:[#allocation190_spill] sm:$0xff] %v6355_v46  ;;  %v1184_v61 = vadd.f32 %v1183_v31, %v9380_v49  ;;  %v1179_v50 = vadd.f32 %v1178_v56, %v9383_v7  ;;  %v9388_v31 = vld [vmem:[#allocation221_spill] sm:$0xff]  ;;  %v9391_v56 = vld [vmem:[#allocation167_spill] sm:$0xff]  ;;  %v1208_v11 = vadd.f32 %v1207_v15, %v6244_v12  ;;  %9408 = vst [vmem:[#allocation161_spill] sm:$0xff] %v6488_v51 }
 0x117   : > { %v1189_v0 = vadd.f32 %v1188_v20, %v9391_v56  ;;  %v9396_v20 = vld [vmem:[#allocation223_spill] sm:$0xff]  ;;  %v6431_v15 = vld [vmem:[%s4441_s12 + $0xc78] sm:$0xff]  ;;  %9414 = vst [vmem:[#allocation221_spill] sm:$0xff] %v6507_v8 }
 0x118   : > { %v6373_v54 = vpop.xlane.xlu0 %820 }
 0x119   : > { %1175 = vadd.xlane.f32.xlu1 %v1174_v21  ;;  %v6367_v14 = vpop.xlane.xlu1 %825  ;;  %9385 = vst [vmem:[#allocation195_spill] sm:$0xff] %v6373_v54  ;;  %v1203_v21 = vadd.f32 %v1202_v27, %v9387_v26  ;;  %v6397_v26 = vld [vmem:[%s4441_s12 + $0xc48] sm:$0xff] }
 0x11a   : > { %1170 = vadd.xlane.f32.xlu0 %v1169_v60  ;;  %9382 = vst [vmem:[#allocation191_spill] sm:$0xff] %v6367_v14  ;;  %v1212_v60 = vadd.f32 %v9389_v38, %v9388_v31  ;;  %v6435_v14 = vld [vmem:[%s4441_s12 + $0xc58] sm:$0xff] }
 0x11b   : > { %v1204_v29 = vadd.f32 %v1203_v21, %v9396_v20  ;;  %v6413_v21 = vld [vmem:[%s4441_s12 + $0xca0] sm:$0xff] }
 0x11c   : > { %v6391_v27 = vpop.xlane.xlu0 %830  ;;  %v1213_v31 = vadd.f32 %v1212_v60, %v6231_v57  ;;  %v6416_v57 = vld [vmem:[%s4441_s12 + $0xca8] sm:$0xff] }
 0x11d   : > { %1185 = vadd.xlane.f32.xlu1 %v1184_v61  ;;  %v6379_v23 = vpop.xlane.xlu1 %835  ;;  %v6386_v61 = vld [vmem:[%s4441_s12 + $0xc60] sm:$0xff]  ;;  %9395 = vst [vmem:[#allocation200_spill] sm:$0xff] %v6391_v27 }
 0x11e   : > { %1180 = vadd.xlane.f32.xlu0 %v1179_v50  ;;  %9390 = vst [vmem:[#allocation196_spill] sm:$0xff] %v6379_v23  ;;  %v6394_v50 = vld [vmem:[%s4441_s12 + $0xc40] sm:$0xff]  ;;  %v1222_v38 = vadd.f32 %v6389_v43, %v6386_v61  ;;  %v6408_v23 = vld [vmem:[%s4441_s12 + $0xc70] sm:$0xff]  ;;  %v1214_v12 = vadd.f32 %v1213_v31, %v6253_v22 }
 0x11f   : > { %v6444_v31 = vld [vmem:[%s4441_s12 + $0xcb0] sm:$0xff] }
 0x120   : > { %v6418_v60 = vpop.xlane.xlu0 %840  ;;  %v1223_v27 = vadd.f32 %v1222_v38, %v6408_v23  ;;  %v6449_v38 = vld [vmem:[%s4441_s12 + $0xce0] sm:$0xff] }
 0x121   : > { %1195 = vadd.xlane.f32.xlu1 %v1194_v53  ;;  %v6403_v3 = vpop.xlane.xlu1 %845  ;;  %v1217_v53 = vadd.f32 %v6397_v26, %v6394_v50  ;;  %9398 = vst [vmem:[#allocation198_spill] sm:$0xff] %v6418_v60  ;;  %v1232_v60 = vadd.f32 %v6416_v57, %v6413_v21 }
 0x122   : > { %1190 = vadd.xlane.f32.xlu0 %v1189_v0  ;;  %9397 = vst [vmem:[#allocation201_spill] sm:$0xff] %v6403_v3  ;;  %v6421_v0 = vld [vmem:[%s4441_s12 + $0xc50] sm:$0xff]  ;;  %v6424_v3 = vld [vmem:[%s4441_s12 + $0xc80] sm:$0xff] }
 0x123   : > { %v1218_v46 = vadd.f32 %v1217_v53, %v6421_v0  ;;  %v1227_v6 = vadd.f32 %v6427_v40, %v6424_v3  ;;  %v1224_v53 = vadd.f32 %v1223_v27, %v6431_v15  ;;  %v1233_v48 = vadd.f32 %v1232_v60, %v6444_v31  ;;  %v6480_v27 = vld [vmem:[%s4441_s12 + $0xcf0] sm:$0xff]  ;;  %v6485_v60 = vld [vmem:[%s4441_s12 + $0xd20] sm:$0xff] }
 0x124   : > { %v6454_v45 = vpop.xlane.xlu0 %850  ;;  %9406 = vst [vmem:[#allocation211_spill] sm:$0xff] %v6480_v27  ;;  %9407 = vst [vmem:[#allocation213_spill] sm:$0xff] %v6485_v60 }
 0x125   : > { %1205 = vadd.xlane.f32.xlu1 %v1204_v29  ;;  %v6439_v54 = vpop.xlane.xlu1 %855  ;;  %v1209_v29 = vadd.f32 %v1208_v11, %v6263_v17  ;;  %9400 = vst [vmem:[#allocation206_spill] sm:$0xff] %v6454_v45  ;;  %v6463_v11 = vld [vmem:[%s4441_s12 + $0xcc8] sm:$0xff]  ;;  %v1242_v45 = vadd.f32 %v6452_v30, %v6449_v38 }
 0x126   : > { %1200 = vadd.xlane.f32.xlu0 %v1199_v36  ;;  %9399 = vst [vmem:[#allocation199_spill] sm:$0xff] %v6439_v54  ;;  %v6457_v36 = vld [vmem:[%s4441_s12 + $0xc90] sm:$0xff]  ;;  %v6460_v54 = vld [vmem:[%s4441_s12 + $0xcc0] sm:$0xff]  ;;  %9402 = vst [vmem:[#allocation205_spill] sm:$0xff] %v6463_v11 }
 0x127   : > { %9401 = vst [vmem:[#allocation203_spill] sm:$0xff] %v6460_v54  ;;  %v1228_v25 = vadd.f32 %v1227_v6, %v6457_v36  ;;  %v1237_v18 = vadd.f32 %v6463_v11, %v6460_v54  ;;  %v1234_v6 = vadd.f32 %v1233_v48, %v6467_v10  ;;  %v1243_v2 = vadd.f32 %v1242_v45, %v6480_v27  ;;  %v6516_v48 = vld [vmem:[%s4441_s12 + $0xd30] sm:$0xff]  ;;  %v6521_v45 = vld [vmem:[%s4441_s12 + $0xd60] sm:$0xff]  ;;  %v6524_v27 = vld [vmem:[%s4441_s12 + $0xd68] sm:$0xff] }
 0x128   : > { %v6490_v19 = vpop.xlane.xlu0 %860  ;;  %9416 = vst [vmem:[#allocation167_spill] sm:$0xff] %v6516_v48  ;;  %9417 = vst [vmem:[#allocation169_spill] sm:$0xff] %v6521_v45 }
 0x129   : > { %1215 = vadd.xlane.f32.xlu1 %v1214_v12  ;;  %v6475_v52 = vpop.xlane.xlu1 %865  ;;  %v1219_v12 = vadd.f32 %v1218_v46, %v6435_v14  ;;  %9409 = vst [vmem:[#allocation217_spill] sm:$0xff] %v6490_v19  ;;  %v6499_v46 = vld [vmem:[%s4441_s12 + $0xd08] sm:$0xff]  ;;  %v1252_v19 = vadd.f32 %v6488_v51, %v6485_v60  ;;  %9418 = vst [vmem:[#allocation225_spill] sm:$0xff] %v6524_v27 }
 0x12a   : > { %1210 = vadd.xlane.f32.xlu0 %v1209_v29  ;;  %9405 = vst [vmem:[#allocation209_spill] sm:$0xff] %v6475_v52  ;;  %v6493_v29 = vld [vmem:[%s4441_s12 + $0xcd0] sm:$0xff]  ;;  %v6496_v52 = vld [vmem:[%s4441_s12 + $0xd00] sm:$0xff]  ;;  %9412 = vst [vmem:[#allocation218_spill] sm:$0xff] %v6499_v46 }
 0x12b   : > { %9410 = vst [vmem:[#allocation214_spill] sm:$0xff] %v6493_v29  ;;  %9411 = vst [vmem:[#allocation216_spill] sm:$0xff] %v6496_v52  ;;  %v1238_v54 = vadd.f32 %v1237_v18, %v6493_v29  ;;  %v1247_v10 = vadd.f32 %v6499_v46, %v6496_v52  ;;  %v1244_v18 = vadd.f32 %v1243_v2, %v6503_v35  ;;  %v6539_v52 = vld [vmem:[%s4441_s12 + $0xd38] sm:$0xff]  ;;  %v6552_v2 = vld [vmem:[%s4441_s12 + $0xd70] sm:$0xff] }
 0x12c   : > { %v6526_v11 = vpop.xlane.xlu0 %870  ;;  %9423 = vst [vmem:[#allocation231_spill] sm:$0xff] %v6539_v52  ;;  %v1253_v46 = vadd.f32 %v1252_v19, %v6516_v48  ;;  %v6543_v29 = vld [vmem:[%s4441_s12 + $0xd18] sm:$0xff]  ;;  %9426 = vst [vmem:[#allocation234_spill] sm:$0xff] %v6552_v2  ;;  %v6557_v19 = vld [vmem:[%s4441_s12 + $0xda0] sm:$0xff] }
 0x12d   : > { %1225 = vadd.xlane.f32.xlu1 %v1224_v53  ;;  %v6511_v37 = vpop.xlane.xlu1 %875  ;;  %v1229_v53 = vadd.f32 %v1228_v25, %v6471_v33  ;;  %9419 = vst [vmem:[#allocation226_spill] sm:$0xff] %v6526_v11  ;;  %v6535_v25 = vld [vmem:[%s4441_s12 + $0xd48] sm:$0xff]  ;;  %9424 = vst [vmem:[#allocation232_spill] sm:$0xff] %v6543_v29  ;;  %v1262_v11 = vadd.f32 %v6524_v27, %v6521_v45 }
 0x12e   : > { %1220 = vadd.xlane.f32.xlu0 %v1219_v12  ;;  %9415 = vst [vmem:[#allocation222_spill] sm:$0xff] %v6511_v37  ;;  %v6529_v12 = vld [vmem:[%s4441_s12 + $0xd10] sm:$0xff]  ;;  %v6532_v37 = vld [vmem:[%s4441_s12 + $0xd40] sm:$0xff]  ;;  %9422 = vst [vmem:[#allocation230_spill] sm:$0xff] %v6535_v25 }
 0x12f   : > { %9420 = vst [vmem:[#allocation223_spill] sm:$0xff] %v6529_v12  ;;  %9421 = vst [vmem:[#allocation229_spill] sm:$0xff] %v6532_v37  ;;  %v1248_v60 = vadd.f32 %v1247_v10, %v6529_v12  ;;  %v1257_v35 = vadd.f32 %v6535_v25, %v6532_v37  ;;  %v6560_v48 = vld [vmem:[%s4441_s12 + $0xda8] sm:$0xff]  ;;  %v1254_v10 = vadd.f32 %v1253_v46, %v6539_v52  ;;  %v6575_v37 = vld [vmem:[%s4441_s12 + $0xd78] sm:$0xff] }
 0x130   : > { %9427 = vst [vmem:[#allocation235_spill] sm:$0xff] %v6557_v19  ;;  %9428 = vst [vmem:[#allocation236_spill] sm:$0xff] %v6560_v48  ;;  %v6562_v51 = vpop.xlane.xlu0 %880  ;;  %v1263_v25 = vadd.f32 %v1262_v11, %v6552_v2  ;;  %v6579_v12 = vld [vmem:[%s4441_s12 + $0xd58] sm:$0xff]  ;;  %v6588_v46 = vld [vmem:[%s4441_s12 + $0xdb0] sm:$0xff] }
 0x131   : > { %1235 = vadd.xlane.f32.xlu1 %v1234_v6  ;;  %v6547_v33 = vpop.xlane.xlu1 %885  ;;  %v1239_v6 = vadd.f32 %v1238_v54, %v6507_v8  ;;  %9429 = vst [vmem:[#allocation237_spill] sm:$0xff] %v6562_v51  ;;  %v6571_v54 = vld [vmem:[%s4441_s12 + $0xd88] sm:$0xff]  ;;  %9433 = vst [vmem:[#allocation241_spill] sm:$0xff] %v6575_v37  ;;  %v1272_v51 = vadd.f32 %v6560_v48, %v6557_v19  ;;  %v6593_v11 = vld [vmem:[%s4441_s12 + $0xde0] sm:$0xff] }
 0x132   : > { %1230 = vadd.xlane.f32.xlu0 %v1229_v53  ;;  %9425 = vst [vmem:[#allocation233_spill] sm:$0xff] %v6547_v33  ;;  %v6565_v53 = vld [vmem:[%s4441_s12 + $0xd50] sm:$0xff]  ;;  %v6568_v33 = vld [vmem:[%s4441_s12 + $0xd80] sm:$0xff]  ;;  %9432 = vst [vmem:[#allocation240_spill] sm:$0xff] %v6571_v54 }
 0x133   : > { %9430 = vst [vmem:[#allocation238_spill] sm:$0xff] %v6565_v53  ;;  %9431 = vst [vmem:[#allocation239_spill] sm:$0xff] %v6568_v33  ;;  %v1258_v45 = vadd.f32 %v1257_v35, %v6565_v53  ;;  %v1267_v52 = vadd.f32 %v6571_v54, %v6568_v33  ;;  %v6596_v2 = vld [vmem:[%s4441_s12 + $0xde8] sm:$0xff]  ;;  %v1264_v35 = vadd.f32 %v1263_v25, %v6575_v37  ;;  %v6611_v33 = vld [vmem:[%s4441_s12 + $0xdb8] sm:$0xff] }
 0x134   : > { %9434 = vst [vmem:[#allocation242_spill] sm:$0xff] %v6579_v12  ;;  %9436 = vst [vmem:[#allocation244_spill] sm:$0xff] %v6588_v46  ;;  %v6598_v27 = vpop.xlane.xlu0 %890  ;;  %v1273_v54 = vadd.f32 %v1272_v51, %v6588_v46  ;;  %v6615_v53 = vld [vmem:[%s4441_s12 + $0xd98] sm:$0xff]  ;;  %v6624_v25 = vld [vmem:[%s4441_s12 + $0xdf0] sm:$0xff] }
 0x135   : > { %1245 = vadd.xlane.f32.xlu1 %v1244_v18  ;;  %v6583_v8 = vpop.xlane.xlu1 %895  ;;  %v1249_v18 = vadd.f32 %v1248_v60, %v6543_v29  ;;  %9437 = vst [vmem:[#allocation245_spill] sm:$0xff] %v6593_v11  ;;  %9438 = vst [vmem:[#allocation246_spill] sm:$0xff] %v6596_v2  ;;  %v6607_v60 = vld [vmem:[%s4441_s12 + $0xdc8] sm:$0xff]  ;;  %v6629_v51 = vld [vmem:[%s4441_s12 + $0xe20] sm:$0xff] }
 0x136   : > { %1240 = vadd.xlane.f32.xlu0 %v1239_v6  ;;  %9435 = vst [vmem:[#allocation243_spill] sm:$0xff] %v6583_v8  ;;  %9439 = vst [vmem:[#allocation247_spill] sm:$0xff] %v6598_v27  ;;  %v6601_v6 = vld [vmem:[%s4441_s12 + $0xd90] sm:$0xff]  ;;  %v6604_v8 = vld [vmem:[%s4441_s12 + $0xdc0] sm:$0xff]  ;;  %v1282_v27 = vadd.f32 %v6596_v2, %v6593_v11 }
 0x137   : > { %9440 = vst [vmem:[#allocation248_spill] sm:$0xff] %v6601_v6  ;;  %9441 = vst [vmem:[#allocation249_spill] sm:$0xff] %v6604_v8  ;;  %v1268_v19 = vadd.f32 %v1267_v52, %v6601_v6  ;;  %v1277_v37 = vadd.f32 %v6607_v60, %v6604_v8  ;;  %v6632_v46 = vld [vmem:[%s4441_s12 + $0xe28] sm:$0xff]  ;;  %v1274_v52 = vadd.f32 %v1273_v54, %v6611_v33  ;;  %v6647_v8 = vld [vmem:[%s4441_s12 + $0xdf8] sm:$0xff] }
 0x138   : > { %9442 = vst [vmem:[#allocation250_spill] sm:$0xff] %v6607_v60  ;;  %9443 = vst [vmem:[#allocation251_spill] sm:$0xff] %v6611_v33  ;;  %v6634_v48 = vpop.xlane.xlu0 %900  ;;  %v1283_v60 = vadd.f32 %v1282_v27, %v6624_v25  ;;  %v6651_v6 = vld [vmem:[%s4441_s12 + $0xdd8] sm:$0xff]  ;;  %v6660_v54 = vld [vmem:[%s4441_s12 + $0xe30] sm:$0xff] }
 0x139   : > { %1255 = vadd.xlane.f32.xlu1 %v1254_v10  ;;  %9444 = vst [vmem:[#allocation252_spill] sm:$0xff] %v6615_v53  ;;  %v6619_v29 = vpop.xlane.xlu1 %905  ;;  %v1259_v10 = vadd.f32 %v1258_v45, %v6579_v12  ;;  %9446 = vst [vmem:[#allocation254_spill] sm:$0xff] %v6624_v25  ;;  %v6643_v45 = vld [vmem:[%s4441_s12 + $0xe08] sm:$0xff]  ;;  %v6665_v27 = vld [vmem:[%s4441_s12 + $0xe60] sm:$0xff] }
 0x13a   : > { %1250 = vadd.xlane.f32.xlu0 %v1249_v18  ;;  %9445 = vst [vmem:[#allocation253_spill] sm:$0xff] %v6619_v29  ;;  %9447 = vst [vmem:[#allocation255_spill] sm:$0xff] %v6629_v51  ;;  %v6637_v18 = vld [vmem:[%s4441_s12 + $0xdd0] sm:$0xff]  ;;  %v6640_v29 = vld [vmem:[%s4441_s12 + $0xe00] sm:$0xff] }
 0x13b   : > { %9448 = vst [vmem:[#allocation256_spill] sm:$0xff] %v6632_v46  ;;  %9449 = vst [vmem:[#allocation257_spill] sm:$0xff] %v6634_v48  ;;  %v1292_v48 = vadd.f32 %v6632_v46, %v6629_v51  ;;  %v1278_v11 = vadd.f32 %v1277_v37, %v6637_v18  ;;  %v1287_v33 = vadd.f32 %v6643_v45, %v6640_v29  ;;  %v6668_v25 = vld [vmem:[%s4441_s12 + $0xe68] sm:$0xff] }
 0x13c   : > { %9450 = vst [vmem:[#allocation258_spill] sm:$0xff] %v6637_v18  ;;  %9451 = vst [vmem:[#allocation259_spill] sm:$0xff] %v6640_v29  ;;  %v6670_v2 = vpop.xlane.xlu0 %910  ;;  %v1284_v37 = vadd.f32 %v1283_v60, %v6647_v8  ;;  %v6683_v29 = vld [vmem:[%s4441_s12 + $0xe38] sm:$0xff]  ;;  %v6696_v60 = vld [vmem:[%s4441_s12 + $0xe70] sm:$0xff] }
 0x13d   : > { %9452 = vst [vmem:[#allocation260_spill] sm:$0xff] %v6643_v45  ;;  %1265 = vadd.xlane.f32.xlu1 %v1264_v35  ;;  %9453 = vst [vmem:[#allocation261_spill] sm:$0xff] %v6647_v8  ;;  %v6655_v12 = vpop.xlane.xlu1 %915  ;;  %v1269_v35 = vadd.f32 %v1268_v19, %v6615_v53  ;;  %v6679_v19 = vld [vmem:[%s4441_s12 + $0xe48] sm:$0xff]  ;;  %v1293_v45 = vadd.f32 %v1292_v48, %v6660_v54  ;;  %v6687_v18 = vld [vmem:[%s4441_s12 + $0xe18] sm:$0xff] }
 0x13e   : > { %9454 = vst [vmem:[#allocation262_spill] sm:$0xff] %v6651_v6  ;;  %1260 = vadd.xlane.f32.xlu0 %v1259_v10  ;;  %9455 = vst [vmem:[#allocation263_spill] sm:$0xff] %v6655_v12  ;;  %v6673_v10 = vld [vmem:[%s4441_s12 + $0xe10] sm:$0xff]  ;;  %v6676_v12 = vld [vmem:[%s4441_s12 + $0xe40] sm:$0xff] }
 0x13f   : > { %9456 = vst [vmem:[#allocation264_spill] sm:$0xff] %v6660_v54  ;;  %9457 = vst [vmem:[#allocation265_spill] sm:$0xff] %v6665_v27  ;;  %v1288_v51 = vadd.f32 %v1287_v33, %v6673_v10  ;;  %v1297_v8 = vadd.f32 %v6679_v19, %v6676_v12  ;;  %v6701_v48 = vld [vmem:[%s4441_s12 + $0xea0] sm:$0xff]  ;;  %v6704_v54 = vld [vmem:[%s4441_s12 + $0xea8] sm:$0xff]  ;;  %v1294_v33 = vadd.f32 %v1293_v45, %v6683_v29 }
 0x140   : > { %9458 = vst [vmem:[#allocation266_spill] sm:$0xff] %v6668_v25  ;;  %9459 = vst [vmem:[#allocation267_spill] sm:$0xff] %v6670_v2  ;;  %v1302_v2 = vadd.f32 %v6668_v25, %v6665_v27  ;;  %v6706_v46 = vpop.xlane.xlu0 %920  ;;  %v6732_v45 = vld [vmem:[%s4441_s12 + $0xeb0] sm:$0xff] }
 0x141   : > { %9460 = vst [vmem:[#allocation268_spill] sm:$0xff] %v6673_v10  ;;  %9461 = vst [vmem:[#allocation269_spill] sm:$0xff] %v6676_v12  ;;  %1275 = vadd.xlane.f32.xlu1 %v1274_v52  ;;  %v6691_v53 = vpop.xlane.xlu1 %925  ;;  %v1279_v52 = vadd.f32 %v1278_v11, %v6651_v6  ;;  %v6715_v11 = vld [vmem:[%s4441_s12 + $0xe88] sm:$0xff]  ;;  %v6719_v12 = vld [vmem:[%s4441_s12 + $0xe78] sm:$0xff] }
 0x142   : > { %9462 = vst [vmem:[#allocation270_spill] sm:$0xff] %v6679_v19  ;;  %9463 = vst [vmem:[#allocation271_spill] sm:$0xff] %v6683_v29  ;;  %1270 = vadd.xlane.f32.xlu0 %v1269_v35  ;;  %v6709_v35 = vld [vmem:[%s4441_s12 + $0xe50] sm:$0xff]  ;;  %v1303_v19 = vadd.f32 %v1302_v2, %v6696_v60  ;;  %v6723_v10 = vld [vmem:[%s4441_s12 + $0xe58] sm:$0xff] }
 0x143   : > { %9464 = vst [vmem:[#allocation272_spill] sm:$0xff] %v6687_v18  ;;  %9465 = vst [vmem:[#allocation273_spill] sm:$0xff] %v6691_v53  ;;  %v6712_v53 = vld [vmem:[%s4441_s12 + $0xe80] sm:$0xff]  ;;  %v1298_v27 = vadd.f32 %v1297_v8, %v6709_v35 }
 0x144   : > { %9466 = vst [vmem:[#allocation274_spill] sm:$0xff] %v6696_v60  ;;  %9467 = vst [vmem:[#allocation275_spill] sm:$0xff] %v6701_v48  ;;  %v1307_v29 = vadd.f32 %v6715_v11, %v6712_v53  ;;  %v6737_v2 = vld [vmem:[%s4441_s12 + $0xee0] sm:$0xff]  ;;  %v6740_v60 = vld [vmem:[%s4441_s12 + $0xee8] sm:$0xff]  ;;  %v6742_v25 = vpop.xlane.xlu0 %930  ;;  %v1304_v8 = vadd.f32 %v1303_v19, %v6719_v12 }
 0x145   : > { %9468 = vst [vmem:[#allocation276_spill] sm:$0xff] %v6704_v54  ;;  %9469 = vst [vmem:[#allocation277_spill] sm:$0xff] %v6706_v46  ;;  %1285 = vadd.xlane.f32.xlu1 %v1284_v37  ;;  %v1312_v46 = vadd.f32 %v6704_v54, %v6701_v48  ;;  %v6727_v6 = vpop.xlane.xlu1 %935  ;;  %v1289_v37 = vadd.f32 %v1288_v51, %v6687_v18  ;;  %v6751_v51 = vld [vmem:[%s4441_s12 + $0xec8] sm:$0xff]  ;;  %v6768_v19 = vld [vmem:[%s4441_s12 + $0xef0] sm:$0xff] }
 0x146   : > { %9470 = vst [vmem:[#allocation278_spill] sm:$0xff] %v6709_v35  ;;  %9471 = vst [vmem:[#allocation279_spill] sm:$0xff] %v6712_v53  ;;  %1280 = vadd.xlane.f32.xlu0 %v1279_v52  ;;  %v6745_v52 = vld [vmem:[%s4441_s12 + $0xe90] sm:$0xff]  ;;  %v6755_v53 = vld [vmem:[%s4441_s12 + $0xeb8] sm:$0xff] }
 0x147   : > { %9472 = vst [vmem:[#allocation280_spill] sm:$0xff] %v6715_v11  ;;  %9473 = vst [vmem:[#allocation281_spill] sm:$0xff] %v6719_v12  ;;  %v1313_v11 = vadd.f32 %v1312_v46, %v6732_v45  ;;  %v6759_v35 = vld [vmem:[%s4441_s12 + $0xe98] sm:$0xff]  ;;  %v1308_v48 = vadd.f32 %v1307_v29, %v6745_v52  ;;  %v6773_v46 = vld [vmem:[%s4441_s12 + $0xf20] sm:$0xff] }
 0x148   : > { %9474 = vst [vmem:[#allocation282_spill] sm:$0xff] %v6723_v10  ;;  %9475 = vst [vmem:[#allocation283_spill] sm:$0xff] %v6727_v6  ;;  %v6748_v6 = vld [vmem:[%s4441_s12 + $0xec0] sm:$0xff]  ;;  %v6778_v54 = vpop.xlane.xlu0 %940 }
 0x149   : > { %9476 = vst [vmem:[#allocation284_spill] sm:$0xff] %v6732_v45  ;;  %9477 = vst [vmem:[#allocation285_spill] sm:$0xff] %v6737_v2  ;;  %1295 = vadd.xlane.f32.xlu1 %v1294_v33  ;;  %v6763_v18 = vpop.xlane.xlu1 %945  ;;  %v1299_v33 = vadd.f32 %v1298_v27, %v6723_v10  ;;  %v1317_v12 = vadd.f32 %v6751_v51, %v6748_v6  ;;  %v6776_v45 = vld [vmem:[%s4441_s12 + $0xf28] sm:$0xff]  ;;  %v1314_v29 = vadd.f32 %v1313_v11, %v6755_v53  ;;  %v6804_v11 = vld [vmem:[%s4441_s12 + $0xf30] sm:$0xff] }
 0x14a   : > { %9478 = vst [vmem:[#allocation286_spill] sm:$0xff] %v6740_v60  ;;  %9479 = vst [vmem:[#allocation287_spill] sm:$0xff] %v6742_v25  ;;  %v1322_v25 = vadd.f32 %v6740_v60, %v6737_v2  ;;  %1290 = vadd.xlane.f32.xlu0 %v1289_v37  ;;  %v6781_v37 = vld [vmem:[%s4441_s12 + $0xed0] sm:$0xff]  ;;  %v6787_v27 = vld [vmem:[%s4441_s12 + $0xf08] sm:$0xff] }
 0x14b   : > { %9480 = vst [vmem:[#allocation288_spill] sm:$0xff] %v6745_v52  ;;  %9481 = vst [vmem:[#allocation289_spill] sm:$0xff] %v6748_v6  ;;  %v6791_v6 = vld [vmem:[%s4441_s12 + $0xef8] sm:$0xff]  ;;  %v1318_v2 = vadd.f32 %v1317_v12, %v6781_v37 }
 0x14c   : > { %9482 = vst [vmem:[#allocation290_spill] sm:$0xff] %v6751_v51  ;;  %9483 = vst [vmem:[#allocation291_spill] sm:$0xff] %v6755_v53  ;;  %v1323_v51 = vadd.f32 %v1322_v25, %v6768_v19  ;;  %v6795_v52 = vld [vmem:[%s4441_s12 + $0xed8] sm:$0xff]  ;;  %v6809_v25 = vld [vmem:[%s4441_s12 + $0xf60] sm:$0xff]  ;;  %v6814_v60 = vpop.xlane.xlu0 %950 }
 0x14d   : > { %9484 = vst [vmem:[#allocation292_spill] sm:$0xff] %v6759_v35  ;;  %9485 = vst [vmem:[#allocation293_spill] sm:$0xff] %v6763_v18  ;;  %v6784_v18 = vld [vmem:[%s4441_s12 + $0xf00] sm:$0xff]  ;;  %1305 = vadd.xlane.f32.xlu1 %v1304_v8  ;;  %v6799_v10 = vpop.xlane.xlu1 %955  ;;  %v1309_v8 = vadd.f32 %v1308_v48, %v6759_v35  ;;  %v6823_v48 = vld [vmem:[%s4441_s12 + $0xf48] sm:$0xff] }
 0x14e   : > { %9486 = vst [vmem:[#allocation294_spill] sm:$0xff] %v6768_v19  ;;  %9487 = vst [vmem:[#allocation295_spill] sm:$0xff] %v6773_v46  ;;  %1300 = vadd.xlane.f32.xlu0 %v1299_v33  ;;  %v1327_v53 = vadd.f32 %v6787_v27, %v6784_v18  ;;  %v6812_v19 = vld [vmem:[%s4441_s12 + $0xf68] sm:$0xff]  ;;  %v6817_v33 = vld [vmem:[%s4441_s12 + $0xf10] sm:$0xff]  ;;  %v1324_v12 = vadd.f32 %v1323_v51, %v6791_v6 }
 0x14f   : > { %9488 = vst [vmem:[#allocation296_spill] sm:$0xff] %v6776_v45  ;;  %9489 = vst [vmem:[#allocation297_spill] sm:$0xff] %v6778_v54  ;;  %v1332_v54 = vadd.f32 %v6776_v45, %v6773_v46  ;;  %v6840_v51 = vld [vmem:[%s4441_s12 + $0xf70] sm:$0xff] }
 0x150   : > { %9490 = vst [vmem:[#allocation298_spill] sm:$0xff] %v6781_v37  ;;  %9491 = vst [vmem:[#allocation299_spill] sm:$0xff] %v6784_v18  ;;  %v6827_v18 = vld [vmem:[%s4441_s12 + $0xf38] sm:$0xff]  ;;  %v1328_v46 = vadd.f32 %v1327_v53, %v6817_v33  ;;  %v6850_v45 = vpop.xlane.xlu0 %960 }
 0x151   : > { %9492 = vst [vmem:[#allocation300_spill] sm:$0xff] %v6787_v27  ;;  %9493 = vst [vmem:[#allocation301_spill] sm:$0xff] %v6791_v6  ;;  %1315 = vadd.xlane.f32.xlu1 %v1314_v29  ;;  %v1333_v27 = vadd.f32 %v1332_v54, %v6804_v11  ;;  %v6831_v37 = vld [vmem:[%s4441_s12 + $0xf18] sm:$0xff]  ;;  %v6835_v35 = vpop.xlane.xlu1 %965  ;;  %v1319_v29 = vadd.f32 %v1318_v2, %v6795_v52  ;;  %v6845_v54 = vld [vmem:[%s4441_s12 + $0xfa0] sm:$0xff] }
 0x152   : > { %9494 = vst [vmem:[#allocation302_spill] sm:$0xff] %v6795_v52  ;;  %9495 = vst [vmem:[#allocation303_spill] sm:$0xff] %v6799_v10  ;;  %v6820_v10 = vld [vmem:[%s4441_s12 + $0xf40] sm:$0xff]  ;;  %1310 = vadd.xlane.f32.xlu0 %v1309_v8  ;;  %v6853_v8 = vld [vmem:[%s4441_s12 + $0xf50] sm:$0xff] }
 0x153   : > { %9496 = vst [vmem:[#allocation304_spill] sm:$0xff] %v6804_v11  ;;  %9497 = vst [vmem:[#allocation305_spill] sm:$0xff] %v6809_v25  ;;  %v1337_v6 = vadd.f32 %v6823_v48, %v6820_v10  ;;  %v6848_v11 = vld [vmem:[%s4441_s12 + $0xfa8] sm:$0xff]  ;;  %v1334_v53 = vadd.f32 %v1333_v27, %v6827_v18 }
 0x154   : > { %9498 = vst [vmem:[#allocation306_spill] sm:$0xff] %v6812_v19  ;;  %9499 = vst [vmem:[#allocation307_spill] sm:$0xff] %v6814_v60  ;;  %v1342_v60 = vadd.f32 %v6812_v19, %v6809_v25  ;;  %v6859_v2 = vld [vmem:[%s4441_s12 + $0xf88] sm:$0xff]  ;;  %v1329_v25 = vadd.f32 %v1328_v46, %v6831_v37  ;;  %v6876_v19 = vld [vmem:[%s4441_s12 + $0xfb0] sm:$0xff] }
 0x155   : > { %9500 = vst [vmem:[#allocation308_spill] sm:$0xff] %v6817_v33  ;;  %9501 = vst [vmem:[#allocation309_spill] sm:$0xff] %v6820_v10  ;;  %1325 = vadd.xlane.f32.xlu1 %v1324_v12  ;;  %v6863_v10 = vld [vmem:[%s4441_s12 + $0xf78] sm:$0xff]  ;;  %v6871_v52 = vpop.xlane.xlu1 %975  ;;  %v1338_v12 = vadd.f32 %v1337_v6, %v6853_v8  ;;  %v6892_v46 = vld [vmem:[%s4441_s12 + $0xfc0] sm:$0xff] }
 0x156   : > { %9502 = vst [vmem:[#allocation310_spill] sm:$0xff] %v6823_v48  ;;  %9503 = vst [vmem:[#allocation311_spill] sm:$0xff] %v6827_v18  ;;  %v1343_v48 = vadd.f32 %v1342_v60, %v6840_v51  ;;  %v6867_v33 = vld [vmem:[%s4441_s12 + $0xf58] sm:$0xff]  ;;  %1320 = vadd.xlane.f32.xlu0 %v1319_v29  ;;  %v6881_v60 = vld [vmem:[%s4441_s12 + $0xfe0] sm:$0xff]  ;;  %v6886_v18 = vpop.xlane.xlu0 %970 }
 0x157   : > { %9504 = vst [vmem:[#allocation312_spill] sm:$0xff] %v6831_v37  ;;  %9505 = vst [vmem:[#allocation313_spill] sm:$0xff] %v6835_v35  ;;  %v6856_v35 = vld [vmem:[%s4441_s12 + $0xf80] sm:$0xff]  ;;  %v6889_v29 = vld [vmem:[%s4441_s12 + $0xf90] sm:$0xff] }
 0x158   : > { %9506 = vst [vmem:[#allocation314_spill] sm:$0xff] %v6840_v51  ;;  %9507 = vst [vmem:[#allocation315_spill] sm:$0xff] %v6845_v54  ;;  %v1347_v27 = vadd.f32 %v6859_v2, %v6856_v35  ;;  %v6884_v51 = vld [vmem:[%s4441_s12 + $0xfe8] sm:$0xff]  ;;  %v6905_v37 = vld [vmem:[%s4441_s12 + $0xfb8] sm:$0xff] }
 0x159   : > { %9508 = vst [vmem:[#allocation316_spill] sm:$0xff] %v6848_v11  ;;  %9509 = vst [vmem:[#allocation317_spill] sm:$0xff] %v6850_v45  ;;  %v1352_v45 = vadd.f32 %v6848_v11, %v6845_v54  ;;  %v6895_v6 = vld [vmem:[%s4441_s12 + $0xfc8] sm:$0xff]  ;;  %1335 = vadd.xlane.f32.xlu1 %v1334_v53  ;;  %v6909_v11 = vld [vmem:[%s4441_s12 + $0xff0] sm:$0xff] }
 0x15a   : > { %9510 = vst [vmem:[#allocation318_spill] sm:$0xff] %v6853_v8  ;;  %9511 = vst [vmem:[#allocation319_spill] sm:$0xff] %v6856_v35  ;;  %1330 = vadd.xlane.f32.xlu0 %v1329_v25  ;;  %v6901_v8 = vpop.xlane.xlu1 %985  ;;  %v1348_v54 = vadd.f32 %v1347_v27, %v6889_v29  ;;  %v6916_v53 = vld [vmem:[%s4441_s12 + $0xf98] sm:$0xff]  ;;  %v6919_v25 = vld [vmem:[%s4441_s12 + $0xfd0] sm:$0xff] }
 0x15b   : > { %9512 = vst [vmem:[#allocation320_spill] sm:$0xff] %v6859_v2  ;;  %9513 = vst [vmem:[#allocation321_spill] sm:$0xff] %v6867_v33  ;;  %v1353_v35 = vadd.f32 %v1352_v45, %v6876_v19  ;;  %v1362_v2 = vadd.f32 %v6884_v51, %v6881_v60  ;;  %v6913_v45 = vpop.xlane.xlu0 %980 }
 0x15c   : > { %9514 = vst [vmem:[#allocation322_spill] sm:$0xff] %v6871_v52  ;;  %9515 = vst [vmem:[#allocation323_spill] sm:$0xff] %v6886_v18  ;;  %v1344_v52 = vadd.f32 %v1343_v48, %v6863_v10  ;;  %v1339_v18 = vadd.f32 %v1338_v12, %v6867_v33  ;;  %v1357_v48 = vadd.f32 %v6895_v6, %v6892_v46 }
 0x15d   : > { %9516 = vst [vmem:[#allocation324_spill] sm:$0xff] %v6889_v29  ;;  %9517 = vst [vmem:[#allocation325_spill] sm:$0xff] %v6892_v46  ;;  %v1363_v12 = vadd.f32 %v1362_v2, %v6909_v11  ;;  %v1349_v27 = vadd.f32 %v1348_v54, %v6916_v53  ;;  %v6927_v29 = vld [vmem:[%s4441_s12 + $0xff8] sm:$0xff] }
 0x15e   : > { %9518 = vst [vmem:[#allocation326_spill] sm:$0xff] %v6895_v6  ;;  %9519 = vst [vmem:[#allocation327_spill] sm:$0xff] %v6901_v8  ;;  %1345 = vadd.xlane.f32.xlu1 %v1344_v52  ;;  %v1354_v8 = vadd.f32 %v1353_v35, %v6905_v37  ;;  %1340 = vadd.xlane.f32.xlu0 %v1339_v18  ;;  %v6923_v33 = vpop.xlane.xlu1 %995  ;;  %v1358_v46 = vadd.f32 %v1357_v48, %v6919_v25  ;;  %v9530_v48 = vld [vmem:[#allocation20_spill] sm:$0xff] }
 0x15f   : > { %9520 = vst [vmem:[#allocation328_spill] sm:$0xff] %v6913_v45  ;;  %9521 = vst [vmem:[#allocation329_spill] sm:$0xff] %v6916_v53  ;;  %v6930_v6 = vpop.xlane.xlu0 %990  ;;  %v6933_v45 = vld [vmem:[%s4441_s12 + $0xfd8] sm:$0xff]  ;;  %v1364_v52 = vadd.f32 %v1363_v12, %v6927_v29  ;;  %v9534_v53 = vld [vmem:[#allocation15_spill] sm:$0xff] }
 0x160   : > { %9522 = vst [vmem:[#allocation330_spill] sm:$0xff] %v6919_v25  ;;  %9523 = vst [vmem:[#allocation331_spill] sm:$0xff] %v6923_v33  ;;  %v1359_v18 = vadd.f32 %v1358_v46, %v6933_v45  ;;  %v9538_v46 = vld [vmem:[#allocation18_spill] sm:$0xff] }
 0x161   : > { %9524 = vst [vmem:[#allocation332_spill] sm:$0xff] %v6930_v6  ;;  %9525 = vst [vmem:[#allocation333_spill] sm:$0xff] %v6933_v45  ;;  %v9531_v6 = vld [vmem:[#allocation19_spill] sm:$0xff] }
 0x162   : > { %1355 = vadd.xlane.f32.xlu1 %v1354_v8  ;;  %1350 = vadd.xlane.f32.xlu0 %v1349_v27  ;;  %v6936_v35 = vpop.xlane.xlu1 %1005  ;;  %v9532_v25 = vmax.f32 %v9530_v48, %v9531_v6  ;;  %v9533_v8 = vld [vmem:[#allocation16_spill] sm:$0xff]  ;;  %v9547_v48 = vld [vmem:[#allocation21_spill] sm:$0xff] }
 0x163   : > { %9526 = vst [vmem:[#allocation334_spill] sm:$0xff] %v6936_v35  ;;  %v6939_v2 = vpop.xlane.xlu0 %1000  ;;  %v9535_v12 = vmax.f32 %v9533_v8, %v9534_v53  ;;  %v9549_v8 = vld [vmem:[#allocation24_spill] sm:$0xff] }
 0x164   : > { %9527 = vst [vmem:[#allocation335_spill] sm:$0xff] %v6939_v2  ;;  %v9539_v2 = vld [vmem:[#allocation17_spill] sm:$0xff] }
 0x166   : > { %1365 = vadd.xlane.f32.xlu1 %v1364_v52  ;;  %1360 = vadd.xlane.f32.xlu0 %v1359_v18  ;;  %v6941_v54 = vpop.xlane.xlu1 %1015  ;;  %v9540_v52 = vmax.f32 %v9538_v46, %v9539_v2  ;;  %v9541_v18 = vld [vmem:[#allocation14_spill] sm:$0xff]  ;;  %v9554_v46 = vld [vmem:[#allocation27_spill] sm:$0xff] }
 0x167   : > { %9528 = vst [vmem:[#allocation336_spill] sm:$0xff] %v6941_v54  ;;  %v6943_v33 = vpop.xlane.xlu0 %1010  ;;  %v9542_v54 = vld [vmem:[#allocation13_spill] sm:$0xff] }
 0x168   : > { %9529 = vst [vmem:[#allocation337_spill] sm:$0xff] %v6943_v33  ;;  %v9543_v45 = vmax.f32 %v9541_v18, %v9542_v54  ;;  %v9558_v18 = vld [vmem:[#allocation26_spill] sm:$0xff] }
 0x16a   : > { %1375 = vmax.xlane.f32.xlu1 %v9532_v25  ;;  %1370 = vmax.xlane.f32.xlu0 %v9535_v12  ;;  %v6951_v27 = vpop.xlane.xlu1 %1025  ;;  %v9546_v25 = vld [vmem:[#allocation23_spill] sm:$0xff]  ;;  %v9550_v12 = vld [vmem:[#allocation22_spill] sm:$0xff] }
 0x16b   : > { %9536 = vst [vmem:[#allocation20_spill] sm:$0xff] %v6951_v27  ;;  %v6953_v35 = vpop.xlane.xlu0 %1020  ;;  %v9548_v53 = vmax.f32 %v9546_v25, %v9547_v48  ;;  %v9551_v27 = vmax.f32 %v9549_v8, %v9550_v12  ;;  %v9562_v48 = vld [vmem:[#allocation30_spill] sm:$0xff]  ;;  %v9566_v12 = vld [vmem:[#allocation32_spill] sm:$0xff] }
 0x16c   : > { %9537 = vst [vmem:[#allocation19_spill] sm:$0xff] %v6953_v35 }
 0x16e   : > { %1385 = vmax.xlane.f32.xlu1 %v9540_v52  ;;  %1380 = vmax.xlane.f32.xlu0 %v9543_v45  ;;  %v6961_v33 = vpop.xlane.xlu1 %1035  ;;  %v9555_v52 = vld [vmem:[#allocation25_spill] sm:$0xff]  ;;  %v9557_v45 = vld [vmem:[#allocation28_spill] sm:$0xff] }
 0x16f   : > { %9544 = vst [vmem:[#allocation16_spill] sm:$0xff] %v6961_v33  ;;  %v6963_v6 = vpop.xlane.xlu0 %1030  ;;  %v9556_v54 = vmax.f32 %v9554_v46, %v9555_v52  ;;  %v9559_v33 = vmax.f32 %v9557_v45, %v9558_v18  ;;  %v9570_v52 = vld [vmem:[#allocation33_spill] sm:$0xff]  ;;  %v9574_v18 = vld [vmem:[#allocation36_spill] sm:$0xff] }
 0x170   : > { %9545 = vst [vmem:[#allocation15_spill] sm:$0xff] %v6963_v6 }
 0x172   : > { %1395 = vmax.xlane.f32.xlu1 %v9548_v53  ;;  %1390 = vmax.xlane.f32.xlu0 %v9551_v27  ;;  %v6971_v35 = vpop.xlane.xlu1 %1045  ;;  %v9563_v53 = vld [vmem:[#allocation29_spill] sm:$0xff]  ;;  %v9565_v27 = vld [vmem:[#allocation31_spill] sm:$0xff] }
 0x173   : > { %9552 = vst [vmem:[#allocation18_spill] sm:$0xff] %v6971_v35  ;;  %v6973_v2 = vpop.xlane.xlu0 %1040  ;;  %v9564_v8 = vmax.f32 %v9562_v48, %v9563_v53  ;;  %v9567_v35 = vmax.f32 %v9565_v27, %v9566_v12  ;;  %v9578_v53 = vld [vmem:[#allocation37_spill] sm:$0xff]  ;;  %v9582_v12 = vld [vmem:[#allocation39_spill] sm:$0xff] }
 0x174   : > { %9553 = vst [vmem:[#allocation17_spill] sm:$0xff] %v6973_v2 }
 0x176   : > { %1405 = vmax.xlane.f32.xlu1 %v9556_v54  ;;  %1400 = vmax.xlane.f32.xlu0 %v9559_v33  ;;  %v6981_v6 = vpop.xlane.xlu1 %1055  ;;  %v9571_v54 = vld [vmem:[#allocation34_spill] sm:$0xff]  ;;  %v9573_v33 = vld [vmem:[#allocation35_spill] sm:$0xff] }
 0x177   : > { %9560 = vst [vmem:[#allocation14_spill] sm:$0xff] %v6981_v6  ;;  %v6983_v25 = vpop.xlane.xlu0 %1050  ;;  %v9572_v45 = vmax.f32 %v9570_v52, %v9571_v54  ;;  %v9575_v6 = vmax.f32 %v9573_v33, %v9574_v18  ;;  %v9586_v54 = vld [vmem:[#allocation41_spill] sm:$0xff]  ;;  %v9590_v18 = vld [vmem:[#allocation44_spill] sm:$0xff] }
 0x178   : > { %9561 = vst [vmem:[#allocation13_spill] sm:$0xff] %v6983_v25 }
 0x17a   : > { %1415 = vmax.xlane.f32.xlu1 %v9564_v8  ;;  %1410 = vmax.xlane.f32.xlu0 %v9567_v35  ;;  %v6991_v2 = vpop.xlane.xlu1 %1065  ;;  %v9579_v8 = vld [vmem:[#allocation38_spill] sm:$0xff]  ;;  %v9581_v35 = vld [vmem:[#allocation40_spill] sm:$0xff] }
 0x17b   : > { %9568 = vst [vmem:[#allocation23_spill] sm:$0xff] %v6991_v2  ;;  %v6993_v46 = vpop.xlane.xlu0 %1060  ;;  %v9580_v27 = vmax.f32 %v9578_v53, %v9579_v8  ;;  %v9583_v2 = vmax.f32 %v9581_v35, %v9582_v12  ;;  %v9594_v8 = vld [vmem:[#allocation45_spill] sm:$0xff]  ;;  %v9598_v12 = vld [vmem:[#allocation48_spill] sm:$0xff] }
 0x17c   : > { %9569 = vst [vmem:[#allocation21_spill] sm:$0xff] %v6993_v46 }
 0x17e   : > { %1425 = vmax.xlane.f32.xlu1 %v9572_v45  ;;  %1420 = vmax.xlane.f32.xlu0 %v9575_v6  ;;  %v7001_v25 = vpop.xlane.xlu1 %1075  ;;  %v9587_v45 = vld [vmem:[#allocation42_spill] sm:$0xff]  ;;  %v9589_v6 = vld [vmem:[#allocation43_spill] sm:$0xff] }
 0x17f   : > { %9576 = vst [vmem:[#allocation24_spill] sm:$0xff] %v7001_v25  ;;  %v7003_v48 = vpop.xlane.xlu0 %1070  ;;  %v9588_v33 = vmax.f32 %v9586_v54, %v9587_v45  ;;  %v9591_v25 = vmax.f32 %v9589_v6, %v9590_v18  ;;  %v9602_v45 = vld [vmem:[#allocation49_spill] sm:$0xff]  ;;  %v9606_v18 = vld [vmem:[#allocation52_spill] sm:$0xff] }
 0x180   : > { %9577 = vst [vmem:[#allocation22_spill] sm:$0xff] %v7003_v48 }
 0x182   : > { %1435 = vmax.xlane.f32.xlu1 %v9580_v27  ;;  %1430 = vmax.xlane.f32.xlu0 %v9583_v2  ;;  %v7011_v46 = vpop.xlane.xlu1 %1085  ;;  %v9595_v27 = vld [vmem:[#allocation46_spill] sm:$0xff]  ;;  %v9597_v2 = vld [vmem:[#allocation47_spill] sm:$0xff] }
 0x183   : > { %9584 = vst [vmem:[#allocation27_spill] sm:$0xff] %v7011_v46  ;;  %v7013_v52 = vpop.xlane.xlu0 %1080  ;;  %v9596_v35 = vmax.f32 %v9594_v8, %v9595_v27  ;;  %v9599_v46 = vmax.f32 %v9597_v2, %v9598_v12  ;;  %v9610_v27 = vld [vmem:[#allocation53_spill] sm:$0xff]  ;;  %v9614_v12 = vld [vmem:[#allocation56_spill] sm:$0xff] }
 0x184   : > { %9585 = vst [vmem:[#allocation25_spill] sm:$0xff] %v7013_v52 }
 0x186   : > { %1445 = vmax.xlane.f32.xlu1 %v9588_v33  ;;  %1440 = vmax.xlane.f32.xlu0 %v9591_v25  ;;  %v7021_v48 = vpop.xlane.xlu1 %1095  ;;  %v9603_v33 = vld [vmem:[#allocation50_spill] sm:$0xff]  ;;  %v9605_v25 = vld [vmem:[#allocation51_spill] sm:$0xff] }
 0x187   : > { %9592 = vst [vmem:[#allocation28_spill] sm:$0xff] %v7021_v48  ;;  %v7023_v53 = vpop.xlane.xlu0 %1090  ;;  %v9604_v6 = vmax.f32 %v9602_v45, %v9603_v33  ;;  %v9607_v48 = vmax.f32 %v9605_v25, %v9606_v18  ;;  %v9618_v33 = vld [vmem:[#allocation57_spill] sm:$0xff]  ;;  %v9622_v18 = vld [vmem:[#allocation60_spill] sm:$0xff] }
 0x188   : > { %9593 = vst [vmem:[#allocation26_spill] sm:$0xff] %v7023_v53 }
 0x18a   : > { %1455 = vmax.xlane.f32.xlu1 %v9596_v35  ;;  %1450 = vmax.xlane.f32.xlu0 %v9599_v46  ;;  %v7031_v52 = vpop.xlane.xlu1 %1105  ;;  %v9611_v35 = vld [vmem:[#allocation54_spill] sm:$0xff]  ;;  %v9613_v46 = vld [vmem:[#allocation55_spill] sm:$0xff] }
 0x18b   : > { %9600 = vst [vmem:[#allocation30_spill] sm:$0xff] %v7031_v52  ;;  %v7033_v54 = vpop.xlane.xlu0 %1100  ;;  %v9612_v2 = vmax.f32 %v9610_v27, %v9611_v35  ;;  %v9615_v52 = vmax.f32 %v9613_v46, %v9614_v12  ;;  %v9626_v35 = vld [vmem:[#allocation61_spill] sm:$0xff]  ;;  %v9630_v12 = vld [vmem:[#allocation64_spill] sm:$0xff] }
 0x18c   : > { %9601 = vst [vmem:[#allocation29_spill] sm:$0xff] %v7033_v54 }
 0x18e   : > { %1465 = vmax.xlane.f32.xlu1 %v9604_v6  ;;  %1460 = vmax.xlane.f32.xlu0 %v9607_v48  ;;  %v7041_v53 = vpop.xlane.xlu1 %1115  ;;  %v9619_v6 = vld [vmem:[#allocation58_spill] sm:$0xff]  ;;  %v9621_v48 = vld [vmem:[#allocation59_spill] sm:$0xff] }
 0x18f   : > { %9608 = vst [vmem:[#allocation31_spill] sm:$0xff] %v7041_v53  ;;  %v7043_v8 = vpop.xlane.xlu0 %1110  ;;  %v9620_v25 = vmax.f32 %v9618_v33, %v9619_v6  ;;  %v9623_v53 = vmax.f32 %v9621_v48, %v9622_v18  ;;  %v9634_v6 = vld [vmem:[#allocation65_spill] sm:$0xff]  ;;  %v9638_v18 = vld [vmem:[#allocation68_spill] sm:$0xff] }
 0x190   : > { %9609 = vst [vmem:[#allocation32_spill] sm:$0xff] %v7043_v8 }
 0x192   : > { %1475 = vmax.xlane.f32.xlu1 %v9612_v2  ;;  %1470 = vmax.xlane.f32.xlu0 %v9615_v52  ;;  %v7051_v54 = vpop.xlane.xlu1 %1125  ;;  %v9627_v2 = vld [vmem:[#allocation62_spill] sm:$0xff]  ;;  %v9629_v52 = vld [vmem:[#allocation63_spill] sm:$0xff] }
 0x193   : > { %9616 = vst [vmem:[#allocation33_spill] sm:$0xff] %v7051_v54  ;;  %v7053_v45 = vpop.xlane.xlu0 %1120  ;;  %v9628_v46 = vmax.f32 %v9626_v35, %v9627_v2  ;;  %v9631_v54 = vmax.f32 %v9629_v52, %v9630_v12  ;;  %v9642_v2 = vld [vmem:[#allocation69_spill] sm:$0xff]  ;;  %v9646_v12 = vld [vmem:[#allocation72_spill] sm:$0xff] }
 0x194   : > { %9617 = vst [vmem:[#allocation34_spill] sm:$0xff] %v7053_v45 }
 0x196   : > { %1485 = vmax.xlane.f32.xlu1 %v9620_v25  ;;  %1480 = vmax.xlane.f32.xlu0 %v9623_v53  ;;  %v7061_v8 = vpop.xlane.xlu1 %1135  ;;  %v9635_v25 = vld [vmem:[#allocation66_spill] sm:$0xff]  ;;  %v9637_v53 = vld [vmem:[#allocation67_spill] sm:$0xff] }
 0x197   : > { %9624 = vst [vmem:[#allocation35_spill] sm:$0xff] %v7061_v8  ;;  %v7063_v27 = vpop.xlane.xlu0 %1130  ;;  %v9636_v48 = vmax.f32 %v9634_v6, %v9635_v25  ;;  %v9639_v8 = vmax.f32 %v9637_v53, %v9638_v18  ;;  %v9650_v25 = vld [vmem:[#allocation73_spill] sm:$0xff]  ;;  %v9654_v18 = vld [vmem:[#allocation76_spill] sm:$0xff] }
 0x198   : > { %9625 = vst [vmem:[#allocation36_spill] sm:$0xff] %v7063_v27 }
 0x19a   : > { %1495 = vmax.xlane.f32.xlu1 %v9628_v46  ;;  %1490 = vmax.xlane.f32.xlu0 %v9631_v54  ;;  %v7071_v45 = vpop.xlane.xlu1 %1145  ;;  %v9643_v46 = vld [vmem:[#allocation70_spill] sm:$0xff]  ;;  %v9645_v54 = vld [vmem:[#allocation71_spill] sm:$0xff] }
 0x19b   : > { %9632 = vst [vmem:[#allocation37_spill] sm:$0xff] %v7071_v45  ;;  %v7073_v33 = vpop.xlane.xlu0 %1140  ;;  %v9644_v52 = vmax.f32 %v9642_v2, %v9643_v46  ;;  %v9647_v45 = vmax.f32 %v9645_v54, %v9646_v12  ;;  %v9658_v46 = vld [vmem:[#allocation77_spill] sm:$0xff]  ;;  %v9662_v12 = vld [vmem:[#allocation80_spill] sm:$0xff] }
 0x19c   : > { %9633 = vst [vmem:[#allocation38_spill] sm:$0xff] %v7073_v33 }
 0x19e   : > { %1505 = vmax.xlane.f32.xlu1 %v9636_v48  ;;  %1500 = vmax.xlane.f32.xlu0 %v9639_v8  ;;  %v7081_v27 = vpop.xlane.xlu1 %1155  ;;  %v9651_v48 = vld [vmem:[#allocation74_spill] sm:$0xff]  ;;  %v9653_v8 = vld [vmem:[#allocation75_spill] sm:$0xff] }
 0x19f   : > { %9640 = vst [vmem:[#allocation40_spill] sm:$0xff] %v7081_v27  ;;  %v7083_v35 = vpop.xlane.xlu0 %1150  ;;  %v9652_v53 = vmax.f32 %v9650_v25, %v9651_v48  ;;  %v9655_v27 = vmax.f32 %v9653_v8, %v9654_v18  ;;  %v9666_v48 = vld [vmem:[#allocation81_spill] sm:$0xff]  ;;  %v9670_v18 = vld [vmem:[#allocation84_spill] sm:$0xff] }
 0x1a0   : > { %9641 = vst [vmem:[#allocation39_spill] sm:$0xff] %v7083_v35 }
 0x1a2   : > { %1515 = vmax.xlane.f32.xlu1 %v9644_v52  ;;  %1510 = vmax.xlane.f32.xlu0 %v9647_v45  ;;  %v7091_v33 = vpop.xlane.xlu1 %1165  ;;  %v9659_v52 = vld [vmem:[#allocation78_spill] sm:$0xff]  ;;  %v9661_v45 = vld [vmem:[#allocation79_spill] sm:$0xff] }
 0x1a3   : > { %9648 = vst [vmem:[#allocation41_spill] sm:$0xff] %v7091_v33  ;;  %v7093_v6 = vpop.xlane.xlu0 %1160  ;;  %v9660_v54 = vmax.f32 %v9658_v46, %v9659_v52  ;;  %v9663_v33 = vmax.f32 %v9661_v45, %v9662_v12  ;;  %v9674_v52 = vld [vmem:[#allocation85_spill] sm:$0xff]  ;;  %v9678_v12 = vld [vmem:[#allocation88_spill] sm:$0xff] }
 0x1a4   : > { %9649 = vst [vmem:[#allocation42_spill] sm:$0xff] %v7093_v6 }
 0x1a6   : > { %1525 = vmax.xlane.f32.xlu1 %v9652_v53  ;;  %1520 = vmax.xlane.f32.xlu0 %v9655_v27  ;;  %v7101_v35 = vpop.xlane.xlu1 %1175  ;;  %v9667_v53 = vld [vmem:[#allocation82_spill] sm:$0xff]  ;;  %v9669_v27 = vld [vmem:[#allocation83_spill] sm:$0xff] }
 0x1a7   : > { %9656 = vst [vmem:[#allocation43_spill] sm:$0xff] %v7101_v35  ;;  %v7103_v2 = vpop.xlane.xlu0 %1170  ;;  %v9668_v8 = vmax.f32 %v9666_v48, %v9667_v53  ;;  %v9671_v35 = vmax.f32 %v9669_v27, %v9670_v18  ;;  %v9682_v53 = vld [vmem:[#allocation89_spill] sm:$0xff]  ;;  %v9686_v18 = vld [vmem:[#allocation92_spill] sm:$0xff] }
 0x1a8   : > { %9657 = vst [vmem:[#allocation44_spill] sm:$0xff] %v7103_v2 }
 0x1aa   : > { %1535 = vmax.xlane.f32.xlu1 %v9660_v54  ;;  %1530 = vmax.xlane.f32.xlu0 %v9663_v33  ;;  %v7111_v6 = vpop.xlane.xlu1 %1185  ;;  %v9675_v54 = vld [vmem:[#allocation86_spill] sm:$0xff]  ;;  %v9677_v33 = vld [vmem:[#allocation87_spill] sm:$0xff] }
 0x1ab   : > { %9664 = vst [vmem:[#allocation45_spill] sm:$0xff] %v7111_v6  ;;  %v7113_v25 = vpop.xlane.xlu0 %1180  ;;  %v9676_v45 = vmax.f32 %v9674_v52, %v9675_v54  ;;  %v9679_v6 = vmax.f32 %v9677_v33, %v9678_v12  ;;  %v9690_v54 = vld [vmem:[#allocation93_spill] sm:$0xff]  ;;  %v9694_v12 = vld [vmem:[#allocation96_spill] sm:$0xff] }
 0x1ac   : > { %9665 = vst [vmem:[#allocation46_spill] sm:$0xff] %v7113_v25 }
 0x1ae   : > { %1545 = vmax.xlane.f32.xlu1 %v9668_v8  ;;  %1540 = vmax.xlane.f32.xlu0 %v9671_v35  ;;  %v7121_v2 = vpop.xlane.xlu1 %1195  ;;  %v9683_v8 = vld [vmem:[#allocation90_spill] sm:$0xff]  ;;  %v9685_v35 = vld [vmem:[#allocation91_spill] sm:$0xff] }
 0x1af   : > { %9672 = vst [vmem:[#allocation47_spill] sm:$0xff] %v7121_v2  ;;  %v7123_v46 = vpop.xlane.xlu0 %1190  ;;  %v9684_v27 = vmax.f32 %v9682_v53, %v9683_v8  ;;  %v9687_v2 = vmax.f32 %v9685_v35, %v9686_v18  ;;  %v9698_v8 = vld [vmem:[#allocation97_spill] sm:$0xff]  ;;  %v9702_v18 = vld [vmem:[#allocation100_spill] sm:$0xff] }
 0x1b0   : > { %9673 = vst [vmem:[#allocation48_spill] sm:$0xff] %v7123_v46 }
 0x1b2   : > { %1555 = vmax.xlane.f32.xlu1 %v9676_v45  ;;  %1550 = vmax.xlane.f32.xlu0 %v9679_v6  ;;  %v7131_v25 = vpop.xlane.xlu1 %1205  ;;  %v9691_v45 = vld [vmem:[#allocation94_spill] sm:$0xff]  ;;  %v9693_v6 = vld [vmem:[#allocation95_spill] sm:$0xff] }
 0x1b3   : > { %9680 = vst [vmem:[#allocation49_spill] sm:$0xff] %v7131_v25  ;;  %v7133_v48 = vpop.xlane.xlu0 %1200  ;;  %v9692_v33 = vmax.f32 %v9690_v54, %v9691_v45  ;;  %v9695_v25 = vmax.f32 %v9693_v6, %v9694_v12  ;;  %v9706_v45 = vld [vmem:[#allocation101_spill] sm:$0xff]  ;;  %v9710_v12 = vld [vmem:[#allocation104_spill] sm:$0xff] }
 0x1b4   : > { %9681 = vst [vmem:[#allocation50_spill] sm:$0xff] %v7133_v48 }
 0x1b6   : > { %1565 = vmax.xlane.f32.xlu1 %v9684_v27  ;;  %1560 = vmax.xlane.f32.xlu0 %v9687_v2  ;;  %v7141_v46 = vpop.xlane.xlu1 %1215  ;;  %v9699_v27 = vld [vmem:[#allocation98_spill] sm:$0xff]  ;;  %v9701_v2 = vld [vmem:[#allocation99_spill] sm:$0xff] }
 0x1b7   : > { %9688 = vst [vmem:[#allocation51_spill] sm:$0xff] %v7141_v46  ;;  %v7143_v52 = vpop.xlane.xlu0 %1210  ;;  %v9700_v35 = vmax.f32 %v9698_v8, %v9699_v27  ;;  %v9703_v46 = vmax.f32 %v9701_v2, %v9702_v18  ;;  %v9714_v27 = vld [vmem:[#allocation105_spill] sm:$0xff]  ;;  %v9718_v18 = vld [vmem:[#allocation108_spill] sm:$0xff] }
 0x1b8   : > { %9689 = vst [vmem:[#allocation52_spill] sm:$0xff] %v7143_v52 }
 0x1ba   : > { %1575 = vmax.xlane.f32.xlu1 %v9692_v33  ;;  %1570 = vmax.xlane.f32.xlu0 %v9695_v25  ;;  %v7151_v48 = vpop.xlane.xlu1 %1225  ;;  %v9707_v33 = vld [vmem:[#allocation102_spill] sm:$0xff]  ;;  %v9709_v25 = vld [vmem:[#allocation103_spill] sm:$0xff] }
 0x1bb   : > { %9696 = vst [vmem:[#allocation53_spill] sm:$0xff] %v7151_v48  ;;  %v7153_v53 = vpop.xlane.xlu0 %1220  ;;  %v9708_v6 = vmax.f32 %v9706_v45, %v9707_v33  ;;  %v9711_v48 = vmax.f32 %v9709_v25, %v9710_v12  ;;  %v9722_v33 = vld [vmem:[#allocation109_spill] sm:$0xff]  ;;  %v9726_v12 = vld [vmem:[#allocation112_spill] sm:$0xff] }
 0x1bc   : > { %9697 = vst [vmem:[#allocation54_spill] sm:$0xff] %v7153_v53 }
 0x1be   : > { %1585 = vmax.xlane.f32.xlu1 %v9700_v35  ;;  %1580 = vmax.xlane.f32.xlu0 %v9703_v46  ;;  %v7161_v52 = vpop.xlane.xlu1 %1235  ;;  %v9715_v35 = vld [vmem:[#allocation106_spill] sm:$0xff]  ;;  %v9717_v46 = vld [vmem:[#allocation107_spill] sm:$0xff] }
 0x1bf   : > { %9704 = vst [vmem:[#allocation55_spill] sm:$0xff] %v7161_v52  ;;  %v7163_v54 = vpop.xlane.xlu0 %1230  ;;  %v9716_v2 = vmax.f32 %v9714_v27, %v9715_v35  ;;  %v9719_v52 = vmax.f32 %v9717_v46, %v9718_v18  ;;  %v9730_v35 = vld [vmem:[#allocation113_spill] sm:$0xff]  ;;  %v9734_v18 = vld [vmem:[#allocation116_spill] sm:$0xff] }
 0x1c0   : > { %9705 = vst [vmem:[#allocation56_spill] sm:$0xff] %v7163_v54 }
 0x1c2   : > { %1595 = vmax.xlane.f32.xlu1 %v9708_v6  ;;  %1590 = vmax.xlane.f32.xlu0 %v9711_v48  ;;  %v7171_v53 = vpop.xlane.xlu1 %1245  ;;  %v9723_v6 = vld [vmem:[#allocation110_spill] sm:$0xff]  ;;  %v9725_v48 = vld [vmem:[#allocation111_spill] sm:$0xff] }
 0x1c3   : > { %9712 = vst [vmem:[#allocation57_spill] sm:$0xff] %v7171_v53  ;;  %v7173_v8 = vpop.xlane.xlu0 %1240  ;;  %v9724_v25 = vmax.f32 %v9722_v33, %v9723_v6  ;;  %v9727_v53 = vmax.f32 %v9725_v48, %v9726_v12  ;;  %v9738_v6 = vld [vmem:[#allocation117_spill] sm:$0xff]  ;;  %v9742_v12 = vld [vmem:[#allocation120_spill] sm:$0xff] }
 0x1c4   : > { %9713 = vst [vmem:[#allocation58_spill] sm:$0xff] %v7173_v8 }
 0x1c6   : > { %1605 = vmax.xlane.f32.xlu1 %v9716_v2  ;;  %1600 = vmax.xlane.f32.xlu0 %v9719_v52  ;;  %v7181_v54 = vpop.xlane.xlu1 %1255  ;;  %v9731_v2 = vld [vmem:[#allocation114_spill] sm:$0xff]  ;;  %v9733_v52 = vld [vmem:[#allocation115_spill] sm:$0xff] }
 0x1c7   : > { %9720 = vst [vmem:[#allocation59_spill] sm:$0xff] %v7181_v54  ;;  %v7183_v45 = vpop.xlane.xlu0 %1250  ;;  %v9732_v46 = vmax.f32 %v9730_v35, %v9731_v2  ;;  %v9735_v54 = vmax.f32 %v9733_v52, %v9734_v18  ;;  %v9746_v2 = vld [vmem:[#allocation121_spill] sm:$0xff] }
 0x1c8   : > { %9721 = vst [vmem:[#allocation60_spill] sm:$0xff] %v7183_v45  ;;  %v9750_v18 = vld [vmem:[#allocation125_spill] sm:$0xff] }
 0x1ca   : > { %1615 = vmax.xlane.f32.xlu1 %v9724_v25  ;;  %1610 = vmax.xlane.f32.xlu0 %v9727_v53  ;;  %v7191_v8 = vpop.xlane.xlu1 %1265  ;;  %v9739_v25 = vld [vmem:[#allocation118_spill] sm:$0xff]  ;;  %v9741_v53 = vld [vmem:[#allocation119_spill] sm:$0xff] }
 0x1cb   : > { %9728 = vst [vmem:[#allocation61_spill] sm:$0xff] %v7191_v8  ;;  %v7193_v27 = vpop.xlane.xlu0 %1260  ;;  %v9740_v48 = vmax.f32 %v9738_v6, %v9739_v25  ;;  %v9743_v8 = vmax.f32 %v9741_v53, %v9742_v12  ;;  %v9754_v25 = vld [vmem:[#allocation126_spill] sm:$0xff] }
 0x1cc   : > { %9729 = vst [vmem:[#allocation62_spill] sm:$0xff] %v7193_v27  ;;  %v9758_v12 = vld [vmem:[#allocation130_spill] sm:$0xff] }
 0x1ce   : > { %1625 = vmax.xlane.f32.xlu1 %v9732_v46  ;;  %1620 = vmax.xlane.f32.xlu0 %v9735_v54  ;;  %v7201_v45 = vpop.xlane.xlu1 %1275  ;;  %v9747_v46 = vld [vmem:[#allocation123_spill] sm:$0xff]  ;;  %v9749_v54 = vld [vmem:[#allocation124_spill] sm:$0xff] }
 0x1cf   : > { %9736 = vst [vmem:[#allocation63_spill] sm:$0xff] %v7201_v45  ;;  %v7203_v33 = vpop.xlane.xlu0 %1270  ;;  %v9748_v52 = vmax.f32 %v9746_v2, %v9747_v46  ;;  %v9751_v45 = vmax.f32 %v9749_v54, %v9750_v18  ;;  %v9762_v46 = vld [vmem:[#allocation131_spill] sm:$0xff] }
 0x1d0   : > { %9737 = vst [vmem:[#allocation64_spill] sm:$0xff] %v7203_v33  ;;  %v9766_v18 = vld [vmem:[#allocation135_spill] sm:$0xff] }
 0x1d2   : > { %1635 = vmax.xlane.f32.xlu1 %v9740_v48  ;;  %1630 = vmax.xlane.f32.xlu0 %v9743_v8  ;;  %v7211_v27 = vpop.xlane.xlu1 %1285  ;;  %v9755_v48 = vld [vmem:[#allocation128_spill] sm:$0xff]  ;;  %v9757_v8 = vld [vmem:[#allocation129_spill] sm:$0xff] }
 0x1d3   : > { %9744 = vst [vmem:[#allocation65_spill] sm:$0xff] %v7211_v27  ;;  %v7213_v35 = vpop.xlane.xlu0 %1280  ;;  %v9756_v53 = vmax.f32 %v9754_v25, %v9755_v48  ;;  %v9759_v27 = vmax.f32 %v9757_v8, %v9758_v12  ;;  %v9770_v48 = vld [vmem:[#allocation136_spill] sm:$0xff] }
 0x1d4   : > { %9745 = vst [vmem:[#allocation66_spill] sm:$0xff] %v7213_v35  ;;  %v9774_v12 = vld [vmem:[#allocation140_spill] sm:$0xff] }
 0x1d6   : > { %1645 = vmax.xlane.f32.xlu1 %v9748_v52  ;;  %1640 = vmax.xlane.f32.xlu0 %v9751_v45  ;;  %v7221_v33 = vpop.xlane.xlu1 %1295  ;;  %v9763_v52 = vld [vmem:[#allocation132_spill] sm:$0xff]  ;;  %v9765_v45 = vld [vmem:[#allocation133_spill] sm:$0xff] }
 0x1d7   : > { %9752 = vst [vmem:[#allocation67_spill] sm:$0xff] %v7221_v33  ;;  %v7223_v6 = vpop.xlane.xlu0 %1290  ;;  %v9764_v54 = vmax.f32 %v9762_v46, %v9763_v52  ;;  %v9767_v33 = vmax.f32 %v9765_v45, %v9766_v18  ;;  %v9778_v52 = vld [vmem:[#allocation142_spill] sm:$0xff] }
 0x1d8   : > { %9753 = vst [vmem:[#allocation68_spill] sm:$0xff] %v7223_v6  ;;  %v9782_v18 = vld [vmem:[#allocation146_spill] sm:$0xff] }
 0x1da   : > { %1655 = vmax.xlane.f32.xlu1 %v9756_v53  ;;  %1650 = vmax.xlane.f32.xlu0 %v9759_v27  ;;  %v7231_v35 = vpop.xlane.xlu1 %1305  ;;  %v9771_v53 = vld [vmem:[#allocation138_spill] sm:$0xff]  ;;  %v9773_v27 = vld [vmem:[#allocation139_spill] sm:$0xff] }
 0x1db   : > { %9760 = vst [vmem:[#allocation69_spill] sm:$0xff] %v7231_v35  ;;  %v7233_v2 = vpop.xlane.xlu0 %1300  ;;  %v9772_v8 = vmax.f32 %v9770_v48, %v9771_v53  ;;  %v9775_v35 = vmax.f32 %v9773_v27, %v9774_v12  ;;  %v9786_v53 = vld [vmem:[#allocation147_spill] sm:$0xff]  ;;  %v9790_v12 = vld [vmem:[#allocation150_spill] sm:$0xff] }
 0x1dc   : > { %9761 = vst [vmem:[#allocation70_spill] sm:$0xff] %v7233_v2 }
 0x1de   : > { %1665 = vmax.xlane.f32.xlu1 %v9764_v54  ;;  %1660 = vmax.xlane.f32.xlu0 %v9767_v33  ;;  %v7241_v6 = vpop.xlane.xlu1 %1315  ;;  %v9779_v54 = vld [vmem:[#allocation144_spill] sm:$0xff]  ;;  %v9781_v33 = vld [vmem:[#allocation145_spill] sm:$0xff] }
 0x1df   : > { %9768 = vst [vmem:[#allocation71_spill] sm:$0xff] %v7241_v6  ;;  %v7243_v25 = vpop.xlane.xlu0 %1310  ;;  %v9780_v45 = vmax.f32 %v9778_v52, %v9779_v54  ;;  %v9783_v6 = vmax.f32 %v9781_v33, %v9782_v18  ;;  %v9794_v54 = vld [vmem:[#allocation151_spill] sm:$0xff] }
 0x1e0   : > { %9769 = vst [vmem:[#allocation72_spill] sm:$0xff] %v7243_v25  ;;  %v9798_v18 = vld [vmem:[#allocation155_spill] sm:$0xff] }
 0x1e2   : > { %1675 = vmax.xlane.f32.xlu1 %v9772_v8  ;;  %1670 = vmax.xlane.f32.xlu0 %v9775_v35  ;;  %v7251_v2 = vpop.xlane.xlu1 %1325  ;;  %v9787_v8 = vld [vmem:[#allocation148_spill] sm:$0xff]  ;;  %v9789_v35 = vld [vmem:[#allocation149_spill] sm:$0xff] }
 0x1e3   : > { %9776 = vst [vmem:[#allocation73_spill] sm:$0xff] %v7251_v2  ;;  %v7253_v46 = vpop.xlane.xlu0 %1320  ;;  %v9788_v27 = vmax.f32 %v9786_v53, %v9787_v8  ;;  %v9791_v2 = vmax.f32 %v9789_v35, %v9790_v12  ;;  %v9802_v8 = vld [vmem:[#allocation156_spill] sm:$0xff] }
 0x1e4   : > { %9777 = vst [vmem:[#allocation74_spill] sm:$0xff] %v7253_v46  ;;  %v9806_v12 = vld [vmem:[#allocation160_spill] sm:$0xff] }
 0x1e6   : > { %1685 = vmax.xlane.f32.xlu1 %v9780_v45  ;;  %1680 = vmax.xlane.f32.xlu0 %v9783_v6  ;;  %v7261_v25 = vpop.xlane.xlu1 %1335  ;;  %v9795_v45 = vld [vmem:[#allocation152_spill] sm:$0xff]  ;;  %v9797_v6 = vld [vmem:[#allocation153_spill] sm:$0xff] }
 0x1e7   : > { %9784 = vst [vmem:[#allocation75_spill] sm:$0xff] %v7261_v25  ;;  %v7263_v48 = vpop.xlane.xlu0 %1330  ;;  %v9796_v33 = vmax.f32 %v9794_v54, %v9795_v45  ;;  %v9799_v25 = vmax.f32 %v9797_v6, %v9798_v18  ;;  %v9809_v45 = vld [vmem:[#allocation122_spill] sm:$0xff]  ;;  %v9813_v18 = vld [vmem:[#allocation164_spill] sm:$0xff] }
 0x1e8   : > { %9785 = vst [vmem:[#allocation76_spill] sm:$0xff] %v7263_v48 }
 0x1ea   : > { %1695 = vmax.xlane.f32.xlu1 %v9788_v27  ;;  %1690 = vmax.xlane.f32.xlu0 %v9791_v2  ;;  %v9803_v27 = vld [vmem:[#allocation158_spill] sm:$0xff]  ;;  %v9805_v2 = vld [vmem:[#allocation159_spill] sm:$0xff] }
 0x1eb   : > { %v7271_v46 = vpop.xlane.xlu1 %1345  ;;  %v7273_v52 = vpop.xlane.xlu0 %1340  ;;  %v9804_v35 = vmax.f32 %v9802_v8, %v9803_v27  ;;  %v9815_v27 = vld [vmem:[#allocation165_spill] sm:$0xff] }
 0x1ec   : > { %9792 = vst [vmem:[#allocation77_spill] sm:$0xff] %v7271_v46  ;;  %9793 = vst [vmem:[#allocation78_spill] sm:$0xff] %v7273_v52  ;;  %v9807_v46 = vmax.f32 %v9805_v2, %v9806_v12 }
 0x1ee   : > { %1705 = vmax.xlane.f32.xlu1 %v9796_v33  ;;  %1700 = vmax.xlane.f32.xlu0 %v9799_v25  ;;  %v9810_v33 = vld [vmem:[#allocation162_spill] sm:$0xff]  ;;  %v9812_v25 = vld [vmem:[#allocation163_spill] sm:$0xff] }
 0x1ef   : > { %v7281_v48 = vpop.xlane.xlu1 %1355  ;;  %v7283_v53 = vpop.xlane.xlu0 %1350  ;;  %v9811_v6 = vmax.f32 %v9809_v45, %v9810_v33  ;;  %v9820_v33 = vld [vmem:[#allocation171_spill] sm:$0xff] }
 0x1f0   : > { %9800 = vst [vmem:[#allocation79_spill] sm:$0xff] %v7281_v48  ;;  %9801 = vst [vmem:[#allocation80_spill] sm:$0xff] %v7283_v53  ;;  %v9814_v48 = vmax.f32 %v9812_v25, %v9813_v18 }
 0x1f2   : > { %1715 = vmax.xlane.f32.xlu1 %v9804_v35  ;;  %1710 = vmax.xlane.f32.xlu0 %v9807_v46  ;;  %v9816_v35 = vld [vmem:[#allocation127_spill] sm:$0xff]  ;;  %v9818_v46 = vld [vmem:[#allocation168_spill] sm:$0xff] }
 0x1f3   : > { %v7291_v52 = vpop.xlane.xlu1 %1365  ;;  %v7293_v54 = vpop.xlane.xlu0 %1360  ;;  %v9817_v2 = vmax.f32 %v9815_v27, %v9816_v35  ;;  %v9819_v12 = vmax.f32 %v9818_v46, %v9331_v9  ;;  %v9824_v35 = vld [vmem:[#allocation176_spill] sm:$0xff] }
 0x1f4   : > { %9808 = vst [vmem:[#allocation81_spill] sm:$0xff] %v7291_v52  ;;  %v9825_v9 = vmax.f32 %v9824_v35, %v5815_v55  ;;  %v9832_v35 = vld [vmem:[#allocation141_spill] sm:$0xff] }
 0x1f6   : > { %1725 = vmax.xlane.f32.xlu1 %v9811_v6  ;;  %1720 = vmax.xlane.f32.xlu0 %v9814_v48  ;;  %v9821_v6 = vmax.f32 %v9820_v33, %v9335_v28  ;;  %v9822_v48 = vld [vmem:[#allocation174_spill] sm:$0xff]  ;;  %v9828_v33 = vld [vmem:[#allocation137_spill] sm:$0xff] }
 0x1f7   : > { %v7301_v53 = vpop.xlane.xlu1 %1375  ;;  %v7303_v8 = vpop.xlane.xlu0 %1370  ;;  %v9823_v25 = vmax.f32 %v9822_v48, %v9337_v16  ;;  %v9829_v16 = vmax.f32 %v9828_v33, %v5859_v1  ;;  %v9836_v33 = vld [vmem:[#allocation189_spill] sm:$0xff] }
 0x1fa   : > { %1735 = vmax.xlane.f32.xlu1 %v9817_v2  ;;  %1730 = vmax.xlane.f32.xlu0 %v9819_v12  ;;  %v9826_v2 = vld [vmem:[#allocation178_spill] sm:$0xff] }
 0x1fb   : > { %v7311_v52 = vpop.xlane.xlu1 %1385  ;;  %v7313_v45 = vpop.xlane.xlu0 %1380  ;;  %v9827_v46 = vmax.f32 %v9826_v2, %v9343_v34  ;;  %v9833_v34 = vmax.f32 %v9832_v35, %v9351_v41  ;;  %v9840_v35 = vld [vmem:[#allocation194_spill] sm:$0xff] }
 0x1fe   : > { %1745 = vmax.xlane.f32.xlu1 %v9821_v6  ;;  %1740 = vmax.xlane.f32.xlu0 %v9823_v25  ;;  %v9830_v6 = vld [vmem:[#allocation183_spill] sm:$0xff] }
 0x1ff   : > { %v7321_v18 = vpop.xlane.xlu1 %1395  ;;  %v7323_v27 = vpop.xlane.xlu0 %1390  ;;  %v9831_v48 = vmax.f32 %v9830_v6, %v9348_v5  ;;  %v9837_v5 = vmax.f32 %v9836_v33, %v9357_v24  ;;  %v9845_v33 = vld [vmem:[#allocation154_spill] sm:$0xff] }
 0x202   : > { %1755 = vmax.xlane.f32.xlu1 %v9825_v9  ;;  %1750 = vmax.xlane.f32.xlu0 %v9827_v46  ;;  %v9834_v9 = vld [vmem:[#allocation187_spill] sm:$0xff] }
 0x203   : > { %v7331_v12 = vpop.xlane.xlu1 %1405  ;;  %v7333_v28 = vpop.xlane.xlu0 %1400  ;;  %v9835_v2 = vmax.f32 %v9834_v9, %v9353_v47  ;;  %v9841_v47 = vmax.f32 %v9840_v35, %v9361_v58  ;;  %v9849_v35 = vld [vmem:[#allocation204_spill] sm:$0xff] }
 0x206   : > { %1765 = vmax.xlane.f32.xlu1 %v9829_v16  ;;  %1760 = vmax.xlane.f32.xlu0 %v9831_v48  ;;  %v9838_v16 = vld [vmem:[#allocation192_spill] sm:$0xff] }
 0x207   : > { %v7341_v25 = vpop.xlane.xlu1 %1415  ;;  %v7343_v55 = vpop.xlane.xlu0 %1410  ;;  %v9839_v6 = vmax.f32 %v9838_v16, %v5967_v63  ;;  %v9846_v63 = vmax.f32 %v9845_v33, %v6035_v32  ;;  %v9853_v33 = vld [vmem:[#allocation210_spill] sm:$0xff] }
 0x20a   : > { %1775 = vmax.xlane.f32.xlu1 %v9833_v34  ;;  %1770 = vmax.xlane.f32.xlu0 %v9835_v2  ;;  %v9842_v34 = vld [vmem:[#allocation197_spill] sm:$0xff] }
 0x20b   : > { %v7351_v46 = vpop.xlane.xlu1 %1425  ;;  %v7353_v1 = vpop.xlane.xlu0 %1420  ;;  %v9843_v9 = vmax.f32 %v9842_v34, %v9365_v44  ;;  %v9850_v44 = vmax.f32 %v9849_v35, %v9374_v13  ;;  %v9858_v35 = vld [vmem:[#allocation215_spill] sm:$0xff] }
 0x20e   : > { %1785 = vmax.xlane.f32.xlu1 %v9837_v5  ;;  %1780 = vmax.xlane.f32.xlu0 %v9839_v6  ;;  %v9847_v5 = vld [vmem:[#allocation202_spill] sm:$0xff] }
 0x20f   : > { %v7361_v48 = vpop.xlane.xlu1 %1435  ;;  %v7363_v41 = vpop.xlane.xlu0 %1430  ;;  %v9848_v16 = vmax.f32 %v9847_v5, %v9370_v42  ;;  %v9854_v42 = vmax.f32 %v9853_v33, %v9380_v49 }
 0x212   : > { %1795 = vmax.xlane.f32.xlu1 %v9841_v47  ;;  %1790 = vmax.xlane.f32.xlu0 %v9843_v9  ;;  %v9851_v47 = vld [vmem:[#allocation207_spill] sm:$0xff] }
 0x213   : > { %v7371_v2 = vpop.xlane.xlu1 %1445  ;;  %v7373_v24 = vpop.xlane.xlu0 %1440  ;;  %v9852_v34 = vmax.f32 %v9851_v47, %v9376_v39  ;;  %v9859_v39 = vmax.f32 %v9858_v35, %v9386_v62  ;;  %v9860_v47 = vld [vmem:[#allocation219_spill] sm:$0xff] }
 0x214   : > { %9844 = vst [vmem:[#allocation82_spill] sm:$0xff] %v7371_v2 }
 0x216   : > { %1805 = vmax.xlane.f32.xlu1 %v9846_v63  ;;  %1800 = vmax.xlane.f32.xlu0 %v9848_v16  ;;  %v9855_v63 = vld [vmem:[#allocation212_spill] sm:$0xff] }
 0x217   : > { %v7381_v6 = vpop.xlane.xlu1 %1455  ;;  %v7383_v58 = vpop.xlane.xlu0 %1450  ;;  %v9856_v5 = vmax.f32 %v9855_v63, %v9383_v7  ;;  %v1857_v7 = vmax.f32 %v6394_v50, %v6397_v26  ;;  %v1867_v50 = vmax.f32 %v6424_v3, %v6427_v40 }
 0x219   : > { %v1858_v35 = vmax.f32 %v1857_v7, %v6421_v0  ;;  %v1868_v40 = vmax.f32 %v1867_v50, %v6457_v36  ;;  %v9878_v7 = vld [vmem:[#allocation211_spill] sm:$0xff]  ;;  %v9887_v50 = vld [vmem:[#allocation220_spill] sm:$0xff] }
 0x21a   : > { %1815 = vmax.xlane.f32.xlu1 %v9850_v44  ;;  %1810 = vmax.xlane.f32.xlu0 %v9852_v34  ;;  %v1862_v44 = vmax.f32 %v6386_v61, %v6389_v43  ;;  %v9861_v34 = vmax.f32 %v9860_v47, %v9391_v56  ;;  %v1872_v61 = vmax.f32 %v6413_v21, %v6416_v57  ;;  %v9866_v43 = vld [vmem:[#allocation224_spill] sm:$0xff] }
 0x21b   : > { %v7391_v9 = vpop.xlane.xlu1 %1465  ;;  %v7393_v32 = vpop.xlane.xlu0 %1460  ;;  %v9867_v56 = vmax.f32 %v9866_v43, %v6228_v4  ;;  %v1882_v4 = vmax.f32 %v6449_v38, %v6452_v30  ;;  %v9872_v57 = vmax.f32 %v6256_v59, %v6263_v17  ;;  %v1859_v3 = vmax.f32 %v1858_v35, %v6435_v14  ;;  %v9879_v38 = vld [vmem:[#allocation161_spill] sm:$0xff]  ;;  %v9885_v43 = vld [vmem:[#allocation216_spill] sm:$0xff] }
 0x21c   : > { %v1863_v62 = vmax.f32 %v1862_v44, %v6408_v23  ;;  %v1873_v21 = vmax.f32 %v1872_v61, %v6444_v31  ;;  %v9874_v44 = vld [vmem:[#allocation205_spill] sm:$0xff]  ;;  %v9884_v61 = vld [vmem:[#allocation218_spill] sm:$0xff] }
 0x21d   : > { %v1883_v30 = vmax.f32 %v1882_v4, %v9878_v7  ;;  %v9890_v4 = vld [vmem:[#allocation169_spill] sm:$0xff] }
 0x21e   : > { %1825 = vmax.xlane.f32.xlu1 %v9854_v42  ;;  %1820 = vmax.xlane.f32.xlu0 %v9856_v5  ;;  %v9864_v42 = vld [vmem:[#allocation166_spill] sm:$0xff]  ;;  %v1864_v23 = vmax.f32 %v1863_v62, %v6431_v15  ;;  %v9877_v15 = vld [vmem:[#allocation208_spill] sm:$0xff]  ;;  %v9895_v7 = vld [vmem:[#allocation229_spill] sm:$0xff] }
 0x21f   : > { %v7401_v16 = vpop.xlane.xlu1 %1475  ;;  %v7403_v13 = vpop.xlane.xlu0 %1470  ;;  %v9865_v63 = vmax.f32 %v9864_v42, %v9396_v20  ;;  %v9870_v20 = vld [vmem:[#allocation227_spill] sm:$0xff]  ;;  %v1874_v31 = vmax.f32 %v1873_v21, %v9877_v15  ;;  %v9880_v42 = vld [vmem:[#allocation213_spill] sm:$0xff]  ;;  %v9883_v62 = vld [vmem:[#allocation214_spill] sm:$0xff] }
 0x220   : > { %9857 = vst [vmem:[#allocation83_spill] sm:$0xff] %v7401_v16  ;;  %v1892_v59 = vmax.f32 %v9880_v42, %v9879_v38  ;;  %v9889_v21 = vld [vmem:[#allocation225_spill] sm:$0xff]  ;;  %v9894_v15 = vld [vmem:[#allocation230_spill] sm:$0xff] }
 0x221   : > { %v1897_v38 = vmax.f32 %v9895_v7, %v9894_v15  ;;  %v9908_v15 = vld [vmem:[#allocation244_spill] sm:$0xff]  ;;  %v9909_v7 = vld [vmem:[#allocation246_spill] sm:$0xff] }
 0x222   : > { %1835 = vmax.xlane.f32.xlu1 %v9859_v39  ;;  %1830 = vmax.xlane.f32.xlu0 %v9861_v34  ;;  %v9871_v39 = vmax.f32 %v9870_v20, %v6253_v22  ;;  %v9875_v22 = vld [vmem:[#allocation203_spill] sm:$0xff]  ;;  %v1884_v20 = vmax.f32 %v1883_v30, %v9887_v50  ;;  %v9902_v50 = vld [vmem:[#allocation232_spill] sm:$0xff] }
 0x223   : > { %v7413_v49 = vpop.xlane.xlu1 %1485  ;;  %v7417_v33 = vpop.xlane.xlu0 %1480  ;;  %v1877_v47 = vmax.f32 %v9875_v22, %v9874_v44  ;;  %v9892_v44 = vld [vmem:[#allocation221_spill] sm:$0xff]  ;;  %v9893_v22 = vld [vmem:[#allocation223_spill] sm:$0xff] }
 0x224   : > { %9862 = vst [vmem:[#allocation84_spill] sm:$0xff] %v7413_v49  ;;  %9863 = vst [vmem:[#allocation85_spill] sm:$0xff] %v7417_v33 }
 0x225   : > { %v1878_v36 = vmax.f32 %v1877_v47, %v9883_v62  ;;  %v9899_v62 = vld [vmem:[#allocation236_spill] sm:$0xff] }
 0x226   : > { %1845 = vmax.xlane.f32.xlu1 %v9865_v63  ;;  %1840 = vmax.xlane.f32.xlu0 %v9867_v56  ;;  %v9882_v63 = vld [vmem:[#allocation157_spill] sm:$0xff]  ;;  %v1887_v56 = vmax.f32 %v9885_v43, %v9884_v61  ;;  %v9900_v61 = vld [vmem:[#allocation235_spill] sm:$0xff] }
 0x227   : > { %v7428_v5 = vpop.xlane.xlu1 %1495  ;;  %v7433_v26 = vpop.xlane.xlu0 %1490  ;;  %v1869_v14 = vmax.f32 %v1868_v40, %v9882_v63  ;;  %v1879_v40 = vmax.f32 %v1878_v36, %v9892_v44  ;;  %v9898_v63 = vld [vmem:[#allocation234_spill] sm:$0xff]  ;;  %v1912_v43 = vmax.f32 %v9900_v61, %v9899_v62  ;;  %v9913_v61 = vld [vmem:[#allocation248_spill] sm:$0xff] }
 0x228   : > { %9868 = vst [vmem:[#allocation86_spill] sm:$0xff] %v7428_v5  ;;  %9869 = vst [vmem:[#allocation87_spill] sm:$0xff] %v7433_v26  ;;  %v1888_v47 = vmax.f32 %v1887_v56, %v9893_v22  ;;  %v9912_v62 = vld [vmem:[#allocation242_spill] sm:$0xff] }
 0x22a   : > { %1855 = vmax.xlane.f32.xlu1 %v9871_v39  ;;  %1850 = vmax.xlane.f32.xlu0 %v9872_v57  ;;  %v9888_v39 = vld [vmem:[#allocation167_spill] sm:$0xff]  ;;  %v1902_v57 = vmax.f32 %v9890_v4, %v9889_v21  ;;  %v1889_v36 = vmax.f32 %v1888_v47, %v9902_v50  ;;  %v9904_v21 = vld [vmem:[#allocation240_spill] sm:$0xff]  ;;  %v9914_v50 = vld [vmem:[#allocation250_spill] sm:$0xff] }
 0x22b   : > { %v7445_v0 = vpop.xlane.xlu1 %1505  ;;  %v7451_v34 = vpop.xlane.xlu0 %1500  ;;  %v9905_v4 = vld [vmem:[#allocation239_spill] sm:$0xff] }
 0x22c   : > { %9873 = vst [vmem:[#allocation88_spill] sm:$0xff] %v7445_v0  ;;  %9876 = vst [vmem:[#allocation89_spill] sm:$0xff] %v7451_v34  ;;  %v1907_v44 = vmax.f32 %v9905_v4, %v9904_v21 }
 0x22e   : > { %1865 = vmax.xlane.f32.xlu1 %v1864_v23  ;;  %1860 = vmax.xlane.f32.xlu0 %v1859_v3  ;;  %v1893_v23 = vmax.f32 %v1892_v59, %v9888_v39  ;;  %v1903_v59 = vmax.f32 %v1902_v57, %v9898_v63  ;;  %v9903_v39 = vld [vmem:[#allocation238_spill] sm:$0xff]  ;;  %v1913_v57 = vmax.f32 %v1912_v43, %v9908_v15  ;;  %v9919_v15 = vld [vmem:[#allocation256_spill] sm:$0xff] }
 0x22f   : > { %v7457_v17 = vpop.xlane.xlu1 %1515  ;;  %v7463_v35 = vpop.xlane.xlu0 %1510  ;;  %v1898_v56 = vmax.f32 %v1897_v38, %v9903_v39  ;;  %v1908_v38 = vmax.f32 %v1907_v44, %v9913_v61  ;;  %v9915_v39 = vld [vmem:[#allocation249_spill] sm:$0xff]  ;;  %v9924_v61 = vld [vmem:[#allocation260_spill] sm:$0xff] }
 0x230   : > { %9881 = vst [vmem:[#allocation90_spill] sm:$0xff] %v7457_v17  ;;  %9886 = vst [vmem:[#allocation91_spill] sm:$0xff] %v7463_v35  ;;  %v1917_v21 = vmax.f32 %v9915_v39, %v9914_v50 }
 0x231   : > { %v1899_v47 = vmax.f32 %v1898_v56, %v9912_v62  ;;  %v9923_v62 = vld [vmem:[#allocation258_spill] sm:$0xff] }
 0x232   : > { %1875 = vmax.xlane.f32.xlu1 %v1874_v31  ;;  %1870 = vmax.xlane.f32.xlu0 %v1869_v14  ;;  %v9897_v31 = vld [vmem:[#allocation231_spill] sm:$0xff]  ;;  %v1918_v44 = vmax.f32 %v1917_v21, %v9923_v62  ;;  %v9934_v62 = vld [vmem:[#allocation270_spill] sm:$0xff] }
 0x233   : > { %v7469_v3 = vpop.xlane.xlu1 %1525  ;;  %v7475_v42 = vpop.xlane.xlu0 %1520  ;;  %v1894_v30 = vmax.f32 %v1893_v23, %v9897_v31  ;;  %v9910_v31 = vld [vmem:[#allocation245_spill] sm:$0xff] }
 0x234   : > { %9891 = vst [vmem:[#allocation92_spill] sm:$0xff] %v7469_v3  ;;  %9896 = vst [vmem:[#allocation93_spill] sm:$0xff] %v7475_v42  ;;  %v1922_v63 = vmax.f32 %v9910_v31, %v9909_v7  ;;  %v9920_v3 = vld [vmem:[#allocation255_spill] sm:$0xff]  ;;  %v9922_v31 = vld [vmem:[#allocation252_spill] sm:$0xff] }
 0x235   : > { %v1932_v7 = vmax.f32 %v9920_v3, %v9919_v15  ;;  %v1909_v56 = vmax.f32 %v1908_v38, %v9922_v31  ;;  %v9932_v15 = vld [vmem:[#allocation262_spill] sm:$0xff]  ;;  %v9933_v31 = vld [vmem:[#allocation268_spill] sm:$0xff] }
 0x236   : > { %1885 = vmax.xlane.f32.xlu1 %v1884_v20  ;;  %1880 = vmax.xlane.f32.xlu0 %v1879_v40  ;;  %v9907_v20 = vld [vmem:[#allocation241_spill] sm:$0xff]  ;;  %v1919_v38 = vmax.f32 %v1918_v44, %v9932_v15  ;;  %v9943_v15 = vld [vmem:[#allocation278_spill] sm:$0xff] }
 0x237   : > { %v7481_v14 = vpop.xlane.xlu1 %1535  ;;  %v7487_v22 = vpop.xlane.xlu0 %1530  ;;  %v1904_v23 = vmax.f32 %v1903_v59, %v9907_v20  ;;  %v9918_v20 = vld [vmem:[#allocation254_spill] sm:$0xff] }
 0x238   : > { %9901 = vst [vmem:[#allocation94_spill] sm:$0xff] %v7481_v14  ;;  %9906 = vst [vmem:[#allocation95_spill] sm:$0xff] %v7487_v22  ;;  %v1923_v43 = vmax.f32 %v1922_v63, %v9918_v20  ;;  %v9929_v20 = vld [vmem:[#allocation266_spill] sm:$0xff] }
 0x23a   : > { %1895 = vmax.xlane.f32.xlu1 %v1894_v30  ;;  %1890 = vmax.xlane.f32.xlu0 %v1889_v36  ;;  %v9917_v30 = vld [vmem:[#allocation251_spill] sm:$0xff] }
 0x23b   : > { %v7493_v40 = vpop.xlane.xlu1 %1545  ;;  %v7499_v4 = vpop.xlane.xlu0 %1540  ;;  %v1914_v59 = vmax.f32 %v1913_v57, %v9917_v30  ;;  %v9928_v30 = vld [vmem:[#allocation264_spill] sm:$0xff] }
 0x23c   : > { %9911 = vst [vmem:[#allocation96_spill] sm:$0xff] %v7493_v40  ;;  %9916 = vst [vmem:[#allocation97_spill] sm:$0xff] %v7499_v4  ;;  %v9925_v40 = vld [vmem:[#allocation259_spill] sm:$0xff]  ;;  %v1933_v63 = vmax.f32 %v1932_v7, %v9928_v30  ;;  %v9930_v4 = vld [vmem:[#allocation265_spill] sm:$0xff] }
 0x23d   : > { %v1927_v50 = vmax.f32 %v9925_v40, %v9924_v61  ;;  %v1942_v3 = vmax.f32 %v9930_v4, %v9929_v20  ;;  %v9939_v30 = vld [vmem:[#allocation276_spill] sm:$0xff] }
 0x23e   : > { %1905 = vmax.xlane.f32.xlu1 %v1904_v23  ;;  %1900 = vmax.xlane.f32.xlu0 %v1899_v47  ;;  %v9927_v23 = vld [vmem:[#allocation261_spill] sm:$0xff]  ;;  %v9942_v20 = vld [vmem:[#allocation272_spill] sm:$0xff] }
 0x23f   : > { %v7505_v36 = vpop.xlane.xlu1 %1555  ;;  %v7511_v39 = vpop.xlane.xlu0 %1550  ;;  %v1924_v57 = vmax.f32 %v1923_v43, %v9927_v23  ;;  %v1928_v21 = vmax.f32 %v1927_v50, %v9933_v31  ;;  %v9938_v23 = vld [vmem:[#allocation274_spill] sm:$0xff]  ;;  %v9944_v31 = vld [vmem:[#allocation280_spill] sm:$0xff] }
 0x240   : > { %9921 = vst [vmem:[#allocation98_spill] sm:$0xff] %v7505_v36  ;;  %9926 = vst [vmem:[#allocation99_spill] sm:$0xff] %v7511_v39  ;;  %v9935_v36 = vld [vmem:[#allocation269_spill] sm:$0xff]  ;;  %v1943_v7 = vmax.f32 %v1942_v3, %v9938_v23  ;;  %v9940_v39 = vld [vmem:[#allocation275_spill] sm:$0xff] }
 0x241   : > { %v1937_v40 = vmax.f32 %v9935_v36, %v9934_v62  ;;  %v1952_v4 = vmax.f32 %v9940_v39, %v9939_v30  ;;  %v1929_v44 = vmax.f32 %v1928_v21, %v9942_v20  ;;  %v9949_v23 = vld [vmem:[#allocation286_spill] sm:$0xff]  ;;  %v9953_v20 = vld [vmem:[#allocation288_spill] sm:$0xff] }
 0x242   : > { %1915 = vmax.xlane.f32.xlu1 %v1914_v59  ;;  %1910 = vmax.xlane.f32.xlu0 %v1909_v56  ;;  %v9937_v59 = vld [vmem:[#allocation271_spill] sm:$0xff]  ;;  %v9952_v30 = vld [vmem:[#allocation282_spill] sm:$0xff] }
 0x243   : > { %v7517_v47 = vpop.xlane.xlu1 %1565  ;;  %v7523_v61 = vpop.xlane.xlu0 %1560  ;;  %v1934_v43 = vmax.f32 %v1933_v63, %v9937_v59  ;;  %v1938_v50 = vmax.f32 %v1937_v40, %v9943_v15  ;;  %v9948_v59 = vld [vmem:[#allocation284_spill] sm:$0xff]  ;;  %v9954_v15 = vld [vmem:[#allocation290_spill] sm:$0xff] }
 0x244   : > { %9931 = vst [vmem:[#allocation100_spill] sm:$0xff] %v7517_v47  ;;  %9936 = vst [vmem:[#allocation101_spill] sm:$0xff] %v7523_v61  ;;  %v9945_v47 = vld [vmem:[#allocation279_spill] sm:$0xff]  ;;  %v1953_v3 = vmax.f32 %v1952_v4, %v9948_v59  ;;  %v9950_v61 = vld [vmem:[#allocation285_spill] sm:$0xff] }
 0x245   : > { %v1947_v36 = vmax.f32 %v9945_v47, %v9944_v31  ;;  %v1962_v39 = vmax.f32 %v9950_v61, %v9949_v23  ;;  %v1939_v21 = vmax.f32 %v1938_v50, %v9952_v30  ;;  %v9959_v59 = vld [vmem:[#allocation296_spill] sm:$0xff]  ;;  %v9963_v30 = vld [vmem:[#allocation298_spill] sm:$0xff] }
 0x246   : > { %1925 = vmax.xlane.f32.xlu1 %v1924_v57  ;;  %1920 = vmax.xlane.f32.xlu0 %v1919_v38  ;;  %v9947_v57 = vld [vmem:[#allocation281_spill] sm:$0xff]  ;;  %v9962_v23 = vld [vmem:[#allocation292_spill] sm:$0xff] }
 0x247   : > { %v7529_v56 = vpop.xlane.xlu1 %1575  ;;  %v7535_v62 = vpop.xlane.xlu0 %1570  ;;  %v1944_v63 = vmax.f32 %v1943_v7, %v9947_v57  ;;  %v1948_v40 = vmax.f32 %v1947_v36, %v9953_v20  ;;  %v9958_v57 = vld [vmem:[#allocation294_spill] sm:$0xff]  ;;  %v9964_v20 = vld [vmem:[#allocation300_spill] sm:$0xff] }
 0x248   : > { %9941 = vst [vmem:[#allocation102_spill] sm:$0xff] %v7529_v56  ;;  %9946 = vst [vmem:[#allocation103_spill] sm:$0xff] %v7535_v62  ;;  %v9955_v56 = vld [vmem:[#allocation289_spill] sm:$0xff]  ;;  %v1963_v4 = vmax.f32 %v1962_v39, %v9958_v57  ;;  %v9960_v62 = vld [vmem:[#allocation295_spill] sm:$0xff] }
 0x249   : > { %v1957_v47 = vmax.f32 %v9955_v56, %v9954_v15  ;;  %v1972_v61 = vmax.f32 %v9960_v62, %v9959_v59  ;;  %v1949_v50 = vmax.f32 %v1948_v40, %v9962_v23  ;;  %v9969_v57 = vld [vmem:[#allocation306_spill] sm:$0xff]  ;;  %v9973_v23 = vld [vmem:[#allocation308_spill] sm:$0xff] }
 0x24a   : > { %1935 = vmax.xlane.f32.xlu1 %v1934_v43  ;;  %1930 = vmax.xlane.f32.xlu0 %v1929_v44  ;;  %v9957_v43 = vld [vmem:[#allocation291_spill] sm:$0xff]  ;;  %v9972_v59 = vld [vmem:[#allocation302_spill] sm:$0xff] }
 0x24b   : > { %v7541_v38 = vpop.xlane.xlu1 %1585  ;;  %v7547_v31 = vpop.xlane.xlu0 %1580  ;;  %v1954_v7 = vmax.f32 %v1953_v3, %v9957_v43  ;;  %v1958_v36 = vmax.f32 %v1957_v47, %v9963_v30  ;;  %v9968_v43 = vld [vmem:[#allocation304_spill] sm:$0xff]  ;;  %v9974_v30 = vld [vmem:[#allocation310_spill] sm:$0xff] }
 0x24c   : > { %9951 = vst [vmem:[#allocation104_spill] sm:$0xff] %v7541_v38  ;;  %9956 = vst [vmem:[#allocation105_spill] sm:$0xff] %v7547_v31  ;;  %v9965_v38 = vld [vmem:[#allocation299_spill] sm:$0xff]  ;;  %v1973_v39 = vmax.f32 %v1972_v61, %v9968_v43  ;;  %v9970_v31 = vld [vmem:[#allocation305_spill] sm:$0xff] }
 0x24d   : > { %v1967_v56 = vmax.f32 %v9965_v38, %v9964_v20  ;;  %v1982_v62 = vmax.f32 %v9970_v31, %v9969_v57  ;;  %v1959_v40 = vmax.f32 %v1958_v36, %v9972_v59  ;;  %v9979_v43 = vld [vmem:[#allocation316_spill] sm:$0xff]  ;;  %v9983_v59 = vld [vmem:[#allocation318_spill] sm:$0xff] }
 0x24e   : > { %1945 = vmax.xlane.f32.xlu1 %v1944_v63  ;;  %1940 = vmax.xlane.f32.xlu0 %v1939_v21  ;;  %v9967_v63 = vld [vmem:[#allocation301_spill] sm:$0xff]  ;;  %v9982_v57 = vld [vmem:[#allocation312_spill] sm:$0xff] }
 0x24f   : > { %v7553_v44 = vpop.xlane.xlu1 %1595  ;;  %v7559_v15 = vpop.xlane.xlu0 %1590  ;;  %v1964_v3 = vmax.f32 %v1963_v4, %v9967_v63  ;;  %v1968_v47 = vmax.f32 %v1967_v56, %v9973_v23  ;;  %v9978_v63 = vld [vmem:[#allocation314_spill] sm:$0xff]  ;;  %v9984_v23 = vld [vmem:[#allocation320_spill] sm:$0xff] }
 0x250   : > { %9961 = vst [vmem:[#allocation106_spill] sm:$0xff] %v7553_v44  ;;  %9966 = vst [vmem:[#allocation107_spill] sm:$0xff] %v7559_v15  ;;  %v9975_v44 = vld [vmem:[#allocation309_spill] sm:$0xff]  ;;  %v1983_v61 = vmax.f32 %v1982_v62, %v9978_v63  ;;  %v9980_v15 = vld [vmem:[#allocation315_spill] sm:$0xff] }
 0x251   : > { %v1977_v38 = vmax.f32 %v9975_v44, %v9974_v30  ;;  %v1992_v31 = vmax.f32 %v9980_v15, %v9979_v43  ;;  %v1969_v36 = vmax.f32 %v1968_v47, %v9982_v57  ;;  %v2002_v15 = vmax.f32 %v6881_v60, %v6884_v51  ;;  %v9990_v63 = vld [vmem:[#allocation326_spill] sm:$0xff]  ;;  %v9991_v43 = vld [vmem:[#allocation325_spill] sm:$0xff] }
 0x252   : > { %1955 = vmax.xlane.f32.xlu1 %v1954_v7  ;;  %1950 = vmax.xlane.f32.xlu0 %v1949_v50  ;;  %v9977_v7 = vld [vmem:[#allocation311_spill] sm:$0xff]  ;;  %v9994_v51 = vld [vmem:[#allocation329_spill] sm:$0xff] }
 0x253   : > { %v7565_v21 = vpop.xlane.xlu1 %1605  ;;  %v7571_v20 = vpop.xlane.xlu0 %1600  ;;  %v1974_v4 = vmax.f32 %v1973_v39, %v9977_v7  ;;  %v1978_v56 = vmax.f32 %v1977_v38, %v9983_v59  ;;  %v1993_v39 = vmax.f32 %v1992_v31, %v6876_v19  ;;  %v9989_v7 = vld [vmem:[#allocation324_spill] sm:$0xff]  ;;  %v2003_v19 = vmax.f32 %v2002_v15, %v6909_v11 }
 0x254   : > { %9971 = vst [vmem:[#allocation108_spill] sm:$0xff] %v7565_v21  ;;  %9976 = vst [vmem:[#allocation109_spill] sm:$0xff] %v7571_v20  ;;  %v9985_v21 = vld [vmem:[#allocation319_spill] sm:$0xff] }
 0x255   : > { %v1987_v44 = vmax.f32 %v9985_v21, %v9984_v23  ;;  %v1997_v21 = vmax.f32 %v9991_v43, %v9990_v63  ;;  %v2004_v59 = vmax.f32 %v2003_v19, %v6927_v29  ;;  %v9998_v23 = vld [vmem:[#allocation333_spill] sm:$0xff] }
 0x256   : > { %1965 = vmax.xlane.f32.xlu1 %v1964_v3  ;;  %1960 = vmax.xlane.f32.xlu0 %v1959_v40  ;;  %v1984_v3 = vmax.f32 %v1983_v61, %v6863_v10  ;;  %v9988_v40 = vld [vmem:[#allocation321_spill] sm:$0xff]  ;;  %v1994_v10 = vmax.f32 %v1993_v39, %v6905_v37  ;;  %v9995_v61 = vld [vmem:[#allocation330_spill] sm:$0xff] }
 0x257   : > { %v7577_v50 = vpop.xlane.xlu1 %1615  ;;  %v7583_v30 = vpop.xlane.xlu0 %1610  ;;  %v1979_v47 = vmax.f32 %v1978_v56, %v9988_v40  ;;  %v1988_v38 = vmax.f32 %v1987_v44, %v9989_v7  ;;  %v1998_v31 = vmax.f32 %v1997_v21, %v9995_v61 }
 0x258   : > { %9981 = vst [vmem:[#allocation110_spill] sm:$0xff] %v7577_v50  ;;  %9986 = vst [vmem:[#allocation111_spill] sm:$0xff] %v7583_v30 }
 0x259   : > { %v1989_v60 = vmax.f32 %v1988_v38, %v9994_v51  ;;  %v1999_v44 = vmax.f32 %v1998_v31, %v9998_v23 }
 0x25a   : > { %1975 = vmax.xlane.f32.xlu1 %v1974_v4  ;;  %1970 = vmax.xlane.f32.xlu0 %v1969_v36 }
 0x25b   : > { %v7589_v62 = vpop.xlane.xlu1 %1625  ;;  %v7595_v57 = vpop.xlane.xlu0 %1620 }
 0x25c   : > { %9987 = vst [vmem:[#allocation112_spill] sm:$0xff] %v7589_v62  ;;  %9992 = vst [vmem:[#allocation113_spill] sm:$0xff] %v7595_v57 }
 0x25e   : > { %1985 = vmax.xlane.f32.xlu1 %v1984_v3  ;;  %1980 = vmax.xlane.f32.xlu0 %v1979_v47 }
 0x25f   : > { %v7599_v4 = vpop.xlane.xlu1 %1635  ;;  %v7603_v36 = vpop.xlane.xlu0 %1630 }
 0x260   : > { %9993 = vst [vmem:[#allocation114_spill] sm:$0xff] %v7599_v4  ;;  %9996 = vst [vmem:[#allocation115_spill] sm:$0xff] %v7603_v36 }
 0x262   : > { %1995 = vmax.xlane.f32.xlu1 %v1994_v10  ;;  %1990 = vmax.xlane.f32.xlu0 %v1989_v60 }
 0x263   : > { %v7606_v56 = vpop.xlane.xlu1 %1645  ;;  %v7609_v37 = vpop.xlane.xlu0 %1640 }
 0x264   : > { %9997 = vst [vmem:[#allocation116_spill] sm:$0xff] %v7606_v56  ;;  %9999 = vst [vmem:[#allocation117_spill] sm:$0xff] %v7609_v37 }
 0x266   : > { %2005 = vmax.xlane.f32.xlu1 %v2004_v59  ;;  %2000 = vmax.xlane.f32.xlu0 %v1999_v44 }
 0x267   : > { %v7611_v11 = vpop.xlane.xlu1 %1655  ;;  %v7613_v3 = vpop.xlane.xlu0 %1650 }
 0x268   : > { %10000 = vst [vmem:[#allocation118_spill] sm:$0xff] %v7611_v11  ;;  %10001 = vst [vmem:[#allocation119_spill] sm:$0xff] %v7613_v3 }
 0x26b   : > { %v7615_v39 = vpop.xlane.xlu1 %1665  ;;  %v7617_v15 = vpop.xlane.xlu0 %1660 }
 0x26c   : > { %10002 = vst [vmem:[#allocation120_spill] sm:$0xff] %v7615_v39  ;;  %10003 = vst [vmem:[#allocation121_spill] sm:$0xff] %v7617_v15 }
 0x26f   : > { %v7619_v40 = vpop.xlane.xlu1 %1675  ;;  %v7621_v29 = vpop.xlane.xlu0 %1670 }
 0x270   : > { %10004 = vst [vmem:[#allocation123_spill] sm:$0xff] %v7619_v40  ;;  %10005 = vst [vmem:[#allocation124_spill] sm:$0xff] %v7621_v29 }
 0x273   : > { %v7623_v47 = vpop.xlane.xlu1 %1685  ;;  %v7625_v7 = vpop.xlane.xlu0 %1680 }
 0x274   : > { %10006 = vst [vmem:[#allocation125_spill] sm:$0xff] %v7623_v47  ;;  %10007 = vst [vmem:[#allocation126_spill] sm:$0xff] %v7625_v7 }
 0x277   : > { %v7627_v38 = vpop.xlane.xlu1 %1695  ;;  %v7629_v63 = vpop.xlane.xlu0 %1690 }
 0x278   : > { %10008 = vst [vmem:[#allocation128_spill] sm:$0xff] %v7627_v38  ;;  %10009 = vst [vmem:[#allocation129_spill] sm:$0xff] %v7629_v63 }
 0x27b   : > { %v7631_v43 = vpop.xlane.xlu1 %1705  ;;  %v7633_v21 = vpop.xlane.xlu0 %1700 }
 0x27c   : > { %10010 = vst [vmem:[#allocation130_spill] sm:$0xff] %v7631_v43  ;;  %10011 = vst [vmem:[#allocation131_spill] sm:$0xff] %v7633_v21 }
 0x27f   : > { %v7635_v10 = vpop.xlane.xlu1 %1715  ;;  %v7637_v19 = vpop.xlane.xlu0 %1710 }
 0x280   : > { %10012 = vst [vmem:[#allocation132_spill] sm:$0xff] %v7635_v10  ;;  %10013 = vst [vmem:[#allocation133_spill] sm:$0xff] %v7637_v19 }
 0x283   : > { %v7639_v51 = vpop.xlane.xlu1 %1725  ;;  %v7641_v60 = vpop.xlane.xlu0 %1720 }
 0x284   : > { %10014 = vst [vmem:[#allocation135_spill] sm:$0xff] %v7639_v51  ;;  %10015 = vst [vmem:[#allocation136_spill] sm:$0xff] %v7641_v60 }
 0x287   : > { %v7643_v61 = vpop.xlane.xlu1 %1735  ;;  %v7645_v31 = vpop.xlane.xlu0 %1730 }
 0x288   : > { %10016 = vst [vmem:[#allocation138_spill] sm:$0xff] %v7643_v61  ;;  %10017 = vst [vmem:[#allocation139_spill] sm:$0xff] %v7645_v31 }
 0x28b   : > { %v7647_v59 = vpop.xlane.xlu1 %1745  ;;  %v7649_v23 = vpop.xlane.xlu0 %1740 }
 0x28c   : > { %10018 = vst [vmem:[#allocation140_spill] sm:$0xff] %v7647_v59  ;;  %10019 = vst [vmem:[#allocation142_spill] sm:$0xff] %v7649_v23 }
 0x28f   : > { %v7651_v44 = vpop.xlane.xlu1 %1755  ;;  %v7653_v43 = vpop.xlane.xlu0 %1750 }
 0x290   : > { %10020 = vst [vmem:[#allocation144_spill] sm:$0xff] %v7651_v44  ;;  %10021 = vst [vmem:[#allocation145_spill] sm:$0xff] %v7653_v43 }
 0x293   : > { %v7655_v47 = vpop.xlane.xlu1 %1765  ;;  %v7657_v10 = vpop.xlane.xlu0 %1760 }
 0x294   : > { %10022 = vst [vmem:[#allocation146_spill] sm:$0xff] %v7655_v47  ;;  %10023 = vst [vmem:[#allocation147_spill] sm:$0xff] %v7657_v10 }
 0x297   : > { %v7659_v19 = vpop.xlane.xlu1 %1775  ;;  %v7661_v51 = vpop.xlane.xlu0 %1770 }
 0x298   : > { %10024 = vst [vmem:[#allocation148_spill] sm:$0xff] %v7659_v19  ;;  %10025 = vst [vmem:[#allocation149_spill] sm:$0xff] %v7661_v51 }
 0x29b   : > { %v7663_v60 = vpop.xlane.xlu1 %1785  ;;  %v7665_v61 = vpop.xlane.xlu0 %1780 }
 0x29c   : > { %10026 = vst [vmem:[#allocation150_spill] sm:$0xff] %v7663_v60  ;;  %10027 = vst [vmem:[#allocation151_spill] sm:$0xff] %v7665_v61 }
 0x29f   : > { %v7667_v31 = vpop.xlane.xlu1 %1795  ;;  %v7669_v59 = vpop.xlane.xlu0 %1790 }
 0x2a0   : > { %10028 = vst [vmem:[#allocation152_spill] sm:$0xff] %v7667_v31  ;;  %10029 = vst [vmem:[#allocation153_spill] sm:$0xff] %v7669_v59 }
 0x2a3   : > { %v7671_v23 = vpop.xlane.xlu1 %1805  ;;  %v7673_v44 = vpop.xlane.xlu0 %1800 }
 0x2a4   : > { %10030 = vst [vmem:[#allocation155_spill] sm:$0xff] %v7671_v23  ;;  %10031 = vst [vmem:[#allocation156_spill] sm:$0xff] %v7673_v44 }
 0x2a7   : > { %v7675_v43 = vpop.xlane.xlu1 %1815  ;;  %v7677_v47 = vpop.xlane.xlu0 %1810 }
 0x2a8   : > { %10032 = vst [vmem:[#allocation158_spill] sm:$0xff] %v7675_v43  ;;  %10033 = vst [vmem:[#allocation159_spill] sm:$0xff] %v7677_v47 }
 0x2ab   : > { %v7679_v10 = vpop.xlane.xlu1 %1825  ;;  %v7681_v19 = vpop.xlane.xlu0 %1820 }
 0x2ac   : > { %10034 = vst [vmem:[#allocation160_spill] sm:$0xff] %v7679_v10  ;;  %10035 = vst [vmem:[#allocation122_spill] sm:$0xff] %v7681_v19 }
 0x2af   : > { %v7683_v51 = vpop.xlane.xlu1 %1835  ;;  %v7685_v60 = vpop.xlane.xlu0 %1830 }
 0x2b0   : > { %10036 = vst [vmem:[#allocation162_spill] sm:$0xff] %v7683_v51  ;;  %10037 = vst [vmem:[#allocation163_spill] sm:$0xff] %v7685_v60 }
 0x2b3   : > { %v7687_v61 = vpop.xlane.xlu1 %1845  ;;  %v7689_v31 = vpop.xlane.xlu0 %1840 }
 0x2b4   : > { %10038 = vst [vmem:[#allocation164_spill] sm:$0xff] %v7687_v61  ;;  %10039 = vst [vmem:[#allocation165_spill] sm:$0xff] %v7689_v31 }
 0x2b7   : > { %v7691_v59 = vpop.xlane.xlu1 %1855  ;;  %v7693_v23 = vpop.xlane.xlu0 %1850 }
 0x2b8   : > { %10040 = vst [vmem:[#allocation127_spill] sm:$0xff] %v7691_v59  ;;  %10041 = vst [vmem:[#allocation168_spill] sm:$0xff] %v7693_v23 }
 0x2bb   : > { %v7695_v44 = vpop.xlane.xlu1 %1865  ;;  %v7697_v43 = vpop.xlane.xlu0 %1860 }
 0x2bc   : > { %10042 = vst [vmem:[#allocation171_spill] sm:$0xff] %v7695_v44  ;;  %10043 = vst [vmem:[#allocation174_spill] sm:$0xff] %v7697_v43 }
 0x2bf   : > { %v7699_v47 = vpop.xlane.xlu1 %1875  ;;  %v7701_v10 = vpop.xlane.xlu0 %1870 }
 0x2c0   : > { %10044 = vst [vmem:[#allocation176_spill] sm:$0xff] %v7699_v47  ;;  %10045 = vst [vmem:[#allocation178_spill] sm:$0xff] %v7701_v10 }
 0x2c3   : > { %v7703_v19 = vpop.xlane.xlu1 %1885  ;;  %v7705_v51 = vpop.xlane.xlu0 %1880 }
 0x2c4   : > { %10046 = vst [vmem:[#allocation137_spill] sm:$0xff] %v7703_v19  ;;  %10047 = vst [vmem:[#allocation183_spill] sm:$0xff] %v7705_v51 }
 0x2c7   : > { %v7707_v60 = vpop.xlane.xlu1 %1895  ;;  %v7709_v61 = vpop.xlane.xlu0 %1890 }
 0x2c8   : > { %10048 = vst [vmem:[#allocation141_spill] sm:$0xff] %v7707_v60  ;;  %10049 = vst [vmem:[#allocation187_spill] sm:$0xff] %v7709_v61 }
 0x2cb   : > { %v7711_v31 = vpop.xlane.xlu1 %1905  ;;  %v7713_v59 = vpop.xlane.xlu0 %1900 }
 0x2cc   : > { %10050 = vst [vmem:[#allocation189_spill] sm:$0xff] %v7711_v31  ;;  %10051 = vst [vmem:[#allocation192_spill] sm:$0xff] %v7713_v59 }
 0x2cf   : > { %v7715_v23 = vpop.xlane.xlu1 %1915  ;;  %v7717_v44 = vpop.xlane.xlu0 %1910 }
 0x2d0   : > { %10052 = vst [vmem:[#allocation194_spill] sm:$0xff] %v7715_v23  ;;  %10053 = vst [vmem:[#allocation197_spill] sm:$0xff] %v7717_v44 }
 0x2d3   : > { %v7719_v43 = vpop.xlane.xlu1 %1925  ;;  %v7721_v47 = vpop.xlane.xlu0 %1920 }
 0x2d4   : > { %10054 = vst [vmem:[#allocation154_spill] sm:$0xff] %v7719_v43  ;;  %10055 = vst [vmem:[#allocation202_spill] sm:$0xff] %v7721_v47 }
 0x2d7   : > { %v7723_v10 = vpop.xlane.xlu1 %1935  ;;  %v7725_v19 = vpop.xlane.xlu0 %1930 }
 0x2d8   : > { %10056 = vst [vmem:[#allocation204_spill] sm:$0xff] %v7723_v10  ;;  %10057 = vst [vmem:[#allocation207_spill] sm:$0xff] %v7725_v19 }
 0x2db   : > { %v7727_v51 = vpop.xlane.xlu1 %1945  ;;  %v7729_v60 = vpop.xlane.xlu0 %1940 }
 0x2dc   : > { %10058 = vst [vmem:[#allocation210_spill] sm:$0xff] %v7727_v51  ;;  %10059 = vst [vmem:[#allocation212_spill] sm:$0xff] %v7729_v60 }
 0x2df   : > { %v7731_v61 = vpop.xlane.xlu1 %1955  ;;  %v7733_v31 = vpop.xlane.xlu0 %1950 }
 0x2e0   : > { %10060 = vst [vmem:[#allocation215_spill] sm:$0xff] %v7731_v61  ;;  %10061 = vst [vmem:[#allocation219_spill] sm:$0xff] %v7733_v31 }
 0x2e3   : > { %v7735_v59 = vpop.xlane.xlu1 %1965  ;;  %v7737_v23 = vpop.xlane.xlu0 %1960 }
 0x2e4   : > { %10062 = vst [vmem:[#allocation166_spill] sm:$0xff] %v7735_v59  ;;  %10063 = vst [vmem:[#allocation224_spill] sm:$0xff] %v7737_v23  ;;  %v4281_v59 = vmov (!%p3945_p11), 0.0  }
 0x2e5   : > { %2012 = vst.msk [vmem:[#allocation2] sm:$0xff] (!%p3945_p11), %vm2011_vm0, %v4281_v59  ;;  %2013 = vst.msk [vmem:[#allocation2 + $0x8] sm:$0xff] (!%p3945_p11), %vm2011_vm0, %v4281_v59 }
 0x2e7   : > { %v7739_v44 = vpop.xlane.xlu1 %1975  ;;  %v7741_v43 = vpop.xlane.xlu0 %1970 }
 0x2e8   : > { %10064 = vst [vmem:[#allocation227_spill] sm:$0xff] %v7739_v44  ;;  %10065 = vst [vmem:[#allocation205_spill] sm:$0xff] %v7741_v43  ;;  %v4282_v44 = vmov (!%p3945_p11), -inf  }
 0x2e9   : > { %2014 = vst.msk [vmem:[#allocation3] sm:$0xff] (!%p3945_p11), %vm2011_vm0, %v4282_v44  ;;  %2015 = vst.msk [vmem:[#allocation3 + $0x8] sm:$0xff] (!%p3945_p11), %vm2011_vm0, %v4282_v44 }
 0x2eb   : > { %v7743_v47 = vpop.xlane.xlu1 %1985  ;;  %v7745_v10 = vpop.xlane.xlu0 %1980 }
 0x2ec   : > { %10066 = vst [vmem:[#allocation203_spill] sm:$0xff] %v7743_v47  ;;  %10067 = vst [vmem:[#allocation208_spill] sm:$0xff] %v7745_v10 }
 0x2ee   : > { %2010 = sbr.rel (%p3945_p11) target bundleno = 757 (0x2f5), region = 44 }
 0x2ef   : > { %v7747_v19 = vpop.xlane.xlu1 %1995  ;;  %v7749_v51 = vpop.xlane.xlu0 %1990 }
 0x2f0   : > { %10068 = vst [vmem:[#allocation211_spill] sm:$0xff] %v7747_v19  ;;  %10069 = vst [vmem:[#allocation161_spill] sm:$0xff] %v7749_v51 }
 0x2f3   : > { %v7751_v60 = vpop.xlane.xlu1 %2005  ;;  %v7753_v61 = vpop.xlane.xlu0 %2000 }
 0x2f4   : > { %10070 = vst [vmem:[#allocation213_spill] sm:$0xff] %v7751_v60  ;;  %10071 = vst [vmem:[#allocation157_spill] sm:$0xff] %v7753_v61 }
 0x2f5 PF: > { %v2146_v47 = vlaneseq  ;;  %vm2157_vm1 = vcmask 130112   ;;  %vm2164_vm2 = vcmask 195712   ;;  %vm2171_vm3 = vcmask 261312   ;;  %v10072_v44 = vld [vmem:[#allocation170_spill] sm:$0xff]  ;;  %v10074_v11 = vld [vmem:[#allocation228_spill] sm:$0xff]  ;;  %v10090_v22 = vld [vmem:[#allocation195_spill] sm:$0xff] }
 0x2f6   : > { %vm2178_vm4 = vcmask 326912   ;;  %vm2185_vm5 = vcmask 392512   ;;  %vm2192_vm6 = vcmask 458112   ;;  %vm2199_vm7 = vcmask 523712   ;;  %v10081_v36 = vld [vmem:[#allocation182_spill] sm:$0xff]  ;;  %v10083_v57 = vld [vmem:[#allocation180_spill] sm:$0xff] }
 0x2f7   : > { %v2147_v10 = vand.u32 127, %v2146_v47  ;;  %v2149_v19 = vshrl.u32 %v2146_v47, 7  ;;  %v10082_v62 = vld [vmem:[#allocation186_spill] sm:$0xff]  ;;  %v10129_v49 = vld [vmem:[#allocation336_spill] sm:$0xff]  ;;  %v10161_v5 = vld [vmem:[#allocation43_spill] sm:$0xff]  ;;  %vm2786_vm8 = vcmask 1041409  }
 0x2f8   : > { %v10152_v0 = vld [vmem:[#allocation36_spill] sm:$0xff]  ;;  %vm2788_vm9 = vcmask 1042434   ;;  %vm2790_vm10 = vcmask 1043459   ;;  %vm2792_vm11 = vcmask 1044484   ;;  %vm2794_vm12 = vcmask 1045509   ;;  %p3946_p4 = scmp.ne.s32.totalorder %s4266_s15, 1 }
 0x2f9   : > { %v7756_v60 = vsub.s32 %v2147_v10, %v2149_v19  ;;  %v2152_v61 = vadd.s32 4294967288, %v2147_v10  ;;  %v2159_v51 = vadd.s32 4294967280, %v2147_v10  ;;  %v2166_v43 = vadd.s32 4294967272, %v2147_v10 }
 0x2fa   : > { %v2173_v23 = vadd.s32 4294967264, %v2147_v10  ;;  %v2180_v59 = vadd.s32 4294967256, %v2147_v10  ;;  %v2187_v31 = vadd.s32 4294967248, %v2147_v10  ;;  %v2194_v21 = vadd.s32 4294967240, %v2147_v10  ;;  %v10073_v10 = vld [vmem:[#allocation175_spill] sm:$0xff] }
 0x2fb   : > { %v2151_v38 = vrot.slane %v10072_v44, %v7756_v60  ;;  %v7760_v47 = vsub.s32 %v2152_v61, %v2149_v19  ;;  %v7762_v7 = vsub.s32 %v2159_v51, %v2149_v19  ;;  %v7764_v63 = vsub.s32 %v2166_v43, %v2149_v19  ;;  %v10075_v61 = vld [vmem:[#allocation172_spill] sm:$0xff]  ;;  %v10076_v43 = vld [vmem:[#allocation179_spill] sm:$0xff] }
 0x2fc   : > { %v7766_v40 = vsub.s32 %v2173_v23, %v2149_v19  ;;  %v7768_v56 = vsub.s32 %v2180_v59, %v2149_v19  ;;  %v7770_v29 = vsub.s32 %v2187_v31, %v2149_v19  ;;  %v7772_v39 = vsub.s32 %v2194_v21, %v2149_v19  ;;  %v10077_v23 = vld [vmem:[#allocation134_spill] sm:$0xff]  ;;  %v10078_v31 = vld [vmem:[#allocation173_spill] sm:$0xff] }
 0x2fd   : > { %v2156_v15 = vrot.slane %v10073_v10, %v7760_v47  ;;  %v2163_v44 = vrot.slane %v10074_v11, %v7762_v7  ;;  %v2170_v51 = vrot.slane %v10075_v61, %v7764_v63  ;;  %v2204_v3 = vrot.slane %v10076_v43, %v7756_v60  ;;  %v10079_v21 = vld [vmem:[#allocation181_spill] sm:$0xff] }
 0x2fe   : > { %v2177_v59 = vrot.slane %v10077_v23, %v7766_v40  ;;  %v2184_v37 = vrot.slane %v10078_v31, %v7768_v56  ;;  %v2191_v19 = vrot.slane %v10079_v21, %v7770_v29  ;;  %v10080_v10 = vld [vmem:[#allocation177_spill] sm:$0xff]  ;;  %v2208_v61 = vrot.slane %v10081_v36, %v7760_v47  ;;  %v10085_v21 = vld [vmem:[#allocation184_spill] sm:$0xff] }
 0x2ff   : > { %v2198_v4 = vrot.slane %v10080_v10, %v7772_v39  ;;  %v2158_v11 = vsel %vm2157_vm1, %v2156_v15, %v2151_v38  ;;  %v2213_v43 = vrot.slane %v10082_v62, %v7762_v7  ;;  %v2218_v23 = vrot.slane %v10083_v57, %v7764_v63  ;;  %v10084_v31 = vld [vmem:[#allocation185_spill] sm:$0xff]  ;;  %v10086_v10 = vld [vmem:[#allocation188_spill] sm:$0xff]  ;;  %v10087_v62 = vld [vmem:[#allocation143_spill] sm:$0xff] }
 0x300   : > { %v2165_v50 = vsel %vm2164_vm2, %v2163_v44, %v2158_v11  ;;  %v2223_v30 = vrot.slane %v10084_v31, %v7766_v40  ;;  %v2228_v20 = vrot.slane %v10085_v21, %v7768_v56  ;;  %v2233_v15 = vrot.slane %v10086_v10, %v7770_v29  ;;  %v10088_v57 = vld [vmem:[#allocation193_spill] sm:$0xff]  ;;  %v10089_v31 = vld [vmem:[#allocation190_spill] sm:$0xff] }
 0x301   : > { %v2172_v38 = vsel %vm2171_vm3, %v2170_v51, %v2165_v50  ;;  %v2209_v36 = vsel %vm2157_vm1, %v2208_v61, %v2204_v3  ;;  %v2238_v14 = vrot.slane %v10087_v62, %v7772_v39  ;;  %v2243_v42 = vrot.slane %v10088_v57, %v7756_v60  ;;  %v10091_v51 = vld [vmem:[#allocation191_spill] sm:$0xff]  ;;  %v10092_v62 = vld [vmem:[#allocation200_spill] sm:$0xff] }
 0x302   : > { %v2179_v44 = vsel %vm2178_vm4, %v2177_v59, %v2172_v38  ;;  %v2214_v11 = vsel %vm2164_vm2, %v2213_v43, %v2209_v36  ;;  %v2247_v21 = vrot.slane %v10089_v31, %v7760_v47  ;;  %v2252_v10 = vrot.slane %v10090_v22, %v7762_v7  ;;  %v10093_v36 = vld [vmem:[#allocation196_spill] sm:$0xff] }
 0x303   : > { %v2186_v50 = vsel %vm2185_vm5, %v2184_v37, %v2179_v44  ;;  %v2219_v3 = vsel %vm2171_vm3, %v2218_v23, %v2214_v11  ;;  %v2257_v61 = vrot.slane %v10091_v51, %v7764_v63  ;;  %v2262_v57 = vrot.slane %v10092_v62, %v7766_v40  ;;  %v10094_v44 = vld [vmem:[#allocation198_spill] sm:$0xff]  ;;  %v10098_v62 = vld [vmem:[#allocation217_spill] sm:$0xff] }
 0x304   : > { %v2193_v59 = vsel %vm2192_vm6, %v2191_v19, %v2186_v50  ;;  %v2224_v43 = vsel %vm2178_vm4, %v2223_v30, %v2219_v3  ;;  %v2248_v38 = vsel %vm2157_vm1, %v2247_v21, %v2243_v42  ;;  %v2267_v31 = vrot.slane %v10093_v36, %v7768_v56  ;;  %v10095_v30 = vld [vmem:[#allocation201_spill] sm:$0xff]  ;;  %v10096_v21 = vld [vmem:[#allocation206_spill] sm:$0xff] }
 0x305   : > { %v7828_v22 = vsel %vm2199_vm7, %v2198_v4, %v2193_v59  ;;  %v2229_v37 = vsel %vm2185_vm5, %v2228_v20, %v2224_v43  ;;  %v2253_v23 = vsel %vm2164_vm2, %v2252_v10, %v2248_v38  ;;  %v2272_v11 = vrot.slane %v10094_v44, %v7770_v29  ;;  %v10097_v10 = vld [vmem:[#allocation199_spill] sm:$0xff]  ;;  %v10100_v38 = vld [vmem:[#allocation226_spill] sm:$0xff]  ;;  %v10102_v44 = vld [vmem:[#allocation237_spill] sm:$0xff] }
 0x306   : > { %v2234_v51 = vsel %vm2192_vm6, %v2233_v15, %v2229_v37  ;;  %v2258_v19 = vsel %vm2171_vm3, %v2257_v61, %v2253_v23  ;;  %v2277_v42 = vrot.slane %v10095_v30, %v7772_v39  ;;  %v2282_v50 = vrot.slane %v10096_v21, %v7756_v60  ;;  %v10099_v61 = vld [vmem:[#allocation209_spill] sm:$0xff]  ;;  %v10101_v37 = vld [vmem:[#allocation222_spill] sm:$0xff] }
 0x307   : > { %v7841_v4 = vsel %vm2199_vm7, %v2238_v14, %v2234_v51  ;;  %v2263_v20 = vsel %vm2178_vm4, %v2262_v57, %v2258_v19  ;;  %v2286_v3 = vrot.slane %v10097_v10, %v7760_v47  ;;  %v2291_v59 = vrot.slane %v10098_v62, %v7762_v7  ;;  %v10103_v19 = vld [vmem:[#allocation233_spill] sm:$0xff]  ;;  %v10105_v62 = vld [vmem:[#allocation243_spill] sm:$0xff] }
 0x308   : > { %v2268_v15 = vsel %vm2185_vm5, %v2267_v31, %v2263_v20  ;;  %v2296_v43 = vrot.slane %v10099_v61, %v7764_v63  ;;  %v2301_v36 = vrot.slane %v10100_v38, %v7766_v40  ;;  %v2306_v14 = vrot.slane %v10101_v37, %v7768_v56  ;;  %v10104_v20 = vld [vmem:[#allocation247_spill] sm:$0xff] }
 0x309   : > { %v2273_v23 = vsel %vm2192_vm6, %v2272_v11, %v2268_v15  ;;  %v2287_v57 = vsel %vm2157_vm1, %v2286_v3, %v2282_v50  ;;  %v2311_v51 = vrot.slane %v10102_v44, %v7770_v29  ;;  %v2316_v30 = vrot.slane %v10103_v19, %v7772_v39  ;;  %v10106_v50 = vld [vmem:[#allocation257_spill] sm:$0xff]  ;;  %v10108_v37 = vld [vmem:[#allocation267_spill] sm:$0xff] }
 0x30a   : > { %v7862_v31 = vsel %vm2199_vm7, %v2277_v42, %v2273_v23  ;;  %v2292_v21 = vsel %vm2164_vm2, %v2291_v59, %v2287_v57  ;;  %v2321_v10 = vrot.slane %v10104_v20, %v7756_v60  ;;  %v2325_v61 = vrot.slane %v10105_v62, %v7760_v47  ;;  %v10107_v15 = vld [vmem:[#allocation253_spill] sm:$0xff]  ;;  %v10109_v57 = vld [vmem:[#allocation263_spill] sm:$0xff] }
 0x30b   : > { %v2297_v11 = vsel %vm2171_vm3, %v2296_v43, %v2292_v21  ;;  %v2330_v3 = vrot.slane %v10106_v50, %v7762_v7  ;;  %v2335_v38 = vrot.slane %v10107_v15, %v7764_v63  ;;  %v2340_v42 = vrot.slane %v10108_v37, %v7766_v40  ;;  %v10110_v19 = vld [vmem:[#allocation277_spill] sm:$0xff]  ;;  %v10112_v15 = vld [vmem:[#allocation287_spill] sm:$0xff] }
 0x30c   : > { %v2302_v23 = vsel %vm2178_vm4, %v2301_v36, %v2297_v11  ;;  %v2326_v59 = vsel %vm2157_vm1, %v2325_v61, %v2321_v10  ;;  %v2345_v44 = vrot.slane %v10109_v57, %v7768_v56  ;;  %v2350_v20 = vrot.slane %v10110_v19, %v7770_v29  ;;  %v10111_v62 = vld [vmem:[#allocation273_spill] sm:$0xff]  ;;  %v10113_v61 = vld [vmem:[#allocation283_spill] sm:$0xff] }
 0x30d   : > { %v2307_v43 = vsel %vm2185_vm5, %v2306_v14, %v2302_v23  ;;  %v2331_v21 = vsel %vm2164_vm2, %v2330_v3, %v2326_v59  ;;  %v2355_v50 = vrot.slane %v10111_v62, %v7772_v39  ;;  %v2360_v37 = vrot.slane %v10112_v15, %v7756_v60  ;;  %v10114_v57 = vld [vmem:[#allocation297_spill] sm:$0xff]  ;;  %v10116_v62 = vld [vmem:[#allocation307_spill] sm:$0xff] }
 0x30e   : > { %v2312_v36 = vsel %vm2192_vm6, %v2311_v51, %v2307_v43  ;;  %v2336_v10 = vsel %vm2171_vm3, %v2335_v38, %v2331_v21  ;;  %v2364_v11 = vrot.slane %v10113_v61, %v7760_v47  ;;  %v2369_v19 = vrot.slane %v10114_v57, %v7762_v7  ;;  %v10115_v23 = vld [vmem:[#allocation293_spill] sm:$0xff]  ;;  %v10117_v43 = vld [vmem:[#allocation303_spill] sm:$0xff] }
 0x30f   : > { %v7895_v14 = vsel %vm2199_vm7, %v2316_v30, %v2312_v36  ;;  %v2341_v3 = vsel %vm2178_vm4, %v2340_v42, %v2336_v10  ;;  %v2374_v59 = vrot.slane %v10115_v23, %v7764_v63  ;;  %v2379_v15 = vrot.slane %v10116_v62, %v7766_v40  ;;  %v10118_v61 = vld [vmem:[#allocation317_spill] sm:$0xff]  ;;  %v10120_v23 = vld [vmem:[#allocation323_spill] sm:$0xff] }
 0x310   : > { %v2346_v51 = vsel %vm2185_vm5, %v2345_v44, %v2341_v3  ;;  %v2365_v38 = vsel %vm2157_vm1, %v2364_v11, %v2360_v37  ;;  %v2384_v21 = vrot.slane %v10117_v43, %v7768_v56  ;;  %v2389_v57 = vrot.slane %v10118_v61, %v7770_v29  ;;  %v10119_v36 = vld [vmem:[#allocation313_spill] sm:$0xff]  ;;  %v10121_v11 = vld [vmem:[#allocation322_spill] sm:$0xff]  ;;  %v10122_v43 = vld [vmem:[#allocation328_spill] sm:$0xff] }
 0x311   : > { %v2351_v30 = vsel %vm2192_vm6, %v2350_v20, %v2346_v51  ;;  %v2370_v42 = vsel %vm2164_vm2, %v2369_v19, %v2365_v38  ;;  %v2394_v10 = vrot.slane %v10119_v36, %v7772_v39  ;;  %v2399_v62 = vrot.slane %v10120_v23, %v7756_v60  ;;  %v10123_v19 = vld [vmem:[#allocation327_spill] sm:$0xff]  ;;  %v10124_v38 = vld [vmem:[#allocation332_spill] sm:$0xff] }
 0x312   : > { %v7915_v44 = vsel %vm2199_vm7, %v2355_v50, %v2351_v30  ;;  %v2375_v37 = vsel %vm2171_vm3, %v2374_v59, %v2370_v42  ;;  %v2403_v3 = vrot.slane %v10121_v11, %v7760_v47  ;;  %v2408_v61 = vrot.slane %v10122_v43, %v7762_v7  ;;  %v10125_v23 = vld [vmem:[#allocation331_spill] sm:$0xff]  ;;  %v10127_v43 = vld [vmem:[#allocation334_spill] sm:$0xff] }
 0x313   : > { %v2380_v20 = vsel %vm2178_vm4, %v2379_v15, %v2375_v37  ;;  %v2413_v51 = vrot.slane %v10123_v19, %v7764_v63  ;;  %v2418_v36 = vrot.slane %v10124_v38, %v7766_v40  ;;  %v2423_v50 = vrot.slane %v10125_v23, %v7768_v56  ;;  %v10126_v42 = vld [vmem:[#allocation335_spill] sm:$0xff]  ;;  %v10128_v19 = vld [vmem:[#allocation337_spill] sm:$0xff] }
 0x314   : > { %v2385_v30 = vsel %vm2185_vm5, %v2384_v21, %v2380_v20  ;;  %v2404_v59 = vsel %vm2157_vm1, %v2403_v3, %v2399_v62  ;;  %v2428_v11 = vrot.slane %v10126_v42, %v7770_v29  ;;  %v2433_v17 = vrot.slane %v10127_v43, %v7772_v39  ;;  %v10130_v3 = vld [vmem:[#allocation19_spill] sm:$0xff]  ;;  %v10131_v42 = vld [vmem:[#allocation20_spill] sm:$0xff] }
 0x315   : > { %v2390_v15 = vsel %vm2192_vm6, %v2389_v57, %v2385_v30  ;;  %v2409_v37 = vsel %vm2164_vm2, %v2408_v61, %v2404_v59  ;;  %v2438_v38 = vrot.slane %v10128_v19, %v7756_v60  ;;  %v2442_v23 = vrot.slane %v10129_v49, %v7760_v47  ;;  %v10132_v30 = vld [vmem:[#allocation15_spill] sm:$0xff]  ;;  %v10133_v49 = vld [vmem:[#allocation16_spill] sm:$0xff] }
 0x316   : > { %v7942_v21 = vsel %vm2199_vm7, %v2394_v10, %v2390_v15  ;;  %v2414_v62 = vsel %vm2171_vm3, %v2413_v51, %v2409_v37  ;;  %v2447_v20 = vrot.slane %v10130_v3, %v7762_v7  ;;  %v2452_v43 = vrot.slane %v10131_v42, %v7764_v63  ;;  %v10134_v15 = vld [vmem:[#allocation17_spill] sm:$0xff]  ;;  %v10135_v3 = vld [vmem:[#allocation18_spill] sm:$0xff] }
 0x317   : > { %v2419_v57 = vsel %vm2178_vm4, %v2418_v36, %v2414_v62  ;;  %v2443_v61 = vsel %vm2157_vm1, %v2442_v23, %v2438_v38  ;;  %v2457_v59 = vrot.slane %v10132_v30, %v7766_v40  ;;  %v2462_v19 = vrot.slane %v10133_v49, %v7768_v56  ;;  %v10136_v23 = vld [vmem:[#allocation13_spill] sm:$0xff]  ;;  %v10137_v30 = vld [vmem:[#allocation14_spill] sm:$0xff] }
 0x318   : > { %v2424_v10 = vsel %vm2185_vm5, %v2423_v50, %v2419_v57  ;;  %v2448_v51 = vsel %vm2164_vm2, %v2447_v20, %v2443_v61  ;;  %v2467_v37 = vrot.slane %v10134_v15, %v7770_v29  ;;  %v2472_v42 = vrot.slane %v10135_v3, %v7772_v39  ;;  %v10138_v57 = vld [vmem:[#allocation21_spill] sm:$0xff]  ;;  %v10139_v15 = vld [vmem:[#allocation23_spill] sm:$0xff] }
 0x319   : > { %v2429_v36 = vsel %vm2192_vm6, %v2428_v11, %v2424_v10  ;;  %v2453_v38 = vsel %vm2171_vm3, %v2452_v43, %v2448_v51  ;;  %v2477_v62 = vrot.slane %v10136_v23, %v7756_v60  ;;  %v2481_v49 = vrot.slane %v10137_v30, %v7760_v47  ;;  %v10140_v10 = vld [vmem:[#allocation22_spill] sm:$0xff]  ;;  %v10141_v23 = vld [vmem:[#allocation24_spill] sm:$0xff] }
 0x31a   : > { %v7968_v50 = vsel %vm2199_vm7, %v2433_v17, %v2429_v36  ;;  %v2458_v20 = vsel %vm2178_vm4, %v2457_v59, %v2453_v38  ;;  %v2486_v61 = vrot.slane %v10138_v57, %v7762_v7  ;;  %v2491_v3 = vrot.slane %v10139_v15, %v7764_v63  ;;  %v10142_v36 = vld [vmem:[#allocation25_spill] sm:$0xff]  ;;  %v10143_v57 = vld [vmem:[#allocation27_spill] sm:$0xff] }
 0x31b   : > { %v2463_v11 = vsel %vm2185_vm5, %v2462_v19, %v2458_v20  ;;  %v2482_v43 = vsel %vm2157_vm1, %v2481_v49, %v2477_v62  ;;  %v2496_v51 = vrot.slane %v10140_v10, %v7766_v40  ;;  %v2501_v30 = vrot.slane %v10141_v23, %v7768_v56  ;;  %v10144_v49 = vld [vmem:[#allocation26_spill] sm:$0xff]  ;;  %v10145_v10 = vld [vmem:[#allocation28_spill] sm:$0xff] }
 0x31c   : > { %v2468_v17 = vsel %vm2192_vm6, %v2467_v37, %v2463_v11  ;;  %v2487_v59 = vsel %vm2164_vm2, %v2486_v61, %v2482_v43  ;;  %v2506_v38 = vrot.slane %v10142_v36, %v7770_v29  ;;  %v2511_v15 = vrot.slane %v10143_v57, %v7772_v39  ;;  %v10146_v61 = vld [vmem:[#allocation29_spill] sm:$0xff]  ;;  %v10147_v43 = vld [vmem:[#allocation30_spill] sm:$0xff]  ;;  %v10148_v57 = vld [vmem:[#allocation32_spill] sm:$0xff] }
 0x31d   : > { %v7988_v19 = vsel %vm2199_vm7, %v2472_v42, %v2468_v17  ;;  %v2492_v62 = vsel %vm2171_vm3, %v2491_v3, %v2487_v59  ;;  %v2516_v20 = vrot.slane %v10144_v49, %v7756_v60  ;;  %v2520_v23 = vrot.slane %v10145_v10, %v7760_v47  ;;  %v10149_v59 = vld [vmem:[#allocation31_spill] sm:$0xff]  ;;  %v10150_v10 = vld [vmem:[#allocation34_spill] sm:$0xff] }
 0x31e   : > { %v2497_v37 = vsel %vm2178_vm4, %v2496_v51, %v2492_v62  ;;  %v2525_v11 = vrot.slane %v10146_v61, %v7762_v7  ;;  %v2530_v36 = vrot.slane %v10147_v43, %v7764_v63  ;;  %v2535_v42 = vrot.slane %v10148_v57, %v7766_v40  ;;  %v10151_v61 = vld [vmem:[#allocation33_spill] sm:$0xff] }
 0x31f   : > { %v2502_v17 = vsel %vm2185_vm5, %v2501_v30, %v2497_v37  ;;  %v2521_v3 = vsel %vm2157_vm1, %v2520_v23, %v2516_v20  ;;  %v2540_v49 = vrot.slane %v10149_v59, %v7768_v56  ;;  %v2545_v35 = vrot.slane %v10150_v10, %v7770_v29  ;;  %v10153_v23 = vld [vmem:[#allocation35_spill] sm:$0xff]  ;;  %v10154_v59 = vld [vmem:[#allocation38_spill] sm:$0xff] }
 0x320   : > { %v2507_v51 = vsel %vm2192_vm6, %v2506_v38, %v2502_v17  ;;  %v2526_v62 = vsel %vm2164_vm2, %v2525_v11, %v2521_v3  ;;  %v2550_v43 = vrot.slane %v10151_v61, %v7772_v39  ;;  %v2555_v57 = vrot.slane %v10152_v0, %v7756_v60  ;;  %v10155_v11 = vld [vmem:[#allocation37_spill] sm:$0xff]  ;;  %v10156_v3 = vld [vmem:[#allocation39_spill] sm:$0xff]  ;;  %v10157_v0 = vld [vmem:[#allocation40_spill] sm:$0xff] }
 0x321   : > { %v8015_v30 = vsel %vm2199_vm7, %v2511_v15, %v2507_v51  ;;  %v2531_v20 = vsel %vm2171_vm3, %v2530_v36, %v2526_v62  ;;  %v2559_v37 = vrot.slane %v10153_v23, %v7760_v47  ;;  %v2564_v10 = vrot.slane %v10154_v59, %v7762_v7  ;;  %v10158_v62 = vld [vmem:[#allocation42_spill] sm:$0xff]  ;;  %v10159_v59 = vld [vmem:[#allocation41_spill] sm:$0xff] }
 0x322   : > { %v2536_v38 = vsel %vm2178_vm4, %v2535_v42, %v2531_v20  ;;  %v2569_v17 = vrot.slane %v10155_v11, %v7764_v63  ;;  %v2574_v61 = vrot.slane %v10156_v3, %v7766_v40  ;;  %v2579_v15 = vrot.slane %v10157_v0, %v7768_v56  ;;  %v10160_v11 = vld [vmem:[#allocation44_spill] sm:$0xff] }
 0x323   : > { %v2541_v51 = vsel %vm2185_vm5, %v2540_v49, %v2536_v38  ;;  %v2560_v36 = vsel %vm2157_vm1, %v2559_v37, %v2555_v57  ;;  %v2584_v23 = vrot.slane %v10158_v62, %v7770_v29  ;;  %v2589_v34 = vrot.slane %v10159_v59, %v7772_v39  ;;  %v10162_v37 = vld [vmem:[#allocation46_spill] sm:$0xff]  ;;  %v10163_v62 = vld [vmem:[#allocation45_spill] sm:$0xff] }
 0x324   : > { %v2546_v42 = vsel %vm2192_vm6, %v2545_v35, %v2541_v51  ;;  %v2565_v20 = vsel %vm2164_vm2, %v2564_v10, %v2560_v36  ;;  %v2594_v3 = vrot.slane %v10160_v11, %v7756_v60  ;;  %v2598_v0 = vrot.slane %v10161_v5, %v7760_v47  ;;  %v10164_v51 = vld [vmem:[#allocation48_spill] sm:$0xff]  ;;  %v10165_v5 = vld [vmem:[#allocation47_spill] sm:$0xff] }
 0x325   : > { %v8042_v49 = vsel %vm2199_vm7, %v2550_v43, %v2546_v42  ;;  %v2570_v57 = vsel %vm2171_vm3, %v2569_v17, %v2565_v20  ;;  %v2603_v38 = vrot.slane %v10162_v37, %v7762_v7  ;;  %v2608_v59 = vrot.slane %v10163_v62, %v7764_v63  ;;  %v10166_v42 = vld [vmem:[#allocation50_spill] sm:$0xff]  ;;  %v10167_v37 = vld [vmem:[#allocation49_spill] sm:$0xff] }
 0x326   : > { %v2575_v35 = vsel %vm2178_vm4, %v2574_v61, %v2570_v57  ;;  %v2599_v10 = vsel %vm2157_vm1, %v2598_v0, %v2594_v3  ;;  %v2613_v36 = vrot.slane %v10164_v51, %v7766_v40  ;;  %v2618_v11 = vrot.slane %v10165_v5, %v7768_v56  ;;  %v10168_v0 = vld [vmem:[#allocation52_spill] sm:$0xff]  ;;  %v10169_v51 = vld [vmem:[#allocation51_spill] sm:$0xff] }
 0x327   : > { %v2580_v43 = vsel %vm2185_vm5, %v2579_v15, %v2575_v35  ;;  %v2604_v17 = vsel %vm2164_vm2, %v2603_v38, %v2599_v10  ;;  %v2623_v20 = vrot.slane %v10166_v42, %v7770_v29  ;;  %v2628_v62 = vrot.slane %v10167_v37, %v7772_v39  ;;  %v10170_v35 = vld [vmem:[#allocation54_spill] sm:$0xff]  ;;  %v10171_v42 = vld [vmem:[#allocation53_spill] sm:$0xff] }
 0x328   : > { %v2585_v61 = vsel %vm2192_vm6, %v2584_v23, %v2580_v43  ;;  %v2609_v3 = vsel %vm2171_vm3, %v2608_v59, %v2604_v17  ;;  %v2633_v57 = vrot.slane %v10168_v0, %v7756_v60  ;;  %v2637_v5 = vrot.slane %v10169_v51, %v7760_v47  ;;  %v10172_v43 = vld [vmem:[#allocation56_spill] sm:$0xff]  ;;  %v10173_v0 = vld [vmem:[#allocation55_spill] sm:$0xff] }
 0x329   : > { %v8068_v15 = vsel %vm2199_vm7, %v2589_v34, %v2585_v61  ;;  %v2614_v38 = vsel %vm2178_vm4, %v2613_v36, %v2609_v3  ;;  %v2642_v10 = vrot.slane %v10170_v35, %v7762_v7  ;;  %v2647_v37 = vrot.slane %v10171_v42, %v7764_v63  ;;  %v10174_v61 = vld [vmem:[#allocation58_spill] sm:$0xff]  ;;  %v10175_v35 = vld [vmem:[#allocation57_spill] sm:$0xff] }
 0x32a   : > { %v2619_v23 = vsel %vm2185_vm5, %v2618_v11, %v2614_v38  ;;  %v2638_v59 = vsel %vm2157_vm1, %v2637_v5, %v2633_v57  ;;  %v2652_v17 = vrot.slane %v10172_v43, %v7766_v40  ;;  %v2657_v51 = vrot.slane %v10173_v0, %v7768_v56  ;;  %v10176_v5 = vld [vmem:[#allocation60_spill] sm:$0xff]  ;;  %v10177_v43 = vld [vmem:[#allocation59_spill] sm:$0xff] }
 0x32b   : > { %v2624_v34 = vsel %vm2192_vm6, %v2623_v20, %v2619_v23  ;;  %v2643_v36 = vsel %vm2164_vm2, %v2642_v10, %v2638_v59  ;;  %v2662_v3 = vrot.slane %v10174_v61, %v7770_v29  ;;  %v2667_v42 = vrot.slane %v10175_v35, %v7772_v39  ;;  %v10178_v10 = vld [vmem:[#allocation62_spill] sm:$0xff]  ;;  %v10179_v59 = vld [vmem:[#allocation61_spill] sm:$0xff]  ;;  %v10181_v35 = vld [vmem:[#allocation63_spill] sm:$0xff] }
 0x32c   : > { %v8088_v11 = vsel %vm2199_vm7, %v2628_v62, %v2624_v34  ;;  %v2648_v57 = vsel %vm2171_vm3, %v2647_v37, %v2643_v36  ;;  %v2672_v38 = vrot.slane %v10176_v5, %v7756_v60  ;;  %v2676_v0 = vrot.slane %v10177_v43, %v7760_v47  ;;  %v10180_v62 = vld [vmem:[#allocation64_spill] sm:$0xff]  ;;  %v10182_v43 = vld [vmem:[#allocation66_spill] sm:$0xff] }
 0x32d   : > { %v2653_v20 = vsel %vm2178_vm4, %v2652_v17, %v2648_v57  ;;  %v2681_v23 = vrot.slane %v10178_v10, %v7762_v7  ;;  %v2686_v61 = vrot.slane %v10179_v59, %v7764_v63  ;;  %v2691_v34 = vrot.slane %v10180_v62, %v7766_v40  ;;  %v10183_v59 = vld [vmem:[#allocation65_spill] sm:$0xff]  ;;  %v10184_v62 = vld [vmem:[#allocation68_spill] sm:$0xff] }
 0x32e   : > { %v2658_v37 = vsel %vm2185_vm5, %v2657_v51, %v2653_v20  ;;  %v2677_v36 = vsel %vm2157_vm1, %v2676_v0, %v2672_v38  ;;  %v2696_v5 = vrot.slane %v10181_v35, %v7768_v56  ;;  %v2701_v17 = vrot.slane %v10182_v43, %v7770_v29  ;;  %v10185_v0 = vld [vmem:[#allocation67_spill] sm:$0xff]  ;;  %v10186_v35 = vld [vmem:[#allocation70_spill] sm:$0xff] }
 0x32f   : > { %v2663_v57 = vsel %vm2192_vm6, %v2662_v3, %v2658_v37  ;;  %v2682_v10 = vsel %vm2164_vm2, %v2681_v23, %v2677_v36  ;;  %v2706_v26 = vrot.slane %v10183_v59, %v7772_v39  ;;  %v2711_v33 = vrot.slane %v10184_v62, %v7756_v60  ;;  %v10187_v23 = vld [vmem:[#allocation69_spill] sm:$0xff]  ;;  %v10188_v36 = vld [vmem:[#allocation72_spill] sm:$0xff]  ;;  %v10189_v62 = vld [vmem:[#allocation71_spill] sm:$0xff] }
 0x330   : > { %v2668_v51 = vsel %vm2199_vm7, %v2667_v42, %v2663_v57  ;;  %v2687_v38 = vsel %vm2171_vm3, %v2686_v61, %v2682_v10  ;;  %v2715_v20 = vrot.slane %v10185_v0, %v7760_v47  ;;  %v2720_v43 = vrot.slane %v10186_v35, %v7762_v7  ;;  %v10190_v10 = vld [vmem:[#allocation74_spill] sm:$0xff]  ;;  %v10191_v35 = vld [vmem:[#allocation73_spill] sm:$0xff] }
 0x331   : > { %v2692_v3 = vsel %vm2178_vm4, %v2691_v34, %v2687_v38  ;;  %v2725_v37 = vrot.slane %v10187_v23, %v7764_v63  ;;  %v2730_v59 = vrot.slane %v10188_v36, %v7766_v40  ;;  %v2735_v42 = vrot.slane %v10189_v62, %v7768_v56  ;;  %v10192_v36 = vld [vmem:[#allocation76_spill] sm:$0xff]  ;;  %v10193_v62 = vld [vmem:[#allocation75_spill] sm:$0xff] }
 0x332   : > { %vm2796_vm13 = vcmask 1046534   ;;  %v2697_v61 = vsel %vm2185_vm5, %v2696_v5, %v2692_v3  ;;  %v2716_v57 = vsel %vm2157_vm1, %v2715_v20, %v2711_v33  ;;  %v2740_v0 = vrot.slane %v10190_v10, %v7770_v29  ;;  %v10194_v20 = vld [vmem:[#allocation78_spill] sm:$0xff]  ;;  %v10195_v10 = vld [vmem:[#allocation77_spill] sm:$0xff] }
 0x333   : > { %v2745_v34 = vrot.slane %v10191_v35, %v7772_v39  ;;  %v2702_v38 = vsel %vm2192_vm6, %v2701_v17, %v2697_v61  ;;  %v2721_v23 = vsel %vm2164_vm2, %v2720_v43, %v2716_v57  ;;  %v2750_v16 = vrot.slane %v10192_v36, %v7756_v60  ;;  %v10196_v61 = vld [vmem:[#allocation80_spill] sm:$0xff]  ;;  %v10197_v36 = vld [vmem:[#allocation79_spill] sm:$0xff] }
 0x334   : > { %v2754_v2 = vrot.slane %v10193_v62, %v7760_v47  ;;  %v2707_v5 = vsel %vm2199_vm7, %v2706_v26, %v2702_v38  ;;  %v2726_v33 = vsel %vm2171_vm3, %v2725_v37, %v2721_v23  ;;  %v2759_v3 = vrot.slane %v10194_v20, %v7762_v7  ;;  %v10198_v23 = vld [vmem:[#allocation81_spill] sm:$0xff] }
 0x335   : > { %v2764_v35 = vrot.slane %v10195_v10, %v7764_v63  ;;  %v2731_v17 = vsel %vm2178_vm4, %v2730_v59, %v2726_v33  ;;  %v2769_v57 = vrot.slane %v10196_v61, %v7766_v40  ;;  %v2774_v62 = vrot.slane %v10197_v36, %v7768_v56 }
 0x336   : > { %v2755_v43 = vsel %vm2157_vm1, %v2754_v2, %v2750_v16  ;;  %v2736_v26 = vsel %vm2185_vm5, %v2735_v42, %v2731_v17  ;;  %v2779_v38 = vrot.slane %v7293_v54, %v7770_v29  ;;  %v2784_v20 = vrot.slane %v10198_v23, %v7772_v39 }
 0x337   : > { %v2760_v37 = vsel %vm2164_vm2, %v2759_v3, %v2755_v43  ;;  %v2741_v59 = vsel %vm2192_vm6, %v2740_v0, %v2736_v26  ;;  %v2787_v16 = vsel %vm2786_vm8, %v7841_v4, %v7828_v22  ;;  %vm2798_vm14 = vcmask 1047559   ;;  %v2017_v43 = vld [vmem:[#allocation2 + $0x8] sm:$0xff] }
 0x338   : > { %v2765_v2 = vsel %vm2171_vm3, %v2764_v35, %v2760_v37  ;;  %v2746_v33 = vsel %vm2199_vm7, %v2745_v34, %v2741_v59  ;;  %v2789_v3 = vsel %vm2788_vm9, %v7862_v31, %v2787_v16  ;;  %v2800_v54 = vsel %vm2786_vm8, %v8042_v49, %v8015_v30  ;;  %v2016_v49 = vld [vmem:[#allocation2] sm:$0xff] }
 0x339   : > { %v2770_v42 = vsel %vm2178_vm4, %v2769_v57, %v2765_v2  ;;  %v2791_v10 = vsel %vm2790_vm10, %v7895_v14, %v2789_v3  ;;  %v2801_v22 = vsel %vm2788_vm9, %v8068_v15, %v2800_v54  ;;  %vm2811_vm15 = vcmask 523264  }
 0x33a   : > { %v2775_v0 = vsel %vm2185_vm5, %v2774_v62, %v2770_v42  ;;  %v2793_v34 = vsel %vm2792_vm11, %v7915_v44, %v2791_v10  ;;  %v2802_v31 = vsel %vm2790_vm10, %v8088_v11, %v2801_v22  ;;  %v2947_v30 = vrot.slane %v7303_v8, %v7756_v60  ;;  %v10201_v10 = vld [vmem:[#allocation85_spill] sm:$0xff]  ;;  %v10202_v22 = vld [vmem:[#allocation87_spill] sm:$0xff] }
 0x33b   : > { %v2780_v4 = vsel %vm2192_vm6, %v2779_v38, %v2775_v0  ;;  %v2795_v14 = vsel %vm2794_vm12, %v7942_v21, %v2793_v34  ;;  %v2803_v15 = vsel %vm2792_vm11, %v2668_v51, %v2802_v31  ;;  %v2951_v17 = vrot.slane %v7301_v53, %v7760_v47  ;;  %v10203_v31 = vld [vmem:[#allocation86_spill] sm:$0xff] }
 0x33c   : > { %v2785_v35 = vsel %vm2199_vm7, %v2784_v20, %v2780_v4  ;;  %v2797_v44 = vsel %vm2796_vm13, %v7968_v50, %v2795_v14  ;;  %v2804_v11 = vsel %vm2794_vm12, %v2707_v5, %v2803_v15  ;;  %v2956_v8 = vrot.slane %v7313_v45, %v7762_v7 }
 0x33d   : > { %v2961_v61 = vrot.slane %v7311_v52, %v7764_v63  ;;  %v2799_v21 = vsel %vm2798_vm14, %v7988_v19, %v2797_v44  ;;  %v2805_v51 = vsel %vm2796_vm13, %v2746_v33, %v2804_v11  ;;  %v2952_v57 = vsel %vm2157_vm1, %v2951_v17, %v2947_v30  ;;  %v10205_v17 = vld [vmem:[#allocation88_spill] sm:$0xff]  ;;  %v10206_v44 = vld [vmem:[#allocation91_spill] sm:$0xff] }
 0x33e   : > { %v2966_v53 = vrot.slane %v7323_v27, %v7766_v40  ;;  %v2806_v50 = vsel %vm2798_vm14, %v2785_v35, %v2805_v51  ;;  %v2809_v36 = vadd.f32 %v2799_v21, %v2016_v49  ;;  %v2957_v5 = vsel %vm2164_vm2, %v2956_v8, %v2952_v57  ;;  %v10204_v49 = vld [vmem:[#allocation89_spill] sm:$0xff]  ;;  %v10208_v57 = vld [vmem:[#allocation90_spill] sm:$0xff] }
 0x33f   : > { %v2971_v45 = vrot.slane %v7321_v18, %v7768_v56  ;;  %v2810_v62 = vadd.f32 %v2806_v50, %v2017_v43  ;;  %v2962_v52 = vsel %vm2171_vm3, %v2961_v61, %v2957_v5  ;;  %v2976_v19 = vrot.slane %v7333_v28, %v7770_v29  ;;  %v10207_v61 = vld [vmem:[#allocation84_spill] sm:$0xff] }
 0x340   : > { %2812 = vst.msk [vmem:[#allocation2] sm:$0xff] %vm2811_vm15, %v2809_v36  ;;  %v2967_v26 = vsel %vm2178_vm4, %v2966_v53, %v2962_v52  ;;  %v2986_v27 = vrot.slane %v7343_v55, %v7756_v60  ;;  %v2990_v37 = vrot.slane %v7341_v25, %v7760_v47  ;;  %v2995_v38 = vrot.slane %v7353_v1, %v7762_v7 }
 0x341   : > { %2813 = vst.msk [vmem:[#allocation2 + $0x8] sm:$0xff] %vm2811_vm15, %v2810_v62  ;;  %v2972_v18 = vsel %vm2185_vm5, %v2971_v45, %v2967_v26  ;;  %v3000_v28 = vrot.slane %v7351_v46, %v7764_v63  ;;  %v3005_v23 = vrot.slane %v7363_v41, %v7766_v40  ;;  %v2981_v55 = vrot.slane %v7331_v12, %v7772_v39  ;;  %v10209_v45 = vld [vmem:[#allocation95_spill] sm:$0xff] }
 0x342   : > { %v2977_v20 = vsel %vm2192_vm6, %v2976_v19, %v2972_v18  ;;  %v2991_v25 = vsel %vm2157_vm1, %v2990_v37, %v2986_v27  ;;  %v3010_v1 = vrot.slane %v7361_v48, %v7768_v56  ;;  %v3015_v2 = vrot.slane %v7373_v24, %v7770_v29  ;;  %v10199_v24 = vld [vmem:[#allocation82_spill] sm:$0xff]  ;;  %v10210_v19 = vld [vmem:[#allocation93_spill] sm:$0xff] }
 0x343   : > { %v2996_v59 = vsel %vm2164_vm2, %v2995_v38, %v2991_v25  ;;  %v3025_v46 = vrot.slane %v7383_v58, %v7756_v60  ;;  %v3029_v41 = vrot.slane %v7381_v6, %v7760_v47  ;;  %v3034_v12 = vrot.slane %v7393_v32, %v7762_v7  ;;  %v10200_v6 = vld [vmem:[#allocation83_spill] sm:$0xff]  ;;  %v10211_v27 = vld [vmem:[#allocation94_spill] sm:$0xff]  ;;  %v10212_v38 = vld [vmem:[#allocation97_spill] sm:$0xff] }
 0x344   : > { %v3001_v16 = vsel %vm2171_vm3, %v3000_v28, %v2996_v59  ;;  %v3039_v33 = vrot.slane %v7391_v9, %v7764_v63  ;;  %v3044_v48 = vrot.slane %v7403_v13, %v7766_v40  ;;  %v3020_v3 = vrot.slane %v10199_v24, %v7772_v39  ;;  %v10218_v24 = vld [vmem:[#allocation103_spill] sm:$0xff] }
 0x345   : > { %v3006_v42 = vsel %vm2178_vm4, %v3005_v23, %v3001_v16  ;;  %v3030_v58 = vsel %vm2157_vm1, %v3029_v41, %v3025_v46  ;;  %v3049_v54 = vrot.slane %v10200_v6, %v7768_v56  ;;  %v3054_v9 = vrot.slane %v10201_v10, %v7770_v29  ;;  %v10213_v23 = vld [vmem:[#allocation92_spill] sm:$0xff]  ;;  %v10216_v16 = vld [vmem:[#allocation98_spill] sm:$0xff] }
 0x346   : > { %v3011_v0 = vsel %vm2185_vm5, %v3010_v1, %v3006_v42  ;;  %v3035_v32 = vsel %vm2164_vm2, %v3034_v12, %v3030_v58  ;;  %v3064_v13 = vrot.slane %v10202_v22, %v7756_v60  ;;  %v3068_v30 = vrot.slane %v10203_v31, %v7760_v47  ;;  %v10215_v1 = vld [vmem:[#allocation99_spill] sm:$0xff]  ;;  %v10219_v58 = vld [vmem:[#allocation102_spill] sm:$0xff] }
 0x347   : > { %v3016_v4 = vsel %vm2192_vm6, %v3015_v2, %v3011_v0  ;;  %v3040_v34 = vsel %vm2171_vm3, %v3039_v33, %v3035_v32  ;;  %v3073_v35 = vrot.slane %v10204_v49, %v7762_v7  ;;  %v8260_v14 = vsel %vm2199_vm7, %v2981_v55, %v2977_v20  ;;  %v10214_v55 = vld [vmem:[#allocation96_spill] sm:$0xff]  ;;  %v10220_v32 = vld [vmem:[#allocation105_spill] sm:$0xff] }
 0x348   : > { %v3045_v15 = vsel %vm2178_vm4, %v3044_v48, %v3040_v34  ;;  %v3078_v43 = vrot.slane %v10205_v17, %v7764_v63  ;;  %v3083_v11 = vrot.slane %v10206_v44, %v7766_v40  ;;  %v3059_v21 = vrot.slane %v10207_v61, %v7772_v39  ;;  %v10217_v48 = vld [vmem:[#allocation101_spill] sm:$0xff]  ;;  %v10222_v34 = vld [vmem:[#allocation107_spill] sm:$0xff] }
 0x349   : > { %v3050_v8 = vsel %vm2185_vm5, %v3049_v54, %v3045_v15  ;;  %v3069_v51 = vsel %vm2157_vm1, %v3068_v30, %v3064_v13  ;;  %v3088_v53 = vrot.slane %v10208_v57, %v7768_v56  ;;  %v8274_v50 = vsel %vm2199_vm7, %v3020_v3, %v3016_v4  ;;  %v10223_v30 = vld [vmem:[#allocation106_spill] sm:$0xff]  ;;  %v10224_v15 = vld [vmem:[#allocation100_spill] sm:$0xff]  ;;  %v10225_v44 = vld [vmem:[#allocation109_spill] sm:$0xff] }
 0x34a   : > { %v3055_v36 = vsel %vm2192_vm6, %v3054_v9, %v3050_v8  ;;  %v3074_v5 = vsel %vm2164_vm2, %v3073_v35, %v3069_v51  ;;  %v3103_v62 = vrot.slane %v10209_v45, %v7756_v60  ;;  %v3093_v26 = vrot.slane %v10210_v19, %v7770_v29  ;;  %v10221_v9 = vld [vmem:[#allocation104_spill] sm:$0xff]  ;;  %v10227_v57 = vld [vmem:[#allocation110_spill] sm:$0xff]  ;;  %v10228_v45 = vld [vmem:[#allocation113_spill] sm:$0xff] }
 0x34b   : > { %v3079_v52 = vsel %vm2171_vm3, %v3078_v43, %v3074_v5  ;;  %v3107_v37 = vrot.slane %v10211_v27, %v7760_v47  ;;  %v3112_v18 = vrot.slane %v10212_v38, %v7762_v7  ;;  %v3098_v20 = vrot.slane %v10213_v23, %v7772_v39 }
 0x34c   : > { %v3084_v28 = vsel %vm2178_vm4, %v3083_v11, %v3079_v52  ;;  %v3117_v25 = vrot.slane %v10214_v55, %v7764_v63  ;;  %v3122_v59 = vrot.slane %v10215_v1, %v7766_v40  ;;  %v8295_v2 = vsel %vm2199_vm7, %v3059_v21, %v3055_v36  ;;  %v10226_v21 = vld [vmem:[#allocation111_spill] sm:$0xff]  ;;  %v10229_v52 = vld [vmem:[#allocation112_spill] sm:$0xff]  ;;  %v10233_v1 = vld [vmem:[#allocation117_spill] sm:$0xff] }
 0x34d   : > { %v3089_v46 = vsel %vm2185_vm5, %v3088_v53, %v3084_v28  ;;  %v3108_v41 = vsel %vm2157_vm1, %v3107_v37, %v3103_v62  ;;  %v3127_v12 = vrot.slane %v10216_v16, %v7768_v56  ;;  %v3132_v42 = vrot.slane %v10217_v48, %v7770_v29  ;;  %v10230_v37 = vld [vmem:[#allocation115_spill] sm:$0xff] }
 0x34e   : > { %v3113_v33 = vsel %vm2164_vm2, %v3112_v18, %v3108_v41  ;;  %v3142_v3 = vrot.slane %v10218_v24, %v7756_v60  ;;  %v3146_v6 = vrot.slane %v10219_v58, %v7760_v47  ;;  %v3094_v54 = vsel %vm2192_vm6, %v3093_v26, %v3089_v46  ;;  %v10231_v18 = vld [vmem:[#allocation114_spill] sm:$0xff]  ;;  %v10234_v16 = vld [vmem:[#allocation119_spill] sm:$0xff]  ;;  %v10236_v24 = vld [vmem:[#allocation121_spill] sm:$0xff] }
 0x34f   : > { %v3118_v0 = vsel %vm2171_vm3, %v3117_v25, %v3113_v33  ;;  %v3151_v10 = vrot.slane %v10220_v32, %v7762_v7  ;;  %v3156_v22 = vrot.slane %v10221_v9, %v7764_v63  ;;  %v3161_v31 = vrot.slane %v10222_v34, %v7766_v40  ;;  %v10235_v33 = vld [vmem:[#allocation118_spill] sm:$0xff]  ;;  %v10237_v58 = vld [vmem:[#allocation120_spill] sm:$0xff] }
 0x350   : > { %v3123_v13 = vsel %vm2178_vm4, %v3122_v59, %v3118_v0  ;;  %v3147_v4 = vsel %vm2157_vm1, %v3146_v6, %v3142_v3  ;;  %v3166_v49 = vrot.slane %v10223_v30, %v7768_v56  ;;  %v3137_v17 = vrot.slane %v10224_v15, %v7772_v39 }
 0x351   : > { %v3128_v35 = vsel %vm2185_vm5, %v3127_v12, %v3123_v13  ;;  %v3152_v43 = vsel %vm2164_vm2, %v3151_v10, %v3147_v4  ;;  %v3171_v11 = vrot.slane %v10225_v44, %v7770_v29  ;;  %v3181_v51 = vrot.slane %v10226_v21, %v7756_v60  ;;  %v10239_v10 = vld [vmem:[#allocation116_spill] sm:$0xff]  ;;  %v10240_v13 = vld [vmem:[#allocation123_spill] sm:$0xff] }
 0x352   : > { %v3133_v8 = vsel %vm2192_vm6, %v3132_v42, %v3128_v35  ;;  %v3157_v61 = vsel %vm2171_vm3, %v3156_v22, %v3152_v43  ;;  %v3185_v53 = vrot.slane %v10227_v57, %v7760_v47  ;;  %v8333_v36 = vsel %vm2199_vm7, %v3098_v20, %v3094_v54  ;;  %v10232_v20 = vld [vmem:[#allocation108_spill] sm:$0xff] }
 0x353   : > { %v3162_v5 = vsel %vm2178_vm4, %v3161_v31, %v3157_v61  ;;  %v3190_v62 = vrot.slane %v10228_v45, %v7762_v7  ;;  %v3195_v19 = vrot.slane %v10229_v52, %v7764_v63  ;;  %v3200_v38 = vrot.slane %v10230_v37, %v7766_v40  ;;  %v10238_v54 = vld [vmem:[#allocation124_spill] sm:$0xff]  ;;  %v10247_v45 = vld [vmem:[#allocation133_spill] sm:$0xff] }
 0x354   : > { %v3167_v26 = vsel %vm2185_vm5, %v3166_v49, %v3162_v5  ;;  %v3186_v27 = vsel %vm2157_vm1, %v3185_v53, %v3181_v51  ;;  %v3205_v28 = vrot.slane %v10231_v18, %v7768_v56  ;;  %v8347_v23 = vsel %vm2199_vm7, %v3137_v17, %v3133_v8  ;;  %v10241_v49 = vld [vmem:[#allocation129_spill] sm:$0xff]  ;;  %v10242_v17 = vld [vmem:[#allocation126_spill] sm:$0xff]  ;;  %v10243_v44 = vld [vmem:[#allocation128_spill] sm:$0xff] }
 0x355   : > { %v3176_v55 = vrot.slane %v10232_v20, %v7772_v39  ;;  %v3191_v25 = vsel %vm2164_vm2, %v3190_v62, %v3186_v27  ;;  %v3210_v59 = vrot.slane %v10233_v1, %v7770_v29  ;;  %v3172_v46 = vsel %vm2192_vm6, %v3171_v11, %v3167_v26  ;;  %v10244_v8 = vld [vmem:[#allocation131_spill] sm:$0xff]  ;;  %v10245_v51 = vld [vmem:[#allocation125_spill] sm:$0xff]  ;;  %v10246_v53 = vld [vmem:[#allocation130_spill] sm:$0xff] }
 0x356   : > { %v3196_v41 = vsel %vm2171_vm3, %v3195_v19, %v3191_v25  ;;  %v3220_v12 = vrot.slane %v10234_v16, %v7756_v60  ;;  %v3224_v48 = vrot.slane %v10235_v33, %v7760_v47  ;;  %v3229_v3 = vrot.slane %v10236_v24, %v7762_v7  ;;  %v10248_v27 = vld [vmem:[#allocation132_spill] sm:$0xff]  ;;  %v10250_v20 = vld [vmem:[#allocation139_spill] sm:$0xff]  ;;  %v10251_v25 = vld [vmem:[#allocation138_spill] sm:$0xff] }
 0x357   : > { %v3201_v42 = vsel %vm2178_vm4, %v3200_v38, %v3196_v41  ;;  %v3234_v6 = vrot.slane %v10237_v58, %v7764_v63  ;;  %v3239_v0 = vrot.slane %v10238_v54, %v7766_v40  ;;  %v3215_v9 = vrot.slane %v10239_v10, %v7772_v39  ;;  %v10249_v18 = vld [vmem:[#allocation136_spill] sm:$0xff]  ;;  %v10252_v41 = vld [vmem:[#allocation142_spill] sm:$0xff]  ;;  %v10254_v24 = vld [vmem:[#allocation145_spill] sm:$0xff] }
 0x358   : > { %v3206_v32 = vsel %vm2185_vm5, %v3205_v28, %v3201_v42  ;;  %v3225_v22 = vsel %vm2157_vm1, %v3224_v48, %v3220_v12  ;;  %v3244_v4 = vrot.slane %v10240_v13, %v7768_v56  ;;  %v8374_v34 = vsel %vm2199_vm7, %v3176_v55, %v3172_v46  ;;  %v10253_v12 = vld [vmem:[#allocation140_spill] sm:$0xff] }
 0x359   : > { %v3211_v31 = vsel %vm2192_vm6, %v3210_v59, %v3206_v32  ;;  %v3230_v30 = vsel %vm2164_vm2, %v3229_v3, %v3225_v22  ;;  %v3259_v35 = vrot.slane %v10241_v49, %v7756_v60  ;;  %v3249_v43 = vrot.slane %v10242_v17, %v7770_v29  ;;  %v10255_v58 = vld [vmem:[#allocation144_spill] sm:$0xff] }
 0x35a   : > { %v3235_v15 = vsel %vm2171_vm3, %v3234_v6, %v3230_v30  ;;  %v3263_v11 = vrot.slane %v10243_v44, %v7760_v47  ;;  %v3268_v61 = vrot.slane %v10244_v8, %v7762_v7  ;;  %v3254_v57 = vrot.slane %v10245_v51, %v7772_v39  ;;  %v10259_v49 = vld [vmem:[#allocation148_spill] sm:$0xff]  ;;  %v10262_v51 = vld [vmem:[#allocation153_spill] sm:$0xff] }
 0x35b   : > { %v3240_v21 = vsel %vm2178_vm4, %v3239_v0, %v3235_v15  ;;  %v3273_v5 = vrot.slane %v10246_v53, %v7764_v63  ;;  %v3278_v62 = vrot.slane %v10247_v45, %v7766_v40  ;;  %v8395_v52 = vsel %vm2199_vm7, %v3215_v9, %v3211_v31  ;;  %v10256_v0 = vld [vmem:[#allocation135_spill] sm:$0xff]  ;;  %v10258_v31 = vld [vmem:[#allocation149_spill] sm:$0xff] }
 0x35c   : > { %v3245_v19 = vsel %vm2185_vm5, %v3244_v4, %v3240_v21  ;;  %v3264_v26 = vsel %vm2157_vm1, %v3263_v11, %v3259_v35  ;;  %v3283_v37 = vrot.slane %v10248_v27, %v7768_v56  ;;  %v3288_v28 = vrot.slane %v10249_v18, %v7770_v29  ;;  %v10257_v9 = vld [vmem:[#allocation147_spill] sm:$0xff]  ;;  %v10261_v11 = vld [vmem:[#allocation150_spill] sm:$0xff]  ;;  %v10265_v27 = vld [vmem:[#allocation156_spill] sm:$0xff] }
 0x35d   : > { %v3269_v38 = vsel %vm2164_vm2, %v3268_v61, %v3264_v26  ;;  %v3298_v55 = vrot.slane %v10250_v20, %v7756_v60  ;;  %v3302_v1 = vrot.slane %v10251_v25, %v7760_v47  ;;  %v3250_v59 = vsel %vm2192_vm6, %v3249_v43, %v3245_v19  ;;  %v10260_v43 = vld [vmem:[#allocation151_spill] sm:$0xff] }
 0x35e   : > { %v3274_v46 = vsel %vm2171_vm3, %v3273_v5, %v3269_v38  ;;  %v3307_v16 = vrot.slane %v10252_v41, %v7762_v7  ;;  %v3312_v33 = vrot.slane %v10253_v12, %v7764_v63  ;;  %v3317_v3 = vrot.slane %v10254_v24, %v7766_v40  ;;  %v10263_v5 = vld [vmem:[#allocation152_spill] sm:$0xff]  ;;  %v10270_v12 = vld [vmem:[#allocation163_spill] sm:$0xff] }
 0x35f   : > { %v3279_v48 = vsel %vm2178_vm4, %v3278_v62, %v3274_v46  ;;  %v3303_v42 = vsel %vm2157_vm1, %v3302_v1, %v3298_v55  ;;  %v3322_v6 = vrot.slane %v10255_v58, %v7768_v56  ;;  %v3293_v32 = vrot.slane %v10256_v0, %v7772_v39  ;;  %v10264_v62 = vld [vmem:[#allocation146_spill] sm:$0xff]  ;;  %v10269_v41 = vld [vmem:[#allocation160_spill] sm:$0xff] }
 0x360   : > { %v3284_v54 = vsel %vm2185_vm5, %v3283_v37, %v3279_v48  ;;  %v3308_v10 = vsel %vm2164_vm2, %v3307_v16, %v3303_v42  ;;  %v3327_v22 = vrot.slane %v10257_v9, %v7770_v29  ;;  %v3337_v30 = vrot.slane %v10258_v31, %v7756_v60  ;;  %v10267_v55 = vld [vmem:[#allocation158_spill] sm:$0xff]  ;;  %v10271_v42 = vld [vmem:[#allocation155_spill] sm:$0xff] }
 0x361   : > { %v3289_v13 = vsel %vm2192_vm6, %v3288_v28, %v3284_v54  ;;  %v3313_v4 = vsel %vm2171_vm3, %v3312_v33, %v3308_v10  ;;  %v3341_v35 = vrot.slane %v10259_v49, %v7760_v47  ;;  %v8433_v15 = vsel %vm2199_vm7, %v3254_v57, %v3250_v59  ;;  %v10266_v28 = vld [vmem:[#allocation159_spill] sm:$0xff]  ;;  %v10268_v59 = vld [vmem:[#allocation122_spill] sm:$0xff]  ;;  %v10273_v10 = vld [vmem:[#allocation168_spill] sm:$0xff] }
 0x362   : > { %v3318_v17 = vsel %vm2178_vm4, %v3317_v3, %v3313_v4  ;;  %v3346_v44 = vrot.slane %v10260_v43, %v7762_v7  ;;  %v3351_v8 = vrot.slane %v10261_v11, %v7764_v63  ;;  %v3356_v53 = vrot.slane %v10262_v51, %v7766_v40  ;;  %v10272_v58 = vld [vmem:[#allocation162_spill] sm:$0xff]  ;;  %v10275_v31 = vld [vmem:[#allocation127_spill] sm:$0xff]  ;;  %v10277_v43 = vld [vmem:[#allocation164_spill] sm:$0xff] }
 0x363   : > { %v3323_v61 = vsel %vm2185_vm5, %v3322_v6, %v3318_v17  ;;  %v3342_v21 = vsel %vm2157_vm1, %v3341_v35, %v3337_v30  ;;  %v3361_v45 = vrot.slane %v10263_v5, %v7768_v56  ;;  %v8447_v57 = vsel %vm2199_vm7, %v3293_v32, %v3289_v13  ;;  %v10274_v13 = vld [vmem:[#allocation165_spill] sm:$0xff]  ;;  %v10276_v49 = vld [vmem:[#allocation174_spill] sm:$0xff]  ;;  %v10278_v11 = vld [vmem:[#allocation171_spill] sm:$0xff] }
 0x364   : > { %v3332_v19 = vrot.slane %v10264_v62, %v7772_v39  ;;  %v3347_v26 = vsel %vm2164_vm2, %v3346_v44, %v3342_v21  ;;  %v3366_v37 = vrot.slane %v10265_v27, %v7770_v29  ;;  %v3328_v38 = vsel %vm2192_vm6, %v3327_v22, %v3323_v61  ;;  %v10279_v61 = vld [vmem:[#allocation178_spill] sm:$0xff] }
 0x365   : > { %v3352_v18 = vsel %vm2171_vm3, %v3351_v8, %v3347_v26  ;;  %v3376_v20 = vrot.slane %v10266_v28, %v7756_v60  ;;  %v3380_v25 = vrot.slane %v10267_v55, %v7760_v47  ;;  %v3385_v46 = vrot.slane %v10268_v59, %v7762_v7  ;;  %v10281_v26 = vld [vmem:[#allocation183_spill] sm:$0xff]  ;;  %v10285_v59 = vld [vmem:[#allocation189_spill] sm:$0xff] }
 0x366   : > { %v3357_v1 = vsel %vm2178_vm4, %v3356_v53, %v3352_v18  ;;  %v3390_v16 = vrot.slane %v10269_v41, %v7764_v63  ;;  %v3395_v33 = vrot.slane %v10270_v12, %v7766_v40  ;;  %v3371_v24 = vrot.slane %v10271_v42, %v7772_v39  ;;  %v10283_v18 = vld [vmem:[#allocation141_spill] sm:$0xff] }
 0x367   : > { %v3362_v48 = vsel %vm2185_vm5, %v3361_v45, %v3357_v1  ;;  %v3381_v3 = vsel %vm2157_vm1, %v3380_v25, %v3376_v20  ;;  %v3400_v6 = vrot.slane %v10272_v58, %v7768_v56  ;;  %v8474_v54 = vsel %vm2199_vm7, %v3332_v19, %v3328_v38  ;;  %v10280_v45 = vld [vmem:[#allocation176_spill] sm:$0xff]  ;;  %v10286_v12 = vld [vmem:[#allocation197_spill] sm:$0xff] }
 0x368   : > { %v3367_v0 = vsel %vm2192_vm6, %v3366_v37, %v3362_v48  ;;  %v3386_v32 = vsel %vm2164_vm2, %v3385_v46, %v3381_v3  ;;  %v3415_v9 = vrot.slane %v10273_v10, %v7756_v60  ;;  %v3405_v4 = vrot.slane %v10274_v13, %v7770_v29  ;;  %v10282_v37 = vld [vmem:[#allocation187_spill] sm:$0xff]  ;;  %v10284_v25 = vld [vmem:[#allocation192_spill] sm:$0xff]  ;;  %v10287_v48 = vld [vmem:[#allocation194_spill] sm:$0xff] }
 0x369   : > { %v3391_v22 = vsel %vm2171_vm3, %v3390_v16, %v3386_v32  ;;  %v3419_v30 = vrot.slane %v10275_v31, %v7760_v47  ;;  %v3424_v35 = vrot.slane %v10276_v49, %v7762_v7  ;;  %v3410_v44 = vrot.slane %v10277_v43, %v7772_v39  ;;  %v10288_v3 = vld [vmem:[#allocation137_spill] sm:$0xff]  ;;  %v10293_v43 = vld [vmem:[#allocation210_spill] sm:$0xff] }
 0x36a   : > { %v3396_v17 = vsel %vm2178_vm4, %v3395_v33, %v3391_v22  ;;  %v3429_v8 = vrot.slane %v10278_v11, %v7764_v63  ;;  %v3434_v21 = vrot.slane %v10279_v61, %v7766_v40  ;;  %v3372_v51 = vsel %vm2199_vm7, %v3371_v24, %v3367_v0  ;;  %v10289_v0 = vld [vmem:[#allocation202_spill] sm:$0xff]  ;;  %v10290_v22 = vld [vmem:[#allocation207_spill] sm:$0xff] }
 0x36b   : > { %v3401_v53 = vsel %vm2185_vm5, %v3400_v6, %v3396_v17  ;;  %v3420_v5 = vsel %vm2157_vm1, %v3419_v30, %v3415_v9  ;;  %v3439_v62 = vrot.slane %v10280_v45, %v7768_v56  ;;  %v3444_v27 = vrot.slane %v10281_v26, %v7770_v29 }
 0x36c   : > { %v3425_v19 = vsel %vm2164_vm2, %v3424_v35, %v3420_v5  ;;  %v3454_v38 = vrot.slane %v10282_v37, %v7756_v60  ;;  %v3458_v28 = vrot.slane %v10283_v18, %v7760_v47  ;;  %v3406_v20 = vsel %vm2192_vm6, %v3405_v4, %v3401_v53  ;;  %v10291_v4 = vld [vmem:[#allocation204_spill] sm:$0xff]  ;;  %v10295_v5 = vld [vmem:[#allocation215_spill] sm:$0xff] }
 0x36d   : > { %v3430_v55 = vsel %vm2171_vm3, %v3429_v8, %v3425_v19  ;;  %v3463_v1 = vrot.slane %v10284_v25, %v7762_v7  ;;  %v3468_v46 = vrot.slane %v10285_v59, %v7764_v63  ;;  %v3473_v33 = vrot.slane %v10286_v12, %v7766_v40  ;;  %v10292_v35 = vld [vmem:[#allocation212_spill] sm:$0xff]  ;;  %v10302_v12 = vld [vmem:[#allocation161_spill] sm:$0xff] }
 0x36e   : > { %v3435_v41 = vsel %vm2178_vm4, %v3434_v21, %v3430_v55  ;;  %v3459_v16 = vsel %vm2157_vm1, %v3458_v28, %v3454_v38  ;;  %v3478_v42 = vrot.slane %v10287_v48, %v7768_v56  ;;  %v3449_v58 = vrot.slane %v10288_v3, %v7772_v39  ;;  %v10294_v21 = vld [vmem:[#allocation219_spill] sm:$0xff]  ;;  %v10298_v28 = vld [vmem:[#allocation205_spill] sm:$0xff]  ;;  %v10300_v59 = vld [vmem:[#allocation208_spill] sm:$0xff] }
 0x36f   : > { %v3440_v24 = vsel %vm2185_vm5, %v3439_v62, %v3435_v41  ;;  %v3464_v6 = vsel %vm2164_vm2, %v3463_v1, %v3459_v16  ;;  %v3483_v32 = vrot.slane %v10289_v0, %v7770_v29  ;;  %v3493_v13 = vrot.slane %v10290_v22, %v7756_v60  ;;  %v10296_v62 = vld [vmem:[#allocation154_spill] sm:$0xff]  ;;  %v10299_v55 = vld [vmem:[#allocation227_spill] sm:$0xff] }
 0x370   : > { %v3445_v10 = vsel %vm2192_vm6, %v3444_v27, %v3440_v24  ;;  %v3469_v9 = vsel %vm2171_vm3, %v3468_v46, %v3464_v6  ;;  %v3497_v31 = vrot.slane %v10291_v4, %v7760_v47  ;;  %v3411_v30 = vsel %vm2199_vm7, %v3410_v44, %v3406_v20  ;;  %v10297_v27 = vld [vmem:[#allocation224_spill] sm:$0xff]  ;;  %v10301_v41 = vld [vmem:[#allocation203_spill] sm:$0xff]  ;;  %v10305_v6 = vld [vmem:[#allocation157_spill] sm:$0xff] }
 0x371   : > { %v3474_v49 = vsel %vm2178_vm4, %v3473_v33, %v3469_v9  ;;  %v3502_v17 = vrot.slane %v10292_v35, %v7762_v7  ;;  %v3507_v11 = vrot.slane %v10293_v43, %v7764_v63  ;;  %v3512_v53 = vrot.slane %v10294_v21, %v7766_v40 }
 0x372   : > { %v3479_v8 = vsel %vm2185_vm5, %v3478_v42, %v3474_v49  ;;  %v3498_v61 = vsel %vm2157_vm1, %v3497_v31, %v3493_v13  ;;  %v3517_v45 = vrot.slane %v10295_v5, %v7768_v56  ;;  %v3450_v44 = vsel %vm2199_vm7, %v3449_v58, %v3445_v10  ;;  %v10303_v42 = vld [vmem:[#allocation166_spill] sm:$0xff]  ;;  %v2814_v31 = vld [vmem:[#allocation3] sm:$0xff]  ;;  %v3704_v5 = vld [vmem:[%s8713_s2 + $0x8] sm:$0xff] (!%p3946_p4) }
 0x373   : > { %v3488_v19 = vrot.slane %v10296_v62, %v7772_v39  ;;  %v3503_v26 = vsel %vm2164_vm2, %v3502_v17, %v3498_v61  ;;  %v3522_v37 = vrot.slane %v10297_v27, %v7770_v29  ;;  %v3484_v38 = vsel %vm2192_vm6, %v3483_v32, %v3479_v8  ;;  %v10306_v32 = vld [vmem:[#allocation213_spill] sm:$0xff]  ;;  %v3593_v61 = vld [vmem:[#allocation2 + $0x8] sm:$0xff] (!%p3946_p4) }
 0x374   : > { %v3508_v18 = vsel %vm2171_vm3, %v3507_v11, %v3503_v26  ;;  %v3532_v20 = vrot.slane %v10298_v28, %v7756_v60  ;;  %v3536_v25 = vrot.slane %v10299_v55, %v7760_v47  ;;  %v3541_v46 = vrot.slane %v10300_v59, %v7762_v7  ;;  %v10304_v47 = vld [vmem:[#allocation211_spill] sm:$0xff]  ;;  %v3706_v26 = vld [vmem:[%s8713_s2 + $0x18] sm:$0xff] (!%p3946_p4) }
 0x375   : > { %v3513_v1 = vsel %vm2178_vm4, %v3512_v53, %v3508_v18  ;;  %v3546_v16 = vrot.slane %v10301_v41, %v7764_v63  ;;  %v3551_v33 = vrot.slane %v10302_v12, %v7766_v40  ;;  %v3527_v24 = vrot.slane %v10303_v42, %v7772_v39  ;;  %v3703_v53 = vld [vmem:[%s8713_s2] sm:$0xff] (!%p3946_p4)  ;;  %v3708_v18 = vld [vmem:[%s8713_s2 + $0x28] sm:$0xff] (!%p3946_p4)  ;;  %v3710_v55 = vld [vmem:[%s8713_s2 + $0x38] sm:$0xff] (!%p3946_p4) }
 0x376   : > { %v3518_v48 = vsel %vm2185_vm5, %v3517_v45, %v3513_v1  ;;  %v3537_v60 = vsel %vm2157_vm1, %v3536_v25, %v3532_v20  ;;  %v3556_v3 = vrot.slane %v10304_v47, %v7768_v56  ;;  %v3561_v63 = vrot.slane %v10305_v6, %v7770_v29  ;;  %v3709_v20 = vld [vmem:[%s8713_s2 + $0x30] sm:$0xff] (!%p3946_p4) }
 0x377   : > { %v3523_v58 = vsel %vm2192_vm6, %v3522_v37, %v3518_v48  ;;  %v3542_v7 = vsel %vm2164_vm2, %v3541_v46, %v3537_v60  ;;  %v3568_v40 = vsel %vm2786_vm8, %v8274_v50, %v8260_v14  ;;  %v3566_v10 = vrot.slane %v10306_v32, %v7772_v39 }
 0x378   : > { %v3547_v0 = vsel %vm2171_vm3, %v3546_v16, %v3542_v7  ;;  %v3569_v9 = vsel %vm2788_vm9, %v8295_v2, %v3568_v40  ;;  %v3575_v56 = vsel %vm2786_vm8, %v8474_v54, %v8447_v57  ;;  %v3489_v22 = vsel %vm2199_vm7, %v3488_v19, %v3484_v38  ;;  %v3707_v38 = vld [vmem:[%s8713_s2 + $0x20] sm:$0xff] (!%p3946_p4) }
 0x379   : > { %v3552_v29 = vsel %vm2178_vm4, %v3551_v33, %v3547_v0  ;;  %v3570_v13 = vsel %vm2790_vm10, %v8333_v36, %v3569_v9  ;;  %v3576_v14 = vsel %vm2788_vm9, %v3372_v51, %v3575_v56  ;;  %v3528_v50 = vsel %vm2199_vm7, %v3527_v24, %v3523_v58  ;;  %v2815_v36 = vld [vmem:[#allocation3 + $0x8] sm:$0xff] }
 0x37a   : > { %v3557_v39 = vsel %vm2185_vm5, %v3556_v3, %v3552_v29  ;;  %v3571_v2 = vsel %vm2792_vm11, %v8347_v23, %v3570_v13  ;;  %v3577_v4 = vsel %vm2790_vm10, %v3411_v30, %v3576_v14  ;;  %vm3711_vm0 = vcmask (!%p3946_p4), 31744  }
 0x37b   : > { %v3562_v57 = vsel %vm2192_vm6, %v3561_v63, %v3557_v39  ;;  %v3572_v54 = vsel %vm2794_vm12, %v8374_v34, %v3571_v2  ;;  %v3578_v49 = vsel %vm2792_vm11, %v3450_v44, %v3577_v4  ;;  %3591 = sbr.rel (%p3946_p4) target bundleno = 1361 (0x551), region = 48  ;;  %v3598_v34 = vld [vmem:[#allocation7] sm:$0xf] (!%p3946_p4)  ;;  %v3595_v21 = vmul.f32 (!%p3946_p4), 0.0009765625, %v3593_v61  ;;  %vm8617_vm1 = vmpackc.low (!%p3946_p4), %vm3711_vm0, %vm3711_vm0  ;;  %v3705_v44 = vld [vmem:[%s8713_s2 + $0x10] sm:$0xff] (!%p3946_p4) }
 0x37c   : > { %v3567_v51 = vsel %vm2199_vm7, %v3566_v10, %v3562_v57  ;;  %v3573_v35 = vsel %vm2796_vm13, %v8395_v52, %v3572_v54  ;;  %v3579_v17 = vsel %vm2794_vm12, %v3489_v22, %v3578_v49  ;;  %v3592_v52 = vld [vmem:[#allocation2] sm:$0xff] (!%p3946_p4)  ;;  %3988 = vmatprep.subr.msk.mxu0 (!%p3946_p4), %vm2811_vm15, %v3598_v34  ;;  %v4018_v19 = vpack.c.bf16 (!%p3946_p4), %v3704_v5, %v3703_v53 }
 0x37d   : > { %v3574_v23 = vsel %vm2798_vm14, %v8433_v15, %v3573_v35  ;;  %v3580_v30 = vsel %vm2796_vm13, %v3528_v50, %v3579_v17  ;;  %v3594_v15 = vmul.f32 (!%p3946_p4), 0.0009765625, %v3592_v52  ;;  %3989 = vmatpush3.xpose.msk.msra.mxu0 (!%p3946_p4), %vm2811_vm15, %v3598_v34  ;;  %v4024_v27 = vpack.c.bf16 (!%p3946_p4), %v3706_v26, %v3705_v44 }
 0x37e   : > { %v3581_v43 = vsel %vm2798_vm14, %v3567_v51, %v3580_v30  ;;  %v3584_v11 = vmax.f32 %v2814_v31, %v3574_v23  ;;  %4020 = vmatprep.subr.msk.bf16.mxu1 (!%p3946_p4), %vm8617_vm1, %v4018_v19  ;;  %v4030_v28 = vpack.c.bf16 (!%p3946_p4), %v3708_v18, %v3707_v38  ;;  %v4036_v25 = vpack.c.bf16 (!%p3946_p4), %v3710_v55, %v3709_v20 }
 0x37f   : > { %v3585_v8 = vmax.f32 %v2815_v36, %v3581_v43  ;;  %3990 = vmatprep.mubr.msk.f32.mxu0 (!%p3946_p4), %vm2811_vm15, %v3594_v15  ;;  %4023 = vmatpush3.bf16.xpose.msk.msra.mxu1 (!%p3946_p4), %vm8617_vm1, %v4018_v19 }
 0x380   : > { %3586 = vst.msk [vmem:[#allocation3] sm:$0xff] %vm2811_vm15, %v3584_v11  ;;  %3991 = vmatmul.mubr.msk.f32.vlgmr.msra.gmra.mrb[0].mxu0 (!%p3946_p4), %vm2811_vm15, %v3595_v21  ;;  %4026 = vmatprep.subr.msk.bf16.mxu1 (!%p3946_p4), %vm8617_vm1, %v4024_v27 }
 0x381   : > { %3587 = vst.msk [vmem:[#allocation3 + $0x8] sm:$0xff] %vm2811_vm15, %v3585_v8 }
 0x387   : > { %v3596_v62 = vld [vmem:[#allocation3] sm:$0xff]  ;;  %4029 = vmatpush3.bf16.xpose.msk.msra.mxu1 %vm8617_vm1, %v4024_v27 }
 0x388   : > { %3993 = vmatprep.mubr.msk.f32.mxu0 %vm2811_vm15, %v3596_v62  ;;  %v3597_v37 = vld [vmem:[#allocation3 + $0x8] sm:$0xff]  ;;  %4032 = vmatprep.subr.msk.bf16.mxu1 %vm8617_vm1, %v4030_v28 }
 0x389   : > { %3994 = vmatmul.mubr.msk.f32.gmra.mrb[2].mxu0 %vm2811_vm15, %v3597_v37 }
 0x38f   : > { %4035 = vmatpush3.bf16.xpose.msk.msra.mxu1 %vm8617_vm1, %v4030_v28 }
 0x390   : > { %4038 = vmatprep.subr.msk.bf16.mxu1 %vm8617_vm1, %v4036_v25 }
 0x397   : > { %4041 = vmatpush3.bf16.xpose.msk.msra.mxu1 %vm8617_vm1, %v4036_v25 }
 0x453   : > { %v3992_v1 = vpop.f32.mrb[0].mxu0 }
 0x454   : > { %v3680_v59 = vpop.f32.mrb[1].mxu0  ;;  %v3700_v41 = vmax.f32 %v3992_v1, 0.0 }
 0x455   : > { %v3699_v46 = vmax.f32 %v3680_v59, 0.0 }
 0x457   : > { %4012 = vmatprep.mubr.msk.f32.mxu1 %vm3711_vm0, %v3699_v46 }
 0x458   : > { %4013 = vmatmul.mubr.msk.f32.vlgmr.msra.gmra.mrb[0].mxu1 %vm3711_vm0, %v3700_v41 }
 0x45c   : > { %v3995_v16 = vpop.f32.mrb[2].mxu0 }
 0x45d   : > { %v3690_v12 = vpop.f32.mrb[3].mxu0  ;;  %v3702_v48 = vmax.f32 %v3995_v16, 0.0 }
 0x45e   : > { %v3701_v33 = vmax.f32 %v3690_v12, 0.0 }
 0x460   : > { %4015 = vmatprep.mubr.msk.f32.mxu1 %vm3711_vm0, %v3701_v33 }
 0x461   : > { %4016 = vmatmul.mubr.msk.f32.gmra.mrb[0].mxu1 %vm3711_vm0, %v3702_v48 }
 0x534   : > { %v4017_v42 = vpop.f32.mrb[0].mxu1 }
 0x535   : > { %v3965_v24 = vmul.f32 -1.442695, %v4017_v42  ;;  %v3824_v60 = vpop.f32.mrb[1].mxu1 }
 0x536   : > { %v3964_v47 = vmul.f32 -1.442695, %v3824_v60 }
 0x537   : > { %4124 = vpow2.f32 %v3965_v24 }
 0x538   : > { %4126 = vpow2.f32 %v3964_v47 }
 0x541   : > { %v4125_v3 = vpop.eup %4124 }
 0x542   : > { %v4127_v58 = vpop.eup %4126  ;;  %v3842_v7 = vadd.f32 1.0, %v4125_v3 }
 0x543   : > { %v3841_v6 = vadd.f32 1.0, %v4127_v58 }
 0x544   : > { %4128 = vrcp.f32 %v3842_v7 }
 0x545   : > { %4130 = vrcp.f32 %v3841_v6 }
 0x54e   : > { %v4129_v63 = vpop.eup %4128 }
 0x54f   : > { %v4131_v40 = vpop.eup %4130  ;;  %3848 = vst.msk [vmem:[#allocation9 + $0x8] sm:$0xff] %vm2811_vm15, %v4129_v63 }
 0x550   : > { %3847 = vst.msk [vmem:[#allocation9] sm:$0xff] %vm2811_vm15, %v4131_v40 }
 0x551 PF: > { %p8667_p7 = scmp.eq.s32.totalorder %s3935_s18, 1  ;;  %s4283_s9 = smov [#allocation9]  }
 0x552   : > { %s3858_s10 = sshll.u32 %s4283_s9, 4  ;;  %s3859_s10 = int_to_ptr.vmem [resolvable:$true] %s3858_s10 }
 0x553   : > { %s4190_s12 = scalar_lea.vmem %s3859_s10, 256  ;;  %p4197_p6 = scmp.lt.s32.totalorder %s3859_s10, %s3859_s10 }
 0x554   : > { %p4191_p9 = scmp.ne.s32.totalorder %s3859_s10, %s4190_s12  ;;  %p4198_p8 = scmp.lt.s32.totalorder %s4190_s12, %s4190_s12 }
 0x556   : > { %p4192_p10 = pnand %p4191_p9, %p8667_p7  ;;  %p4199_p13 = por %p4198_p8, %p4197_p6 }
 0x558   : > { %p4193_p3 = pneg %p4192_p10 }
 0x55a   : > { %p4200_p1 = pnand %p4199_p13, %p4193_p3 }
 0x55c   : > { %4203 = shalt.err (!%p4200_p1)
}
 0x55d   : > { %s4204_s18 = scalar_lea.hbm %s8714_s3, 256 }
 0x55e   : > { %p4205_p2 = scmp.ne.s32.totalorder %s8714_s3, %s4204_s18  ;;  %p4210_p5 = scmp.lt.u32.totalorder %s4204_s18, %s8714_s3 }
 0x560   : > { %p4206_p12 = pnand %p4205_p2, %p8667_p7 }
 0x562   : > { %p4207_p0 = pneg %p4206_p12 }
 0x564   : > { %p4212_p11 = pnand %p4210_p5, %p4207_p0 }
 0x566   : > { %4215 = shalt.err (!%p4212_p11)
}
 0x567   : > { %s4284_s4 = smov 128   ;;  %s4285_s6 = smov 8  }
 0x568   : > { %4051 = dma.vmem_to_hbm [thread:$0]  (%p8667_p7), %s3859_s10, 256, %s8714_s3, [#allocation6], %s4284_s4, %s4284_s4, %s4285_s6  }
 0x569   : > { %4249 = dma.done.wait (%p8667_p7), [#allocation6], 256  }
 0x56a   : > { %4251 = vsyncadd (%p8667_p7), [#allocation6], 4294967040 }
 0x56b PF: > { %s18_s17 = sadd.s32 1, %s4274_s17   ;;  %s10310_s12 = smov %s4258_s13 }
 0x56c   : > { %p15_p4 = scmp.ge.s32.totalorder %s18_s17, 4   ;;  %s10311_s13 = smov %s4262_s14 }
 0x56d   : > { %s10312_s14 = smov %s4406_s5  ;;  %s10313_s15 = smov %s4270_s16 }
 0x56e   : > { %s10314_s16 = smov %s10316_s11  ;;  %17 = sbr.rel (!%p15_p4) target bundleno = 6 (0x6), region = 82 }
 0x575   :  { %3874 = vsyncpa [#allocation5], 1 }
 0x576   :  { %3876 = vsyncpa [#allocation5 + $0x1], 1 }
 0x577   :  { %3877 = vsyncpa [#allocation8], 1 }
 0x578   :  { %3878 = vsyncpa [#allocation6], 1 }
 0x579   :  { %3880 = vsyncpa [#allocation6 + $0x1], 1 }

</bundles_post_ra>
